<compile_context>
chip_gen: v6e
topology: v6e:2x2x1
jax: 0.10.0
libtpu: 0.0.40
codegen_flags: <defaults>
</compile_context>

<pallas_src>
import functools
import math

import jax
import jax.numpy as jnp
import numpy as np
from jax import lax
from jax.experimental import pallas as pl
from jax.experimental.pallas import tpu as pltpu

EMBEDDING_SIZE = 100
NUM_FILTERS = 10
WINDOW_SIZES = (1, 2, 3)


def _round_up(x, m):
    return (x + m - 1) // m * m


def _device_kind():
    try:
        return jax.devices()[0].device_kind.lower()
    except Exception:
        return ""


def _vmem_capacity_bytes():
    try:
        cap = getattr(pltpu.get_tpu_info(), "vmem_capacity_bytes", None)
        if cap:
            return int(cap)
    except Exception:
        pass
    return 64 * 1024 * 1024          # conservative fallback (v7x per-core VMEM)


def _softmax_last(s):
    m = jnp.max(s, axis=-1, keepdims=True)
    e = jnp.exp(s - m)
    return e * pl.reciprocal(jnp.sum(e, axis=-1, keepdims=True), approx=True)


def _cnn_attn_kernel(aw_ref, x_ref, wc_ref, bc_ref, wl_ref, bl_ref, out_ref,
                     add_sc_ref, *, tanh_dtype, query_chunk):
    F = NUM_FILTERS
    x = x_ref[...]                                   # (Bt, S, Ep) f32
    Bt, S, Ep = x.shape
    QC = query_chunk
    n_chunks = S // QC

    # ---- dot-product attention scores (f32 MXU; softmax exponent is sensitive)
    scores = jnp.einsum('bie,bje->bij', x, x,
                        preferred_element_type=jnp.float32)       # (Bt, S, S)

    # ---- additive scores sum_e tanh(x_i + x_j): QC query rows per fori_loop
    # iteration, written as (Bt, QC, S) slabs into a VMEM scratch so live ranges
    # and trace size stay bounded for long S.  tanh in bf16 on v6e/v7x (bf16 EUP
    # path), f32 on v5e; the E-reduction always accumulates in f32.  Zero-padded
    # embedding lanes contribute tanh(0) = 0, so padding is exact.
    def _add_score_chunk(c, carry):
        i0 = pl.multiple_of(c * QC, QC)
        xq = x_ref[:, pl.ds(i0, QC), :]                           # (Bt, QC, Ep)
        rows = []
        for r in range(QC):
            t = jnp.tanh((xq[:, r:r + 1, :] + x).astype(tanh_dtype))
            rows.append(jnp.sum(t.astype(jnp.float32), axis=-1)[:, None, :])
        add_sc_ref[:, pl.ds(i0, QC), :] = jnp.concatenate(rows, axis=1)
        return carry

    lax.fori_loop(0, n_chunks, _add_score_chunk, 0, unroll=True)
    add_scores = add_sc_ref[...]                                  # (Bt, S, S)

    # combined probability matrix: sum_i w_i (P_i @ x) == (sum_i w_i P_i) @ x
    inv_sqrt_d = 1.0 / math.sqrt(EMBEDDING_SIZE)
    p = (aw_ref[0] * _softmax_last(scores)
         + aw_ref[1] * _softmax_last(add_scores)
         + aw_ref[2] * _softmax_last(scores * inv_sqrt_d))        # (Bt, S, S) f32

    # ---- value contraction.  K = S is tiny, so a batched MXU einsum is bound by
    # per-batch RHS reloads; use S broadcast multiply-adds on the VPU instead
    # (f32 throughout, which also buys back accuracy margin).
    if S <= 16:
        attn = p[:, :, 0:1] * x[:, 0:1, :]
        for j in range(1, S):
            attn = attn + p[:, :, j:j + 1] * x[:, j:j + 1, :]
    else:
        attn = jnp.einsum('bij,bje->bie',
                          p.astype(jnp.bfloat16), x.astype(jnp.bfloat16),
                          preferred_element_type=jnp.float32)
    y = x + attn                                                  # (Bt, S, Ep) f32

    # ---- fused conv matmul: all (window, kernel-row) pairs in one MXU pass ----
    m = jnp.dot(y.reshape(Bt * S, Ep).astype(jnp.bfloat16), wc_ref[...],
                preferred_element_type=jnp.float32)               # (Bt*S, 6F)
    m = m.reshape(Bt, S, 6 * F)

    bc = bc_ref[...]                                              # (1, 3F)
    z1 = jnp.zeros((Bt, 1, F), jnp.float32)
    z2 = jnp.zeros((Bt, 2, F), jnp.float32)

    # ws = 1 (no padding)
    out1 = jnp.maximum(m[:, :, 0:F] + bc[:, 0:F], 0.0)
    pool1 = jnp.max(out1, axis=1)                                 # (Bt, F)

    # ws = 2, pad = 1: out[t] = M0_pad[t] + M1_pad[t+1], t in [0, S]
    m20, m21 = m[:, :, F:2 * F], m[:, :, 2 * F:3 * F]
    out2 = jnp.maximum(jnp.concatenate([z1, m20], axis=1)
                       + jnp.concatenate([m21, z1], axis=1)
                       + bc[:, F:2 * F], 0.0)
    pool2 = jnp.max(out2, axis=1)

    # ws = 3, pad = 2: out[t] = M0_pad[t] + M1_pad[t+1] + M2_pad[t+2]
    m30, m31, m32 = m[:, :, 3 * F:4 * F], m[:, :, 4 * F:5 * F], m[:, :, 5 * F:6 * F]
    out3 = jnp.maximum(jnp.concatenate([z2, m30], axis=1)
                       + jnp.concatenate([z1, m31, z1], axis=1)
                       + jnp.concatenate([m32, z2], axis=1)
                       + bc[:, 2 * F:3 * F], 0.0)
    pool3 = jnp.max(out3, axis=1)

    pooled = jnp.concatenate([pool1, pool2, pool3], axis=-1)      # (Bt, 3F)

    # TODO(synk): nn.Dropout(0.2) is identity in eval mode; no stochastic dropout.
    # final Linear, emitted lane-dense as (C, Bt)
    logits = lax.dot_general(wl_ref[...], pooled, (((1,), (1,)), ((), ())),
                             preferred_element_type=jnp.float32) + bl_ref[...]
    out_ref[...] = logits


def _select_batch_tile(B, S, Ep, F, block_b, vmem_limit, tanh_bytes, QC, two_tc):
    """Pick the batch tile Bt (and padded batch) from an explicit VMEM formula."""
    B8 = _round_up(B, 8)
    S8, S128 = _round_up(S, 8), _round_up(S, 128)
    per_row = (
        2 * S8 * Ep * 4                            # double-buffered x input block
        + 2 * S8 * Ep * 4                          # y / attention accumulator
        + 6 * S8 * S128 * 4                        # scores, add_scores, exp, p temps
        + QC * S8 * Ep * tanh_bytes                # additive-attention tanh chunk
        + S8 * _round_up(6 * F, 128) * 4           # fused conv matmul result
        + 4 * (S8 + 2) * _round_up(F, 128) * 4     # relu / shift-add / max-pool chain
        + 2 * 8 * 4                                # double-buffered logits column
    )
    budget = int(vmem_limit * 0.75)                # headroom: weights + compiler scratch
    bt_cap = max(128, (budget // per_row) // 128 * 128)
    bt = max(128, (min(block_b, bt_cap) // 128) * 128)

    if B8 < 256 or (not two_tc and B8 <= bt):
        return B8, B8                              # one full-extent (lane-dense) block
    if two_tc:
        # keep >= 2 grid steps so the "parallel" batch axis can shard across
        # both v7x TensorCores (a single-step grid leaves one TC idle)
        bt = min(bt, max(128, _round_up((B8 + 1) // 2, 128)))
    b_pad = _round_up(B8, bt)
    return bt, b_pad


def cnn_text_classifier_forward(src, params, *, block_b=1024):
    """Pallas-backed forward. Returns (logits (B, C), 0) like the PyTorch module."""
    B, S, E = src.shape
    assert E == EMBEDDING_SIZE
    F = NUM_FILTERS
    C = params["linear_b"].shape[0]
    Ep = _round_up(E, 128)                         # full 128-lane vreg width

    kind = _device_kind()
    # bf16 EUP path exists on v6e / v7x; v5e (and unknown chips) stay f32.
    use_bf16_tanh = ("v6" in kind) or ("v7" in kind) or ("7x" in kind)
    two_tc = ("v7" in kind) or ("7x" in kind)
    tanh_dtype = jnp.bfloat16 if use_bf16_tanh else jnp.float32

    QC = 8 if S % 8 == 0 else S                    # query rows per additive-score chunk

    vmem_cap = _vmem_capacity_bytes()
    vmem_limit = min(int(vmem_cap * 0.85), 112 * 1024 * 1024)

    Bt, B_pad = _select_batch_tile(B, S, Ep, F, block_b, vmem_limit,
                                   2 if use_bf16_tanh else 4, QC, two_tc)
    nsteps = B_pad // Bt

    # attention mixing weights, pre-normalized on host (no in-kernel divides)
    aw = params["attention_weights"].astype(jnp.float32)
    aw_norm = aw / jnp.sum(aw)

    # fused conv weight (Ep, 6F) bf16; column order [w1r0 | w2r0 w2r1 | w3r0 w3r1 w3r2]
    cols = []
    for ws in WINDOW_SIZES:
        w = params[f"conv{ws}_w"][:, 0]            # (F, ws, E)
        for r in range(ws):
            cols.append(w[:, r, :].T)              # (E, F)
    wconv = jnp.concatenate(cols, axis=-1)         # (E, 6F)
    wconv = jnp.pad(wconv, ((0, Ep - E), (0, 0))).astype(jnp.bfloat16)
    bconv = jnp.concatenate(
        [params[f"conv{ws}_b"] for ws in WINDOW_SIZES]).reshape(1, 3 * F).astype(jnp.float32)
    wl = params["linear_w"].astype(jnp.float32)    # (C, 3F)
    bl = params["linear_b"].reshape(C, 1).astype(jnp.float32)

    # TODO(synk): x could be streamed as bf16 to halve the HBM read on v5e; kept
    # f32 so the dot-product scores / softmax path stays exact.
    x = jnp.pad(src.astype(jnp.float32), ((0, B_pad - B), (0, 0), (0, Ep - E)))

    kernel = functools.partial(_cnn_attn_kernel, tanh_dtype=tanh_dtype,
                               query_chunk=QC)

    cost = pl.CostEstimate(
        flops=int(2 * B_pad * S * Ep * (2 * S + 6 * F) + 2 * B_pad * 3 * F * C),
        transcendentals=int(B_pad * S * S * (Ep + 3)),   # tanh + 3 softmax exps
        bytes_accessed=int(B_pad * S * Ep * 4 + C * B_pad * 4
                           + Ep * 6 * F * 2 + (C * 3 * F + C + 3 * F + 3) * 4),
    )

    out = pl.pallas_call(
        kernel,
        out_shape=jax.ShapeDtypeStruct((C, B_pad), jnp.float32),
        grid=(nsteps,),
        in_specs=[
            pl.BlockSpec(memory_space=pltpu.MemorySpace.SMEM),   # aw_norm (3,)
            pl.BlockSpec((Bt, S, Ep), lambda b: (b, 0, 0)),      # src rows
            pl.BlockSpec((Ep, 6 * F), lambda b: (0, 0)),         # fused conv weight
            pl.BlockSpec((1, 3 * F), lambda b: (0, 0)),          # conv biases
            pl.BlockSpec((C, 3 * F), lambda b: (0, 0)),          # linear weight
            pl.BlockSpec((C, 1), lambda b: (0, 0)),              # linear bias
        ],
        out_specs=pl.BlockSpec((C, Bt), lambda b: (0, b)),       # lane-dense logits
        scratch_shapes=[pltpu.VMEM((Bt, S, S), jnp.float32)],    # additive scores
        compiler_params=pltpu.CompilerParams(
            dimension_semantics=("parallel",),
            vmem_limit_bytes=vmem_limit),
        cost_estimate=cost,
    )(aw_norm, x, wconv, bconv, wl, bl)

    return out[:, :B].T, 0


def init_params(key, num_classes):
    """Deterministic synthetic parameters with the module's shapes."""
    keys = jax.random.split(key, 8)
    params = {"attention_weights": jnp.ones((3,), jnp.float32)}
    i = 0
    for ws in WINDOW_SIZES:
        fan_in = 1 * ws * EMBEDDING_SIZE
        bound = 1.0 / math.sqrt(fan_in)
        params[f"conv{ws}_w"] = jax.random.uniform(
            keys[i], (NUM_FILTERS, 1, ws, EMBEDDING_SIZE), jnp.float32, -bound, bound)
        params[f"conv{ws}_b"] = jax.random.uniform(
            keys[i + 1], (NUM_FILTERS,), jnp.float32, -bound, bound)
        i += 2
    in_f = len(WINDOW_SIZES) * NUM_FILTERS
    bound = 1.0 / math.sqrt(in_f)
    params["linear_w"] = jax.random.uniform(
        keys[i], (num_classes, in_f), jnp.float32, -bound, bound)
    params["linear_b"] = jax.random.uniform(
        keys[i + 1], (num_classes,), jnp.float32, -bound, bound)
    return params


def reference_forward(src, params):
    """Pure-JAX reference reproducing the PyTorch forward (eval mode)."""
    x = src.astype(jnp.float32)
    B, S, E = x.shape

    def softmax(s):
        m = jnp.max(s, -1, keepdims=True)
        e = jnp.exp(s - m)
        return e / jnp.sum(e, -1, keepdims=True)

    scores = jnp.einsum('bie,bje->bij', x, x)
    a_dot = jnp.einsum('bij,bje->bie', softmax(scores), x)
    add_sc = jnp.sum(jnp.tanh(x[:, :, None, :] + x[:, None, :, :]), -1)
    a_add = jnp.einsum('bij,bje->bie', softmax(add_sc), x)
    a_sdp = jnp.einsum('bij,bje->bie', softmax(scores / math.sqrt(E)), x)
    aw = params["attention_weights"]
    w = aw / aw.sum()
    y = x + w[0] * a_dot + w[1] * a_add + w[2] * a_sdp

    pooled = []
    for ws in WINDOW_SIZES:
        wc = params[f"conv{ws}_w"][:, 0]                         # (F, ws, E)
        bc = params[f"conv{ws}_b"]
        pad = ws - 1
        L = S + ws - 1
        ypad = jnp.pad(y, ((0, 0), (pad, pad), (0, 0)))
        out = jnp.broadcast_to(bc[None, None, :], (B, L, NUM_FILTERS))
        for r in range(ws):
            out = out + jnp.einsum('ble,fe->blf', ypad[:, r:r + L], wc[:, r, :])
        out = jnp.maximum(out, 0.0)
        pooled.append(jnp.max(out, axis=1))                      # (B, F)
    cat = jnp.concatenate(pooled, axis=1)                        # (B, 3F)
    return cat @ params["linear_w"].T + params["linear_b"][None, :], 0


if __name__ == "__main__":
    key = jax.random.PRNGKey(0)
    k_x, k_p = jax.random.split(key)
    B, S, num_classes = 2, 8, 4
    src = jax.random.normal(k_x, (B, S, EMBEDDING_SIZE), jnp.float32)
    params = init_params(k_p, num_classes)

    logits, _ = cnn_text_classifier_forward(src, params)
    logits = jax.block_until_ready(logits)

    ref_logits, _ = reference_forward(src, params)
    np.testing.assert_allclose(np.asarray(logits), np.asarray(ref_logits),
                               rtol=2e-2, atol=2e-2)
    print("KERNEL_OK")
</pallas_src>

<mosaic_0001>
module attributes {stable_mosaic.version = 11 : i64} {
  func.func @_cnn_attn_kernel(%arg0: i32, %arg1: memref<3xf32, #tpu.memory_space<smem>>, %arg2: memref<8x8x128xf32, #tpu.memory_space<vmem>>, %arg3: memref<128x60xbf16, #tpu.memory_space<vmem>>, %arg4: memref<1x30xf32, #tpu.memory_space<vmem>>, %arg5: memref<4x30xf32, #tpu.memory_space<vmem>>, %arg6: memref<4x1xf32, #tpu.memory_space<vmem>>, %arg7: memref<4x8xf32, #tpu.memory_space<vmem>>, %arg8: memref<8x8x8xf32, #tpu.memory_space<vmem>>) attributes {dimension_semantics = [#tpu.dimension_semantics<parallel>], iteration_bounds = array<i64: 1>, scalar_prefetch = 0 : i64, scratch_operands = 1 : i64, tpu.core_type = #tpu.core_type<tc>, window_params = [{transform_indices = @transform_0, window_bounds = array<i64: 3>}, {transform_indices = @transform_1, window_bounds = array<i64: 8, 8, 128>}, {pipeline_mode = #tpu.pipeline_mode<synchronous>, transform_indices = @transform_2, window_bounds = array<i64: 128, 60>}, {pipeline_mode = #tpu.pipeline_mode<synchronous>, transform_indices = @transform_3, window_bounds = array<i64: 1, 30>}, {pipeline_mode = #tpu.pipeline_mode<synchronous>, transform_indices = @transform_4, window_bounds = array<i64: 4, 30>}, {pipeline_mode = #tpu.pipeline_mode<synchronous>, transform_indices = @transform_5, window_bounds = array<i64: 4, 1>}, {transform_indices = @transform_6, window_bounds = array<i64: 4, 8>}]} {
    %c0 = arith.constant 0 : index
    %c0_0 = arith.constant 0 : index
    %c0_1 = arith.constant 0 : index
    %0 = vector.load %arg2[%c0, %c0_0, %c0_1] : memref<8x8x128xf32, #tpu.memory_space<vmem>>, vector<8x8x128xf32>
    "tpu.trace_start"() <{level = 10 : i32, message = "bie,bje->bij"}> : () -> ()
    %cst = arith.constant dense<0.000000e+00> : vector<8x8x8xf32>
    %1 = tpu.matmul %0, %0, %cst {dimension_numbers = #tpu.dot_dimension_numbers<[2], [2], [1], [1], [0, 0, 0, 1, 1, 1], [0], [0]>} : vector<8x8x128xf32>, vector<8x8x128xf32>, vector<8x8x8xf32> -> vector<8x8x8xf32>
    "tpu.trace_stop"() : () -> ()
    %c0_i32 = arith.constant 0 : i32
    %c8_i32 = arith.constant 8 : i32
    %2 = arith.muli %c0_i32, %c8_i32 : i32
    %3 = tpu.assume_multiple %2, 8 : i32
    %c0_2 = arith.constant 0 : index
    %4 = arith.index_cast %3 : i32 to index
    %c0_3 = arith.constant 0 : index
    %5 = vector.load %arg2[%c0_2, %4, %c0_3] : memref<8x8x128xf32, #tpu.memory_space<vmem>>, vector<8x8x128xf32>
    %6 = vector.extract_strided_slice %5 {offsets = [0, 0, 0], sizes = [8, 1, 128], strides = [1, 1, 1]} : vector<8x8x128xf32> to vector<8x1x128xf32>
    %7 = vector.broadcast %6 : vector<8x1x128xf32> to vector<8x8x128xf32>
    %8 = arith.addf %7, %0 : vector<8x8x128xf32>
    %9 = math.tanh %8 : vector<8x8x128xf32>
    %cst_4 = arith.constant dense<0.000000e+00> : vector<8x8xf32>
    %10 = vector.multi_reduction <add>, %9, %cst_4 [2] : vector<8x8x128xf32> to vector<8x8xf32>
    %11 = vector.shape_cast %10 : vector<8x8xf32> to vector<8x1x8xf32>
    %12 = vector.extract_strided_slice %5 {offsets = [0, 1, 0], sizes = [8, 1, 128], strides = [1, 1, 1]} : vector<8x8x128xf32> to vector<8x1x128xf32>
    %13 = vector.broadcast %12 : vector<8x1x128xf32> to vector<8x8x128xf32>
    %14 = arith.addf %13, %0 : vector<8x8x128xf32>
    %15 = math.tanh %14 : vector<8x8x128xf32>
    %cst_5 = arith.constant dense<0.000000e+00> : vector<8x8xf32>
    %16 = vector.multi_reduction <add>, %15, %cst_5 [2] : vector<8x8x128xf32> to vector<8x8xf32>
    %17 = vector.shape_cast %16 : vector<8x8xf32> to vector<8x1x8xf32>
    %18 = vector.extract_strided_slice %5 {offsets = [0, 2, 0], sizes = [8, 1, 128], strides = [1, 1, 1]} : vector<8x8x128xf32> to vector<8x1x128xf32>
    %19 = vector.broadcast %18 : vector<8x1x128xf32> to vector<8x8x128xf32>
    %20 = arith.addf %19, %0 : vector<8x8x128xf32>
    %21 = math.tanh %20 : vector<8x8x128xf32>
    %cst_6 = arith.constant dense<0.000000e+00> : vector<8x8xf32>
    %22 = vector.multi_reduction <add>, %21, %cst_6 [2] : vector<8x8x128xf32> to vector<8x8xf32>
    %23 = vector.shape_cast %22 : vector<8x8xf32> to vector<8x1x8xf32>
    %24 = vector.extract_strided_slice %5 {offsets = [0, 3, 0], sizes = [8, 1, 128], strides = [1, 1, 1]} : vector<8x8x128xf32> to vector<8x1x128xf32>
    %25 = vector.broadcast %24 : vector<8x1x128xf32> to vector<8x8x128xf32>
    %26 = arith.addf %25, %0 : vector<8x8x128xf32>
    %27 = math.tanh %26 : vector<8x8x128xf32>
    %cst_7 = arith.constant dense<0.000000e+00> : vector<8x8xf32>
    %28 = vector.multi_reduction <add>, %27, %cst_7 [2] : vector<8x8x128xf32> to vector<8x8xf32>
    %29 = vector.shape_cast %28 : vector<8x8xf32> to vector<8x1x8xf32>
    %30 = vector.extract_strided_slice %5 {offsets = [0, 4, 0], sizes = [8, 1, 128], strides = [1, 1, 1]} : vector<8x8x128xf32> to vector<8x1x128xf32>
    %31 = vector.broadcast %30 : vector<8x1x128xf32> to vector<8x8x128xf32>
    %32 = arith.addf %31, %0 : vector<8x8x128xf32>
    %33 = math.tanh %32 : vector<8x8x128xf32>
    %cst_8 = arith.constant dense<0.000000e+00> : vector<8x8xf32>
    %34 = vector.multi_reduction <add>, %33, %cst_8 [2] : vector<8x8x128xf32> to vector<8x8xf32>
    %35 = vector.shape_cast %34 : vector<8x8xf32> to vector<8x1x8xf32>
    %36 = vector.extract_strided_slice %5 {offsets = [0, 5, 0], sizes = [8, 1, 128], strides = [1, 1, 1]} : vector<8x8x128xf32> to vector<8x1x128xf32>
    %37 = vector.broadcast %36 : vector<8x1x128xf32> to vector<8x8x128xf32>
    %38 = arith.addf %37, %0 : vector<8x8x128xf32>
    %39 = math.tanh %38 : vector<8x8x128xf32>
    %cst_9 = arith.constant dense<0.000000e+00> : vector<8x8xf32>
    %40 = vector.multi_reduction <add>, %39, %cst_9 [2] : vector<8x8x128xf32> to vector<8x8xf32>
    %41 = vector.shape_cast %40 : vector<8x8xf32> to vector<8x1x8xf32>
    %42 = vector.extract_strided_slice %5 {offsets = [0, 6, 0], sizes = [8, 1, 128], strides = [1, 1, 1]} : vector<8x8x128xf32> to vector<8x1x128xf32>
    %43 = vector.broadcast %42 : vector<8x1x128xf32> to vector<8x8x128xf32>
    %44 = arith.addf %43, %0 : vector<8x8x128xf32>
    %45 = math.tanh %44 : vector<8x8x128xf32>
    %cst_10 = arith.constant dense<0.000000e+00> : vector<8x8xf32>
    %46 = vector.multi_reduction <add>, %45, %cst_10 [2] : vector<8x8x128xf32> to vector<8x8xf32>
    %47 = vector.shape_cast %46 : vector<8x8xf32> to vector<8x1x8xf32>
    %48 = vector.extract_strided_slice %5 {offsets = [0, 7, 0], sizes = [8, 1, 128], strides = [1, 1, 1]} : vector<8x8x128xf32> to vector<8x1x128xf32>
    %49 = vector.broadcast %48 : vector<8x1x128xf32> to vector<8x8x128xf32>
    %50 = arith.addf %49, %0 : vector<8x8x128xf32>
    %51 = math.tanh %50 : vector<8x8x128xf32>
    %cst_11 = arith.constant dense<0.000000e+00> : vector<8x8xf32>
    %52 = vector.multi_reduction <add>, %51, %cst_11 [2] : vector<8x8x128xf32> to vector<8x8xf32>
    %53 = vector.shape_cast %52 : vector<8x8xf32> to vector<8x1x8xf32>
    %54 = tpu.concatenate %11, %17, %23, %29, %35, %41, %47, %53 in 1 : vector<8x1x8xf32>, vector<8x1x8xf32>, vector<8x1x8xf32>, vector<8x1x8xf32>, vector<8x1x8xf32>, vector<8x1x8xf32>, vector<8x1x8xf32>, vector<8x1x8xf32> -> vector<8x8x8xf32>
    %c0_12 = arith.constant 0 : index
    %55 = arith.index_cast %3 : i32 to index
    %c0_13 = arith.constant 0 : index
    %56 = vector.load %arg8[%c0_12, %55, %c0_13] : memref<8x8x8xf32, #tpu.memory_space<vmem>>, vector<8x8x8xf32>
    tpu.vector_store %arg8[%c0_12, %55, %c0_13], %54 {strides = array<i32>} : memref<8x8x8xf32, #tpu.memory_space<vmem>>, vector<8x8x8xf32>,
    %c1_i32 = arith.constant 1 : i32
    %c0_14 = arith.constant 0 : index
    %c0_15 = arith.constant 0 : index
    %c0_16 = arith.constant 0 : index
    %57 = vector.load %arg8[%c0_14, %c0_15, %c0_16] : memref<8x8x8xf32, #tpu.memory_space<vmem>>, vector<8x8x8xf32>
    %c0_17 = arith.constant 0 : index
    %58 = memref.load %arg1[%c0_17] : memref<3xf32, #tpu.memory_space<smem>>
    %cst_18 = arith.constant dense<0xFF800000> : vector<8x8xf32>
    %59 = vector.multi_reduction <maximumf>, %1, %cst_18 [2] : vector<8x8x8xf32> to vector<8x8xf32>
    %60 = vector.shape_cast %59 : vector<8x8xf32> to vector<8x8x1xf32>
    %61 = vector.broadcast %60 : vector<8x8x1xf32> to vector<8x8x8xf32>
    %62 = arith.subf %1, %61 : vector<8x8x8xf32>
    %63 = math.exp %62 : vector<8x8x8xf32>
    %cst_19 = arith.constant dense<0.000000e+00> : vector<8x8xf32>
    %64 = vector.multi_reduction <add>, %63, %cst_19 [2] : vector<8x8x8xf32> to vector<8x8xf32>
    %65 = vector.shape_cast %64 : vector<8x8xf32> to vector<8x8x1xf32>
    %66 = tpu.reciprocal %65 {approx = true} : vector<8x8x1xf32> -> vector<8x8x1xf32>
    %67 = vector.broadcast %66 : vector<8x8x1xf32> to vector<8x8x8xf32>
    %68 = arith.mulf %63, %67 : vector<8x8x8xf32>
    %69 = vector.broadcast %58 : f32 to vector<8x8x8xf32>
    %70 = arith.mulf %69, %68 : vector<8x8x8xf32>
    %c1 = arith.constant 1 : index
    %71 = memref.load %arg1[%c1] : memref<3xf32, #tpu.memory_space<smem>>
    %cst_20 = arith.constant dense<0xFF800000> : vector<8x8xf32>
    %72 = vector.multi_reduction <maximumf>, %57, %cst_20 [2] : vector<8x8x8xf32> to vector<8x8xf32>
    %73 = vector.shape_cast %72 : vector<8x8xf32> to vector<8x8x1xf32>
    %74 = vector.broadcast %73 : vector<8x8x1xf32> to vector<8x8x8xf32>
    %75 = arith.subf %57, %74 : vector<8x8x8xf32>
    %76 = math.exp %75 : vector<8x8x8xf32>
    %cst_21 = arith.constant dense<0.000000e+00> : vector<8x8xf32>
    %77 = vector.multi_reduction <add>, %76, %cst_21 [2] : vector<8x8x8xf32> to vector<8x8xf32>
    %78 = vector.shape_cast %77 : vector<8x8xf32> to vector<8x8x1xf32>
    %79 = tpu.reciprocal %78 {approx = true} : vector<8x8x1xf32> -> vector<8x8x1xf32>
    %80 = vector.broadcast %79 : vector<8x8x1xf32> to vector<8x8x8xf32>
    %81 = arith.mulf %76, %80 : vector<8x8x8xf32>
    %82 = vector.broadcast %71 : f32 to vector<8x8x8xf32>
    %83 = arith.mulf %82, %81 : vector<8x8x8xf32>
    %84 = arith.addf %70, %83 : vector<8x8x8xf32>
    %c2 = arith.constant 2 : index
    %85 = memref.load %arg1[%c2] : memref<3xf32, #tpu.memory_space<smem>>
    %cst_22 = arith.constant 1.000000e-01 : f32
    %86 = vector.broadcast %cst_22 : f32 to vector<8x8x8xf32>
    %87 = arith.mulf %1, %86 : vector<8x8x8xf32>
    %cst_23 = arith.constant dense<0xFF800000> : vector<8x8xf32>
    %88 = vector.multi_reduction <maximumf>, %87, %cst_23 [2] : vector<8x8x8xf32> to vector<8x8xf32>
    %89 = vector.shape_cast %88 : vector<8x8xf32> to vector<8x8x1xf32>
    %90 = vector.broadcast %89 : vector<8x8x1xf32> to vector<8x8x8xf32>
    %91 = arith.subf %87, %90 : vector<8x8x8xf32>
    %92 = math.exp %91 : vector<8x8x8xf32>
    %cst_24 = arith.constant dense<0.000000e+00> : vector<8x8xf32>
    %93 = vector.multi_reduction <add>, %92, %cst_24 [2] : vector<8x8x8xf32> to vector<8x8xf32>
    %94 = vector.shape_cast %93 : vector<8x8xf32> to vector<8x8x1xf32>
    %95 = tpu.reciprocal %94 {approx = true} : vector<8x8x1xf32> -> vector<8x8x1xf32>
    %96 = vector.broadcast %95 : vector<8x8x1xf32> to vector<8x8x8xf32>
    %97 = arith.mulf %92, %96 : vector<8x8x8xf32>
    %98 = vector.broadcast %85 : f32 to vector<8x8x8xf32>
    %99 = arith.mulf %98, %97 : vector<8x8x8xf32>
    %100 = arith.addf %84, %99 : vector<8x8x8xf32>
    %101 = vector.extract_strided_slice %100 {offsets = [0, 0, 0], sizes = [8, 8, 1], strides = [1, 1, 1]} : vector<8x8x8xf32> to vector<8x8x1xf32>
    %102 = vector.extract_strided_slice %0 {offsets = [0, 0, 0], sizes = [8, 1, 128], strides = [1, 1, 1]} : vector<8x8x128xf32> to vector<8x1x128xf32>
    %103 = vector.broadcast %101 : vector<8x8x1xf32> to vector<8x8x128xf32>
    %104 = vector.broadcast %102 : vector<8x1x128xf32> to vector<8x8x128xf32>
    %105 = arith.mulf %103, %104 : vector<8x8x128xf32>
    %106 = vector.extract_strided_slice %100 {offsets = [0, 0, 1], sizes = [8, 8, 1], strides = [1, 1, 1]} : vector<8x8x8xf32> to vector<8x8x1xf32>
    %107 = vector.extract_strided_slice %0 {offsets = [0, 1, 0], sizes = [8, 1, 128], strides = [1, 1, 1]} : vector<8x8x128xf32> to vector<8x1x128xf32>
    %108 = vector.broadcast %106 : vector<8x8x1xf32> to vector<8x8x128xf32>
    %109 = vector.broadcast %107 : vector<8x1x128xf32> to vector<8x8x128xf32>
    %110 = arith.mulf %108, %109 : vector<8x8x128xf32>
    %111 = arith.addf %105, %110 : vector<8x8x128xf32>
    %112 = vector.extract_strided_slice %100 {offsets = [0, 0, 2], sizes = [8, 8, 1], strides = [1, 1, 1]} : vector<8x8x8xf32> to vector<8x8x1xf32>
    %113 = vector.extract_strided_slice %0 {offsets = [0, 2, 0], sizes = [8, 1, 128], strides = [1, 1, 1]} : vector<8x8x128xf32> to vector<8x1x128xf32>
    %114 = vector.broadcast %112 : vector<8x8x1xf32> to vector<8x8x128xf32>
    %115 = vector.broadcast %113 : vector<8x1x128xf32> to vector<8x8x128xf32>
    %116 = arith.mulf %114, %115 : vector<8x8x128xf32>
    %117 = arith.addf %111, %116 : vector<8x8x128xf32>
    %118 = vector.extract_strided_slice %100 {offsets = [0, 0, 3], sizes = [8, 8, 1], strides = [1, 1, 1]} : vector<8x8x8xf32> to vector<8x8x1xf32>
    %119 = vector.extract_strided_slice %0 {offsets = [0, 3, 0], sizes = [8, 1, 128], strides = [1, 1, 1]} : vector<8x8x128xf32> to vector<8x1x128xf32>
    %120 = vector.broadcast %118 : vector<8x8x1xf32> to vector<8x8x128xf32>
    %121 = vector.broadcast %119 : vector<8x1x128xf32> to vector<8x8x128xf32>
    %122 = arith.mulf %120, %121 : vector<8x8x128xf32>
    %123 = arith.addf %117, %122 : vector<8x8x128xf32>
    %124 = vector.extract_strided_slice %100 {offsets = [0, 0, 4], sizes = [8, 8, 1], strides = [1, 1, 1]} : vector<8x8x8xf32> to vector<8x8x1xf32>
    %125 = vector.extract_strided_slice %0 {offsets = [0, 4, 0], sizes = [8, 1, 128], strides = [1, 1, 1]} : vector<8x8x128xf32> to vector<8x1x128xf32>
    %126 = vector.broadcast %124 : vector<8x8x1xf32> to vector<8x8x128xf32>
    %127 = vector.broadcast %125 : vector<8x1x128xf32> to vector<8x8x128xf32>
    %128 = arith.mulf %126, %127 : vector<8x8x128xf32>
    %129 = arith.addf %123, %128 : vector<8x8x128xf32>
    %130 = vector.extract_strided_slice %100 {offsets = [0, 0, 5], sizes = [8, 8, 1], strides = [1, 1, 1]} : vector<8x8x8xf32> to vector<8x8x1xf32>
    %131 = vector.extract_strided_slice %0 {offsets = [0, 5, 0], sizes = [8, 1, 128], strides = [1, 1, 1]} : vector<8x8x128xf32> to vector<8x1x128xf32>
    %132 = vector.broadcast %130 : vector<8x8x1xf32> to vector<8x8x128xf32>
    %133 = vector.broadcast %131 : vector<8x1x128xf32> to vector<8x8x128xf32>
    %134 = arith.mulf %132, %133 : vector<8x8x128xf32>
    %135 = arith.addf %129, %134 : vector<8x8x128xf32>
    %136 = vector.extract_strided_slice %100 {offsets = [0, 0, 6], sizes = [8, 8, 1], strides = [1, 1, 1]} : vector<8x8x8xf32> to vector<8x8x1xf32>
    %137 = vector.extract_strided_slice %0 {offsets = [0, 6, 0], sizes = [8, 1, 128], strides = [1, 1, 1]} : vector<8x8x128xf32> to vector<8x1x128xf32>
    %138 = vector.broadcast %136 : vector<8x8x1xf32> to vector<8x8x128xf32>
    %139 = vector.broadcast %137 : vector<8x1x128xf32> to vector<8x8x128xf32>
    %140 = arith.mulf %138, %139 : vector<8x8x128xf32>
    %141 = arith.addf %135, %140 : vector<8x8x128xf32>
    %142 = vector.extract_strided_slice %100 {offsets = [0, 0, 7], sizes = [8, 8, 1], strides = [1, 1, 1]} : vector<8x8x8xf32> to vector<8x8x1xf32>
    %143 = vector.extract_strided_slice %0 {offsets = [0, 7, 0], sizes = [8, 1, 128], strides = [1, 1, 1]} : vector<8x8x128xf32> to vector<8x1x128xf32>
    %144 = vector.broadcast %142 : vector<8x8x1xf32> to vector<8x8x128xf32>
    %145 = vector.broadcast %143 : vector<8x1x128xf32> to vector<8x8x128xf32>
    %146 = arith.mulf %144, %145 : vector<8x8x128xf32>
    %147 = arith.addf %141, %146 : vector<8x8x128xf32>
    %148 = arith.addf %0, %147 : vector<8x8x128xf32>
    %149 = vector.shape_cast %148 : vector<8x8x128xf32> to vector<64x128xf32>
    %150 = arith.truncf %149 : vector<64x128xf32> to vector<64x128xbf16>
    %c0_25 = arith.constant 0 : index
    %c0_26 = arith.constant 0 : index
    %151 = vector.load %arg3[%c0_25, %c0_26] : memref<128x60xbf16, #tpu.memory_space<vmem>>, vector<128x60xbf16>
    %cst_27 = arith.constant dense<0.000000e+00> : vector<64x60xf32>
    %152 = tpu.matmul %150, %151, %cst_27 {dimension_numbers = #tpu.dot_dimension_numbers<[1], [0], [0], [1], [0, 0, 1, 1], [], []>} : vector<64x128xbf16>, vector<128x60xbf16>, vector<64x60xf32> -> vector<64x60xf32>
    %153 = vector.shape_cast %152 : vector<64x60xf32> to vector<8x8x60xf32>
    %c0_28 = arith.constant 0 : index
    %c0_29 = arith.constant 0 : index
    %154 = vector.load %arg4[%c0_28, %c0_29] : memref<1x30xf32, #tpu.memory_space<vmem>>, vector<1x30xf32>
    %cst_30 = arith.constant 0.000000e+00 : f32
    %155 = vector.broadcast %cst_30 : f32 to vector<8x1x10xf32>
    %cst_31 = arith.constant 0.000000e+00 : f32
    %156 = vector.broadcast %cst_31 : f32 to vector<8x2x10xf32>
    %157 = vector.extract_strided_slice %153 {offsets = [0, 0, 0], sizes = [8, 8, 10], strides = [1, 1, 1]} : vector<8x8x60xf32> to vector<8x8x10xf32>
    %158 = vector.extract_strided_slice %154 {offsets = [0, 0], sizes = [1, 10], strides = [1, 1]} : vector<1x30xf32> to vector<1x10xf32>
    %159 = vector.shape_cast %158 : vector<1x10xf32> to vector<1x1x10xf32>
    %160 = vector.broadcast %159 : vector<1x1x10xf32> to vector<8x8x10xf32>
    %161 = arith.addf %157, %160 : vector<8x8x10xf32>
    %cst_32 = arith.constant 0.000000e+00 : f32
    %162 = vector.broadcast %cst_32 : f32 to vector<8x8x10xf32>
    %163 = arith.maximumf %161, %162 : vector<8x8x10xf32>
    %cst_33 = arith.constant dense<0xFF800000> : vector<8x10xf32>
    %164 = vector.multi_reduction <maximumf>, %163, %cst_33 [1] : vector<8x8x10xf32> to vector<8x10xf32>
    %165 = vector.extract_strided_slice %153 {offsets = [0, 0, 10], sizes = [8, 8, 10], strides = [1, 1, 1]} : vector<8x8x60xf32> to vector<8x8x10xf32>
    %166 = vector.extract_strided_slice %153 {offsets = [0, 0, 20], sizes = [8, 8, 10], strides = [1, 1, 1]} : vector<8x8x60xf32> to vector<8x8x10xf32>
    %167 = tpu.concatenate %155, %165 in 1 : vector<8x1x10xf32>, vector<8x8x10xf32> -> vector<8x9x10xf32>
    %168 = tpu.concatenate %166, %155 in 1 : vector<8x8x10xf32>, vector<8x1x10xf32> -> vector<8x9x10xf32>
    %169 = arith.addf %167, %168 : vector<8x9x10xf32>
    %170 = vector.extract_strided_slice %154 {offsets = [0, 10], sizes = [1, 10], strides = [1, 1]} : vector<1x30xf32> to vector<1x10xf32>
    %171 = vector.shape_cast %170 : vector<1x10xf32> to vector<1x1x10xf32>
    %172 = vector.broadcast %171 : vector<1x1x10xf32> to vector<8x9x10xf32>
    %173 = arith.addf %169, %172 : vector<8x9x10xf32>
    %cst_34 = arith.constant 0.000000e+00 : f32
    %174 = vector.broadcast %cst_34 : f32 to vector<8x9x10xf32>
    %175 = arith.maximumf %173, %174 : vector<8x9x10xf32>
    %cst_35 = arith.constant dense<0xFF800000> : vector<8x10xf32>
    %176 = vector.multi_reduction <maximumf>, %175, %cst_35 [1] : vector<8x9x10xf32> to vector<8x10xf32>
    %177 = vector.extract_strided_slice %153 {offsets = [0, 0, 30], sizes = [8, 8, 10], strides = [1, 1, 1]} : vector<8x8x60xf32> to vector<8x8x10xf32>
    %178 = vector.extract_strided_slice %153 {offsets = [0, 0, 40], sizes = [8, 8, 10], strides = [1, 1, 1]} : vector<8x8x60xf32> to vector<8x8x10xf32>
    %179 = vector.extract_strided_slice %153 {offsets = [0, 0, 50], sizes = [8, 8, 10], strides = [1, 1, 1]} : vector<8x8x60xf32> to vector<8x8x10xf32>
    %180 = tpu.concatenate %156, %177 in 1 : vector<8x2x10xf32>, vector<8x8x10xf32> -> vector<8x10x10xf32>
    %181 = tpu.concatenate %155, %178, %155 in 1 : vector<8x1x10xf32>, vector<8x8x10xf32>, vector<8x1x10xf32> -> vector<8x10x10xf32>
    %182 = arith.addf %180, %181 : vector<8x10x10xf32>
    %183 = tpu.concatenate %179, %156 in 1 : vector<8x8x10xf32>, vector<8x2x10xf32> -> vector<8x10x10xf32>
    %184 = arith.addf %182, %183 : vector<8x10x10xf32>
    %185 = vector.extract_strided_slice %154 {offsets = [0, 20], sizes = [1, 10], strides = [1, 1]} : vector<1x30xf32> to vector<1x10xf32>
    %186 = vector.shape_cast %185 : vector<1x10xf32> to vector<1x1x10xf32>
    %187 = vector.broadcast %186 : vector<1x1x10xf32> to vector<8x10x10xf32>
    %188 = arith.addf %184, %187 : vector<8x10x10xf32>
    %cst_36 = arith.constant 0.000000e+00 : f32
    %189 = vector.broadcast %cst_36 : f32 to vector<8x10x10xf32>
    %190 = arith.maximumf %188, %189 : vector<8x10x10xf32>
    %cst_37 = arith.constant dense<0xFF800000> : vector<8x10xf32>
    %191 = vector.multi_reduction <maximumf>, %190, %cst_37 [1] : vector<8x10x10xf32> to vector<8x10xf32>
    %192 = tpu.concatenate %164, %176, %191 in 1 : vector<8x10xf32>, vector<8x10xf32>, vector<8x10xf32> -> vector<8x30xf32>
    %c0_38 = arith.constant 0 : index
    %c0_39 = arith.constant 0 : index
    %193 = vector.load %arg5[%c0_38, %c0_39] : memref<4x30xf32, #tpu.memory_space<vmem>>, vector<4x30xf32>
    %cst_40 = arith.constant dense<0.000000e+00> : vector<4x8xf32>
    %194 = tpu.matmul %193, %192, %cst_40 {dimension_numbers = #tpu.dot_dimension_numbers<[1], [1], [0], [0], [0, 0, 1, 0], [], []>} : vector<4x30xf32>, vector<8x30xf32>, vector<4x8xf32> -> vector<4x8xf32>
    %c0_41 = arith.constant 0 : index
    %c0_42 = arith.constant 0 : index
    %195 = vector.load %arg6[%c0_41, %c0_42] : memref<4x1xf32, #tpu.memory_space<vmem>>, vector<4x1xf32>
    %196 = vector.broadcast %195 : vector<4x1xf32> to vector<4x8xf32>
    %197 = arith.addf %194, %196 : vector<4x8xf32>
    %c0_43 = arith.constant 0 : index
    %c0_44 = arith.constant 0 : index
    %198 = vector.load %arg7[%c0_43, %c0_44] : memref<4x8xf32, #tpu.memory_space<vmem>>, vector<4x8xf32>
    tpu.vector_store %arg7[%c0_43, %c0_44], %197 {strides = array<i32>} : memref<4x8xf32, #tpu.memory_space<vmem>>, vector<4x8xf32>,
    return
  }
  func.func @transform_0(%arg0: i32) -> i32 {
    %c0_i32 = arith.constant 0 : i32
    %c0_i32_0 = arith.constant 0 : i32
    return %c0_i32 : i32
  }
  func.func @transform_1(%arg0: i32) -> (i32, i32, i32) {
    %c0_i32 = arith.constant 0 : i32
    %c0_i32_0 = arith.constant 0 : i32
    %c0_i32_1 = arith.constant 0 : i32
    return %arg0, %c0_i32, %c0_i32_0 : i32, i32, i32
  }
  func.func @transform_2(%arg0: i32) -> (i32, i32) {
    %c0_i32 = arith.constant 0 : i32
    %c0_i32_0 = arith.constant 0 : i32
    %c0_i32_1 = arith.constant 0 : i32
    return %c0_i32, %c0_i32_0 : i32, i32
  }
  func.func @transform_3(%arg0: i32) -> (i32, i32) {
    %c0_i32 = arith.constant 0 : i32
    %c0_i32_0 = arith.constant 0 : i32
    %c0_i32_1 = arith.constant 0 : i32
    return %c0_i32, %c0_i32_0 : i32, i32
  }
  func.func @transform_4(%arg0: i32) -> (i32, i32) {
    %c0_i32 = arith.constant 0 : i32
    %c0_i32_0 = arith.constant 0 : i32
    %c0_i32_1 = arith.constant 0 : i32
    return %c0_i32, %c0_i32_0 : i32, i32
  }
  func.func @transform_5(%arg0: i32) -> (i32, i32) {
    %c0_i32 = arith.constant 0 : i32
    %c0_i32_0 = arith.constant 0 : i32
    %c0_i32_1 = arith.constant 0 : i32
    return %c0_i32, %c0_i32_0 : i32, i32
  }
  func.func @transform_6(%arg0: i32) -> (i32, i32) {
    %c0_i32 = arith.constant 0 : i32
    %c0_i32_0 = arith.constant 0 : i32
    return %c0_i32, %arg0 : i32, i32
  }
}

</mosaic_0001>

<bundles_post_ra>
// kernel: tpu_custom_call.1
= control target key start
LH: loop header
LB: loop body
LE: loop exit
PB: predicated region body
PF: predicated region fallthrough
CT: control target
= control target key end

     0   :  { %11 = vsyncpa [#allocation5], 0  ;;  %s5293_s0 = inlined_call_operand.vmem [shape: f32[3], index: 0, kind: input, shape index: {}]   ;;  %s5294_s1 = inlined_call_operand.vmem [shape: f32[8,8,128], index: 1, kind: input, shape index: {}]   ;;  %s5295_s2 = inlined_call_operand.vmem [shape: bf16[128,60], index: 2, kind: input, shape index: {}]   ;;  %s5296_s3 = inlined_call_operand.vmem [shape: f32[1,30], index: 3, kind: input, shape index: {}]   ;;  %s5297_s4 = inlined_call_operand.vmem [shape: f32[4,30], index: 4, kind: input, shape index: {}]   ;;  %s5298_s5 = inlined_call_operand.vmem [shape: f32[4,1], index: 5, kind: input, shape index: {}]   ;;  %s5299_s6 = inlined_call_operand.hbm [shape: f32[4,8], index: 6, kind: output, shape index: {}]  }
   0x1   :  { %12 = vsyncpa [#allocation4], 0  ;;  %s19_s23 = sshll.u32 %s5293_s0, 4  ;;  %s20_s23 = int_to_ptr.vmem [resolvable:$true] %s19_s23 }
   0x2   :  { %s3816_s24 = scalar_lea.vmem %s20_s23, 16  ;;  %p3821_p1 = scmp.lt.s32.totalorder %s20_s23, %s20_s23 }
   0x3   :  { %p3817_p0 = scmp.ne.s32.totalorder %s20_s23, %s3816_s24  ;;  %p3822_p2 = scmp.lt.s32.totalorder %s3816_s24, %s3816_s24 }
   0x5   :  { %p3823_p3 = por %p3822_p2, %p3821_p1 }
   0x7   :  { %p3824_p4 = pnand %p3823_p3, %p3817_p0 }
   0x9   :  { %3827 = shalt.err (!%p3824_p4)
}
   0xa   :  { %s3852_s25 = smov [#allocation3]  }
   0xb   :  { %22 = dma.vmem_to_smem %s20_s23, 16, %s3852_s25, [#allocation5]  }
   0xc   :  { %3848 = dma.done.wait [#allocation5], 16  }
   0xd   :  { %3849 = vsyncadd [#allocation5], 4294967280 }
   0xe   :  { %36 = sfence }
   0xf   :  { %v614_v0 = vlaneseq  ;;  %v3912_v1 = vld [vmem:[%s5294_s1] sm:$0xff]  ;;  %v3853_v2 = vmov 0.0   ;;  %vm3854_vm0 = vmmov 0   ;;  %v3922_v5 = vld [vmem:[%s5294_s1 + $0x8] sm:$0xff]  ;;  %v3938_v9 = vld [vmem:[%s5294_s1 + $0x18] sm:$0xff]  ;;  %vm1512_vm1 = vcmask 1040384  }
  0x10   :  { %3424 = vmatprep.subr.mxu1 %v3853_v2  ;;  %3426 = vmatprep.mubr.msk.f32.mxu1 %vm3854_vm0, %v3853_v2  ;;  %v3943_v10 = vld [vmem:[%s5294_s1 + $0x10] sm:$0xff]  ;;  %v3994_v30 = vld [vmem:[%s5294_s1 + $0x20] sm:$0xff]  ;;  %v4013_v36 = vld [vmem:[%s5294_s1 + $0x28] sm:$0xff]  ;;  %vm1521_vm2 = vcmask 1041408   ;;  %vm1530_vm3 = vcmask 1042432   ;;  %vm1539_vm4 = vcmask 1043456  }
  0x11   :  { %v3917_v3 = vshrl.u32 %v614_v0, 7  ;;  %v1135_v4 = vand.u32 127, %v614_v0  ;;  %3425 = vmatpush3.xpose.msra.mxu1 %v3912_v1  ;;  %v4029_v44 = vld [vmem:[%s5294_s1 + $0x30] sm:$0xff]  ;;  %v4048_v52 = vld [vmem:[%s5294_s1 + $0x38] sm:$0xff]  ;;  %vm1548_vm5 = vcmask 1044480   ;;  %vm1557_vm6 = vcmask 1045504  }
  0x12   :  { %3429 = vmatprep.subr.mxu1 %v3853_v2  ;;  %vm1566_vm7 = vcmask 1046528   ;;  %vm1575_vm8 = vcmask 64512   ;;  %s1592_s17 = sld [smem:[#allocation3]]  ;;  %s3865_s22 = smov 118   ;;  %vm2714_vm9 = vcmask 80896   ;;  %vm3226_vm10 = vcmask 1041409  }
  0x13   :  { %v3927_v6 = vsub.s32 1, %v3917_v3  ;;  %v3930_v7 = vsub.s32 %v1135_v4, %v3917_v3  ;;  %v3933_v8 = vsub.s32 0, %v3917_v3  ;;  %v3975_v23 = vsub.s32 2, %v3917_v3  ;;  %s3381_s18 = sld [smem:[#allocation3 + $0x1]]  ;;  %s3867_s29 = smov 88  }
  0x14   :  { %3427 = vmatmul.mubr.f32.vlgmr.msra.gmra.mxu1 %v3912_v1  ;;  %v4005_v33 = vsub.s32 3, %v3917_v3  ;;  %v4040_v48 = vsub.s32 4, %v3917_v3  ;;  %v4068_v62 = vsub.s32 5, %v3917_v3  ;;  %s3382_s19 = sld [smem:[#allocation3 + $0x2]]  ;;  %vm3228_vm11 = vcmask 1042434   ;;  %s3868_s30 = smov 10  }
  0x15   :  { %v681_v11 = vrot.slane %v3912_v1, %v3927_v6  ;;  %v617_v12 = vrot.slane %v3912_v1, %v3933_v8  ;;  %v685_v13 = vrot.slane %v3922_v5, %v3927_v6  ;;  %v621_v14 = vrot.slane %v3922_v5, %v3933_v8  ;;  %3430 = vmatpush3.xpose.msra.mxu1 %v3922_v5  ;;  %s3869_s7 = smov 20   ;;  %s3870_s11 = smov [#allocation6]  }
  0x16   :  { %3431 = vmatprep.mubr.msk.f32.mxu1 %vm3854_vm0, %v3853_v2  ;;  %v629_v18 = vrot.slane %v3938_v9, %v3933_v8  ;;  %3434 = vmatprep.subr.mxu1 %v3853_v2  ;;  %v625_v20 = vrot.slane %v3943_v10, %v3933_v8  ;;  %v693_v22 = vrot.slane %v3938_v9, %v3927_v6  ;;  %vm3230_vm12 = vcmask 1043459   ;;  %s3372_s12 = sshll.u32 %s3870_s11, 4  ;;  %s3373_s12 = int_to_ptr.vmem [resolvable:$true] %s3372_s12 }
  0x17   :  { %v710_v15 = vadd.f32 %v681_v11, %v3912_v1  ;;  %v646_v16 = vadd.f32 %v617_v12, %v3912_v1  ;;  %v711_v17 = vadd.f32 %v685_v13, %v3922_v5  ;;  %v647_v19 = vadd.f32 %v621_v14, %v3922_v5  ;;  %p3833_p6 = scmp.lt.s32.totalorder %s3373_s12, %s3373_s12 }
  0x18   :  { %3432 = vmatmul.mubr.f32.vlgmr.msra.gmra.mxu1 %v3922_v5  ;;  %v649_v21 = vadd.f32 %v629_v18, %v3938_v9  ;;  %v648_v24 = vadd.f32 %v625_v20, %v3943_v10  ;;  %v689_v25 = vrot.slane %v3943_v10, %v3927_v6  ;;  %v713_v26 = vadd.f32 %v693_v22, %v3938_v9 }
  0x19   :  { %3584 = vtanh.f32 %v710_v15  ;;  %3435 = vmatpush3.xpose.msra.mxu1 %v3943_v10  ;;  %3436 = vmatprep.mubr.msk.f32.mxu1 %vm3854_vm0, %v3853_v2  ;;  %v749_v27 = vrot.slane %v3922_v5, %v3975_v23  ;;  %v745_v29 = vrot.slane %v3912_v1, %v3975_v23  ;;  %v757_v32 = vrot.slane %v3938_v9, %v3975_v23 }
  0x1a   :  { %3586 = vtanh.f32 %v646_v16  ;;  %3439 = vmatprep.subr.mxu1 %v3853_v2  ;;  %v712_v28 = vadd.f32 %v689_v25, %v3943_v10  ;;  %v753_v35 = vrot.slane %v3943_v10, %v3975_v23  ;;  %v813_v40 = vrot.slane %v3922_v5, %v4005_v33 }
  0x1b   :  { %3588 = vtanh.f32 %v711_v17  ;;  %v775_v31 = vadd.f32 %v749_v27, %v3922_v5  ;;  %v774_v34 = vadd.f32 %v745_v29, %v3912_v1  ;;  %v777_v39 = vadd.f32 %v757_v32, %v3938_v9 }
  0x1c   :  { %3590 = vtanh.f32 %v647_v19  ;;  %3437 = vmatmul.mubr.f32.vlgmr.msra.gmra.mxu1 %v3943_v10  ;;  %v776_v42 = vadd.f32 %v753_v35, %v3943_v10  ;;  %v809_v43 = vrot.slane %v3912_v1, %v4005_v33  ;;  %v839_v46 = vadd.f32 %v813_v40, %v3922_v5 }
  0x1d   :  { %3440 = vmatpush3.xpose.msra.mxu1 %v3938_v9  ;;  %3441 = vmatprep.mubr.msk.f32.mxu1 %vm3854_vm0, %v3853_v2  ;;  %3592 = vtanh.f32 %v649_v21  ;;  %v821_v47 = vrot.slane %v3938_v9, %v4005_v33  ;;  %v817_v51 = vrot.slane %v3943_v10, %v4005_v33  ;;  %v877_v55 = vrot.slane %v3922_v5, %v4040_v48 }
  0x1e   :  { %3444 = vmatprep.subr.mxu1 %v3853_v2  ;;  %3594 = vtanh.f32 %v648_v24  ;;  %v838_v50 = vadd.f32 %v809_v43, %v3912_v1  ;;  %v873_v58 = vrot.slane %v3912_v1, %v4040_v48  ;;  %v885_v61 = vrot.slane %v3938_v9, %v4040_v48 }
  0x1f   :  { %3596 = vtanh.f32 %v713_v26  ;;  %v841_v54 = vadd.f32 %v821_v47, %v3938_v9  ;;  %v840_v57 = vadd.f32 %v817_v51, %v3943_v10  ;;  %v903_v60 = vadd.f32 %v877_v55, %v3922_v5 }
  0x20   :  { %3442 = vmatmul.mubr.f32.vlgmr.msra.gmra.mxu1 %v3938_v9  ;;  %3598 = vtanh.f32 %v712_v28  ;;  %v902_v0 = vadd.f32 %v873_v58, %v3912_v1  ;;  %v881_v4 = vrot.slane %v3943_v10, %v4040_v48  ;;  %v905_v12 = vadd.f32 %v885_v61, %v3938_v9 }
  0x21   :  { %3445 = vmatpush3.xpose.msra.mxu1 %v3994_v30  ;;  %3446 = vmatprep.mubr.msk.f32.mxu1 %vm3854_vm0, %v3853_v2  ;;  %3600 = vtanh.f32 %v775_v31  ;;  %v941_v13 = vrot.slane %v3922_v5, %v4068_v62  ;;  %v937_v16 = vrot.slane %v3912_v1, %v4068_v62  ;;  %v949_v19 = vrot.slane %v3938_v9, %v4068_v62 }
  0x22   :  { %3449 = vmatprep.subr.mxu1 %v3853_v2  ;;  %3602 = vtanh.f32 %v774_v34  ;;  %v904_v15 = vadd.f32 %v881_v4, %v3943_v10  ;;  %v4083_v20 = vsub.s32 6, %v3917_v3  ;;  %v945_v24 = vrot.slane %v3943_v10, %v4068_v62 }
  0x23   :  { %3604 = vtanh.f32 %v777_v39  ;;  %v967_v18 = vadd.f32 %v941_v13, %v3922_v5  ;;  %v966_v22 = vadd.f32 %v937_v16, %v3912_v1  ;;  %v969_v26 = vadd.f32 %v949_v19, %v3938_v9 }
  0x24   :  { %3447 = vmatmul.mubr.f32.vlgmr.msra.gmra.mxu1 %v3994_v30  ;;  %3606 = vtanh.f32 %v776_v42  ;;  %v1005_v27 = vrot.slane %v3922_v5, %v4083_v20  ;;  %v968_v29 = vadd.f32 %v945_v24, %v3943_v10  ;;  %v1001_v31 = vrot.slane %v3912_v1, %v4083_v20 }
  0x25   :  { %3450 = vmatpush3.xpose.msra.mxu1 %v4013_v36  ;;  %3451 = vmatprep.mubr.msk.f32.mxu1 %vm3854_vm0, %v3853_v2  ;;  %3608 = vtanh.f32 %v839_v46  ;;  %v1013_v35 = vrot.slane %v3938_v9, %v4083_v20  ;;  %v1009_v40 = vrot.slane %v3943_v10, %v4083_v20  ;;  %v701_v61 = vrot.slane %v4013_v36, %v3927_v6 }
  0x26   :  { %v3585_v37 = vpop.eup %3584  ;;  %3454 = vmatprep.subr.mxu1 %v3853_v2  ;;  %3610 = vtanh.f32 %v838_v50  ;;  %v1031_v34 = vadd.f32 %v1005_v27, %v3922_v5  ;;  %v1030_v39 = vadd.f32 %v1001_v31, %v3912_v1  ;;  %vm3232_vm13 = vcmask 1044484  }
  0x27   :  { %v3587_v38 = vpop.eup %3586  ;;  %726 = vadd.xlane.f32.xlu1 %v3585_v37  ;;  %3612 = vtanh.f32 %v841_v54  ;;  %v4098_v37 = vsub.s32 7, %v3917_v3  ;;  %v1033_v42 = vadd.f32 %v1013_v35, %v3938_v9  ;;  %v1032_v3 = vadd.f32 %v1009_v40, %v3943_v10 }
  0x28   :  { %v3589_v41 = vpop.eup %3588  ;;  %662 = vadd.xlane.f32.xlu0 %v3587_v38  ;;  %3452 = vmatmul.mubr.f32.vlgmr.msra.gmra.mxu1 %v4013_v36  ;;  %3614 = vtanh.f32 %v840_v57  ;;  %v637_v57 = vrot.slane %v4013_v36, %v3933_v8  ;;  %v715_v4 = vadd.f32 %v701_v61, %v4013_v36  ;;  %vm3234_vm14 = vcmask 1045509  }
  0x29   :  { %v3591_v45 = vpop.eup %3590  ;;  %3455 = vmatpush3.xpose.msra.mxu1 %v4029_v44  ;;  %3456 = vmatprep.mubr.msk.f32.mxu1 %vm3854_vm0, %v3853_v2  ;;  %3616 = vtanh.f32 %v903_v60  ;;  %v1069_v43 = vrot.slane %v3922_v5, %v4098_v37  ;;  %v1065_v46 = vrot.slane %v3912_v1, %v4098_v37  ;;  %v1077_v50 = vrot.slane %v3938_v9, %v4098_v37 }
  0x2a   :  { %3459 = vmatprep.subr.mxu1 %v3853_v2  ;;  %v3593_v49 = vpop.eup %3592  ;;  %3618 = vtanh.f32 %v902_v0  ;;  %v1073_v54 = vrot.slane %v3943_v10, %v4098_v37  ;;  %v651_v60 = vadd.f32 %v637_v57, %v4013_v36  ;;  %v697_v0 = vrot.slane %v3994_v30, %v3927_v6 }
  0x2b   :  { %728 = vadd.xlane.f32.xlu1 %v3589_v41  ;;  %v3595_v53 = vpop.eup %3594  ;;  %3620 = vtanh.f32 %v905_v12  ;;  %vm3236_vm15 = vcmask 1046534  }
  0x2c   :  { %664 = vadd.xlane.f32.xlu0 %v3591_v45  ;;  %3457 = vmatmul.mubr.f32.vlgmr.msra.gmra.mxu1 %v4029_v44  ;;  %v3597_v56 = vpop.eup %3596  ;;  %3622 = vtanh.f32 %v904_v15  ;;  %v1096_v58 = vadd.f32 %v1073_v54, %v3943_v10  ;;  %v714_v13 = vadd.f32 %v697_v0, %v3994_v30 }
  0x2d   :  { %3460 = vmatpush3.xpose.msra.mxu1 %v4048_v52  ;;  %3461 = vmatprep.mubr.msk.f32.mxu1 %vm3854_vm0, %v3853_v2  ;;  %v3599_v59 = vpop.eup %3598  ;;  %3624 = vtanh.f32 %v967_v18 }
  0x2e   :  { %3488 = vmatprep.subr.mxu1 %v3853_v2  ;;  %v3601_v63 = vpop.eup %3600  ;;  %3626 = vtanh.f32 %v966_v22 }
  0x2f   :  { %668 = vadd.xlane.f32.xlu1 %v3593_v49  ;;  %v3603_v11 = vpop.eup %3602  ;;  %3628 = vtanh.f32 %v969_v26  ;;  %v1095_v49 = vadd.f32 %v1069_v43, %v3922_v5 }
  0x30   :  { %666 = vadd.xlane.f32.xlu0 %v3595_v53  ;;  %3462 = vmatmul.mubr.f32.vlgmr.msra.gmra.mxu1 %v4048_v52  ;;  %v3605_v14 = vpop.eup %3604  ;;  %3630 = vtanh.f32 %v968_v29  ;;  %v1094_v53 = vadd.f32 %v1065_v46, %v3912_v1 }
  0x31   :  { %3490 = vmatprep.mubr.msk.f32.mxu1 %vm3854_vm0, %v3853_v2  ;;  %v3607_v17 = vpop.eup %3606  ;;  %3632 = vtanh.f32 %v1031_v34  ;;  %vm3238_vm0 = vcmask 1047559  }
  0x32   :  { %v3609_v21 = vpop.eup %3608  ;;  %3634 = vtanh.f32 %v1030_v39 }
  0x33   :  { %732 = vadd.xlane.f32.xlu1 %v3597_v56  ;;  %v3611_v25 = vpop.eup %3610  ;;  %3636 = vtanh.f32 %v1033_v42  ;;  %v1097_v56 = vadd.f32 %v1077_v50, %v3938_v9 }
  0x34   :  { %730 = vadd.xlane.f32.xlu0 %v3599_v59  ;;  %v3613_v28 = vpop.eup %3612  ;;  %3638 = vtanh.f32 %v1032_v3  ;;  %v633_v59 = vrot.slane %v3994_v30, %v3933_v8 }
  0x35   :  { %v3615_v32 = vpop.eup %3614  ;;  %3640 = vtanh.f32 %v1095_v49 }
  0x36   :  { %v3617_v38 = vpop.eup %3616  ;;  %3642 = vtanh.f32 %v1094_v53 }
  0x37   :  { %792 = vadd.xlane.f32.xlu1 %v3601_v63  ;;  %v3619_v41 = vpop.eup %3618  ;;  %3644 = vtanh.f32 %v1097_v56  ;;  %v650_v63 = vadd.f32 %v633_v59, %v3994_v30 }
  0x38   :  { %790 = vadd.xlane.f32.xlu0 %v3603_v11  ;;  %v3621_v45 = vpop.eup %3620  ;;  %3646 = vtanh.f32 %v1096_v58  ;;  %v645_v11 = vrot.slane %v4048_v52, %v3933_v8 }
  0x39   :  { %v3623_v47 = vpop.eup %3622  ;;  %3648 = vtanh.f32 %v651_v60 }
  0x3a   :  { %v3625_v51 = vpop.eup %3624  ;;  %3650 = vtanh.f32 %v650_v63  ;;  %v653_v16 = vadd.f32 %v645_v11, %v4048_v52 }
  0x3b   :  { %796 = vadd.xlane.f32.xlu1 %v3605_v14  ;;  %v3627_v55 = vpop.eup %3626  ;;  %v641_v14 = vrot.slane %v4029_v44, %v3933_v8  ;;  %3652 = vtanh.f32 %v715_v4 }
  0x3c   :  { %794 = vadd.xlane.f32.xlu0 %v3607_v17  ;;  %v3629_v5 = vpop.eup %3628  ;;  %v709_v17 = vrot.slane %v4048_v52, %v3927_v6  ;;  %3654 = vtanh.f32 %v714_v13 }
  0x3d   :  { %v3631_v1 = vpop.eup %3630  ;;  %v652_v19 = vadd.f32 %v641_v14, %v4029_v44  ;;  %3656 = vtanh.f32 %v653_v16 }
  0x3e   :  { %v3633_v9 = vpop.eup %3632  ;;  %v717_v24 = vadd.f32 %v709_v17, %v4048_v52 }
  0x3f   :  { %856 = vadd.xlane.f32.xlu1 %v3609_v21  ;;  %v3635_v10 = vpop.eup %3634  ;;  %v705_v21 = vrot.slane %v4029_v44, %v3927_v6  ;;  %3658 = vtanh.f32 %v652_v19 }
  0x40   :  { %854 = vadd.xlane.f32.xlu0 %v3611_v25  ;;  %v3637_v12 = vpop.eup %3636  ;;  %v765_v25 = vrot.slane %v4013_v36, %v3975_v23  ;;  %3660 = vtanh.f32 %v717_v24 }
  0x41   :  { %v3639_v15 = vpop.eup %3638  ;;  %v716_v27 = vadd.f32 %v705_v21, %v4029_v44 }
  0x42   :  { %v3641_v18 = vpop.eup %3640  ;;  %v779_v31 = vadd.f32 %v765_v25, %v4013_v36 }
  0x43   :  { %860 = vadd.xlane.f32.xlu1 %v3613_v28  ;;  %v3643_v22 = vpop.eup %3642  ;;  %v761_v28 = vrot.slane %v3994_v30, %v3975_v23  ;;  %3662 = vtanh.f32 %v716_v27 }
  0x44   :  { %858 = vadd.xlane.f32.xlu0 %v3615_v32  ;;  %v3645_v26 = vpop.eup %3644  ;;  %v773_v32 = vrot.slane %v4048_v52, %v3975_v23  ;;  %3664 = vtanh.f32 %v779_v31 }
  0x45   :  { %v3647_v29 = vpop.eup %3646  ;;  %v778_v35 = vadd.f32 %v761_v28, %v3994_v30 }
  0x46   :  { %v3649_v34 = vpop.eup %3648  ;;  %v781_v40 = vadd.f32 %v773_v32, %v4048_v52 }
  0x47   :  { %920 = vadd.xlane.f32.xlu1 %v3617_v38  ;;  %v769_v38 = vrot.slane %v4029_v44, %v3975_v23  ;;  %v3651_v39 = vpop.eup %3650  ;;  %3666 = vtanh.f32 %v778_v35 }
  0x48   :  { %918 = vadd.xlane.f32.xlu0 %v3619_v41  ;;  %v829_v41 = vrot.slane %v4013_v36, %v4005_v33  ;;  %v3653_v42 = vpop.eup %3652  ;;  %3668 = vtanh.f32 %v781_v40 }
  0x49   :  { %v780_v43 = vadd.f32 %v769_v38, %v4029_v44  ;;  %v3655_v3 = vpop.eup %3654 }
  0x4a   :  { %v843_v46 = vadd.f32 %v829_v41, %v4013_v36  ;;  %v3657_v49 = vpop.eup %3656 }
  0x4b   :  { %924 = vadd.xlane.f32.xlu1 %v3621_v45  ;;  %v825_v45 = vrot.slane %v3994_v30, %v4005_v33  ;;  %3670 = vtanh.f32 %v780_v43 }
  0x4c   :  { %922 = vadd.xlane.f32.xlu0 %v3623_v47  ;;  %v837_v47 = vrot.slane %v4048_v52, %v4005_v33  ;;  %v3659_v53 = vpop.eup %3658  ;;  %3672 = vtanh.f32 %v843_v46 }
  0x4d   :  { %v842_v50 = vadd.f32 %v825_v45, %v3994_v30  ;;  %v3661_v56 = vpop.eup %3660 }
  0x4e   :  { %v845_v54 = vadd.f32 %v837_v47, %v4048_v52 }
  0x4f   :  { %984 = vadd.xlane.f32.xlu1 %v3625_v51  ;;  %v833_v51 = vrot.slane %v4029_v44, %v4005_v33  ;;  %3674 = vtanh.f32 %v842_v50 }
  0x50   :  { %982 = vadd.xlane.f32.xlu0 %v3627_v55  ;;  %v893_v55 = vrot.slane %v4013_v36, %v4040_v48  ;;  %v3663_v58 = vpop.eup %3662  ;;  %3676 = vtanh.f32 %v845_v54 }
  0x51   :  { %v844_v57 = vadd.f32 %v833_v51, %v4029_v44  ;;  %v3665_v60 = vpop.eup %3664 }
  0x52   :  { %v907_v59 = vadd.f32 %v893_v55, %v4013_v36 }
  0x53   :  { %988 = vadd.xlane.f32.xlu1 %v3629_v5  ;;  %v889_v5 = vrot.slane %v3994_v30, %v4040_v48  ;;  %3678 = vtanh.f32 %v844_v57 }
  0x54   :  { %986 = vadd.xlane.f32.xlu0 %v3631_v1  ;;  %v901_v1 = vrot.slane %v4048_v52, %v4040_v48  ;;  %v3667_v63 = vpop.eup %3666  ;;  %3680 = vtanh.f32 %v907_v59 }
  0x55   :  { %v906_v61 = vadd.f32 %v889_v5, %v3994_v30  ;;  %v3669_v4 = vpop.eup %3668 }
  0x56   :  { %v909_v0 = vadd.f32 %v901_v1, %v4048_v52 }
  0x57   :  { %1048 = vadd.xlane.f32.xlu1 %v3633_v9  ;;  %v897_v9 = vrot.slane %v4029_v44, %v4040_v48  ;;  %3682 = vtanh.f32 %v906_v61 }
  0x58   :  { %1046 = vadd.xlane.f32.xlu0 %v3635_v10  ;;  %v957_v10 = vrot.slane %v4013_v36, %v4068_v62  ;;  %v3671_v13 = vpop.eup %3670  ;;  %3684 = vtanh.f32 %v909_v0 }
  0x59   :  { %v908_v11 = vadd.f32 %v897_v9, %v4029_v44  ;;  %v3673_v16 = vpop.eup %3672 }
  0x5a   :  { %v971_v14 = vadd.f32 %v957_v10, %v4013_v36 }
  0x5b   :  { %1052 = vadd.xlane.f32.xlu1 %v3637_v12  ;;  %v953_v12 = vrot.slane %v3994_v30, %v4068_v62  ;;  %3686 = vtanh.f32 %v908_v11 }
  0x5c   :  { %1050 = vadd.xlane.f32.xlu0 %v3639_v15  ;;  %v965_v15 = vrot.slane %v4048_v52, %v4068_v62  ;;  %v3675_v19 = vpop.eup %3674  ;;  %3688 = vtanh.f32 %v971_v14 }
  0x5d   :  { %v970_v17 = vadd.f32 %v953_v12, %v3994_v30  ;;  %v3677_v24 = vpop.eup %3676 }
  0x5e   :  { %v973_v21 = vadd.f32 %v965_v15, %v4048_v52 }
  0x5f   :  { %1112 = vadd.xlane.f32.xlu1 %v3641_v18  ;;  %v961_v18 = vrot.slane %v4029_v44, %v4068_v62  ;;  %3690 = vtanh.f32 %v970_v17 }
  0x60   :  { %1110 = vadd.xlane.f32.xlu0 %v3643_v22  ;;  %v1021_v22 = vrot.slane %v4013_v36, %v4083_v20  ;;  %v3679_v27 = vpop.eup %3678  ;;  %3692 = vtanh.f32 %v973_v21 }
  0x61   :  { %v972_v25 = vadd.f32 %v961_v18, %v4029_v44  ;;  %v3681_v31 = vpop.eup %3680 }
  0x62   :  { %v1035_v28 = vadd.f32 %v1021_v22, %v4013_v36 }
  0x63   :  { %1116 = vadd.xlane.f32.xlu1 %v3645_v26  ;;  %v1017_v26 = vrot.slane %v3994_v30, %v4083_v20  ;;  %3694 = vtanh.f32 %v972_v25 }
  0x64   :  { %1114 = vadd.xlane.f32.xlu0 %v3647_v29  ;;  %v1029_v29 = vrot.slane %v4048_v52, %v4083_v20  ;;  %v3683_v35 = vpop.eup %3682  ;;  %3696 = vtanh.f32 %v1035_v28 }
  0x65   :  { %v1034_v32 = vadd.f32 %v1017_v26, %v3994_v30  ;;  %v3685_v40 = vpop.eup %3684 }
  0x66   :  { %v1037_v38 = vadd.f32 %v1029_v29, %v4048_v52 }
  0x67   :  { %672 = vadd.xlane.f32.xlu1 %v3649_v34  ;;  %v1025_v34 = vrot.slane %v4029_v44, %v4083_v20  ;;  %3698 = vtanh.f32 %v1034_v32 }
  0x68   :  { %670 = vadd.xlane.f32.xlu0 %v3651_v39  ;;  %v1085_v39 = vrot.slane %v4013_v36, %v4098_v37  ;;  %v3687_v43 = vpop.eup %3686  ;;  %3700 = vtanh.f32 %v1037_v38 }
  0x69   :  { %v1036_v41 = vadd.f32 %v1025_v34, %v4029_v44  ;;  %v3689_v46 = vpop.eup %3688 }
  0x6a   :  { %v1099_v45 = vadd.f32 %v1085_v39, %v4013_v36 }
  0x6b   :  { %736 = vadd.xlane.f32.xlu1 %v3653_v42  ;;  %v1081_v42 = vrot.slane %v3994_v30, %v4098_v37  ;;  %3702 = vtanh.f32 %v1036_v41 }
  0x6c   :  { %734 = vadd.xlane.f32.xlu0 %v3655_v3  ;;  %v1093_v3 = vrot.slane %v4048_v52, %v4098_v37  ;;  %v3691_v50 = vpop.eup %3690  ;;  %3704 = vtanh.f32 %v1099_v45 }
  0x6d   :  { %v1098_v47 = vadd.f32 %v1081_v42, %v3994_v30 }
  0x6e   :  { %v1101_v51 = vadd.f32 %v1093_v3, %v4048_v52 }
  0x6f   :  { %676 = vadd.xlane.f32.xlu1 %v3657_v49  ;;  %v1089_v49 = vrot.slane %v4029_v44, %v4098_v37  ;;  %3706 = vtanh.f32 %v1098_v47 }
  0x70   :  { %674 = vadd.xlane.f32.xlu0 %v3659_v53  ;;  %v3693_v53 = vpop.eup %3692  ;;  %3708 = vtanh.f32 %v1101_v51 }
  0x71   :  { %v1100_v36 = vadd.f32 %v1089_v49, %v4029_v44  ;;  %v3695_v54 = vpop.eup %3694 }
  0x72   :  { %v3697_v55 = vpop.eup %3696 }
  0x73   :  { %740 = vadd.xlane.f32.xlu1 %v3661_v56  ;;  %3710 = vtanh.f32 %v1100_v36 }
  0x74   :  { %738 = vadd.xlane.f32.xlu0 %v3663_v58  ;;  %v3699_v30 = vpop.eup %3698 }
  0x75   :  { %v3701_v56 = vpop.eup %3700 }
  0x77   :  { %800 = vadd.xlane.f32.xlu1 %v3665_v60 }
  0x78   :  { %798 = vadd.xlane.f32.xlu0 %v3667_v63  ;;  %v3703_v57 = vpop.eup %3702 }
  0x79   :  { %v3705_v5 = vpop.eup %3704 }
  0x7b   :  { %804 = vadd.xlane.f32.xlu1 %v3669_v4 }
  0x7c   :  { %802 = vadd.xlane.f32.xlu0 %v3671_v13  ;;  %v3707_v52 = vpop.eup %3706 }
  0x7d   :  { %v3709_v58 = vpop.eup %3708 }
  0x7f   :  { %864 = vadd.xlane.f32.xlu1 %v3673_v16 }
  0x80   :  { %862 = vadd.xlane.f32.xlu0 %v3675_v19  ;;  %v3711_v59 = vpop.eup %3710 }
  0x83   :  { %868 = vadd.xlane.f32.xlu1 %v3677_v24 }
  0x84   :  { %866 = vadd.xlane.f32.xlu0 %v3679_v27 }
  0x87   :  { %928 = vadd.xlane.f32.xlu1 %v3681_v31 }
  0x88   :  { %926 = vadd.xlane.f32.xlu0 %v3683_v35 }
  0x8b   :  { %932 = vadd.xlane.f32.xlu1 %v3685_v40 }
  0x8c   :  { %930 = vadd.xlane.f32.xlu0 %v3687_v43 }
  0x8f   :  { %992 = vadd.xlane.f32.xlu1 %v3689_v46 }
  0x90   :  { %990 = vadd.xlane.f32.xlu0 %v3691_v50 }
  0x93   :  { %996 = vadd.xlane.f32.xlu1 %v3693_v53 }
  0x94   :  { %994 = vadd.xlane.f32.xlu0 %v3695_v54 }
  0x97   :  { %1056 = vadd.xlane.f32.xlu1 %v3697_v55 }
  0x98   :  { %1054 = vadd.xlane.f32.xlu0 %v3699_v30 }
  0x9b   :  { %1060 = vadd.xlane.f32.xlu1 %v3701_v56 }
  0x9c   :  { %1058 = vadd.xlane.f32.xlu0 %v3703_v57 }
  0x9f   :  { %1120 = vadd.xlane.f32.xlu1 %v3705_v5 }
  0xa0   :  { %1118 = vadd.xlane.f32.xlu0 %v3707_v52 }
  0xa3   :  { %1124 = vadd.xlane.f32.xlu1 %v3709_v58 }
  0xa4   :  { %1122 = vadd.xlane.f32.xlu0 %v3711_v59 }
  0xb0   :  { %v727_v44 = vpop.xlane.xlu1 %726 }
  0xb1   :  { %v663_v1 = vpop.xlane.xlu0 %662  ;;  %v1187_v40 = vrot.slane %v727_v44, %v3930_v7 }
  0xb2   :  { %v1139_v41 = vrot.slane %v663_v1, %v3930_v7 }
  0xb4   :  { %v729_v60 = vpop.xlane.xlu1 %728  ;;  %v1513_v55 = vsel %vm1512_vm1, %v1139_v41, %v1187_v40 }
  0xb5   :  { %v665_v61 = vpop.xlane.xlu0 %664  ;;  %v1191_v42 = vrot.slane %v729_v60, %v3930_v7 }
  0xb6   :  { %v1143_v43 = vrot.slane %v665_v61, %v3930_v7 }
  0xb8   :  { %v669_v9 = vpop.xlane.xlu1 %668  ;;  %v1514_v5 = vsel %vm1512_vm1, %v1143_v43, %v1191_v42 }
  0xb9   :  { %v667_v63 = vpop.xlane.xlu0 %666  ;;  %v1151_v34 = vrot.slane %v669_v9, %v3930_v7 }
  0xba   :  { %v1147_v30 = vrot.slane %v667_v63, %v3930_v7 }
  0xbc   :  { %v733_v0 = vpop.xlane.xlu1 %732 }
  0xbd   :  { %v731_v10 = vpop.xlane.xlu0 %730  ;;  %v1199_v35 = vrot.slane %v733_v0, %v3930_v7 }
  0xbe   :  { %v1195_v49 = vrot.slane %v731_v10, %v3930_v7 }
  0xbf   :  { %v1516_v47 = vsel %vm1512_vm1, %v1151_v34, %v1199_v35 }
  0xc0   :  { %v793_v4 = vpop.xlane.xlu1 %792  ;;  %v1515_v60 = vsel %vm1512_vm1, %v1147_v30, %v1195_v49 }
  0xc1   :  { %v791_v11 = vpop.xlane.xlu0 %790  ;;  %v1239_v50 = vrot.slane %v793_v4, %v3930_v7 }
  0xc2   :  { %v1235_v53 = vrot.slane %v791_v11, %v3930_v7 }
  0xc3   :  { %v1523_v61 = vsel %vm1521_vm2, %v1514_v5, %v1239_v50 }
  0xc4   :  { %v797_v12 = vpop.xlane.xlu1 %796  ;;  %v1522_v10 = vsel %vm1521_vm2, %v1513_v55, %v1235_v53 }
  0xc5   :  { %v4213_v13 = vpop.xlane.xlu0 %794  ;;  %v1247_v45 = vrot.slane %v797_v12, %v3930_v7 }
  0xc6   :  { %v1243_v4 = vrot.slane %v4213_v13, %v3930_v7 }
  0xc7   :  { %v1525_v52 = vsel %vm1521_vm2, %v1516_v47, %v1247_v45 }
  0xc8   :  { %v857_v14 = vpop.xlane.xlu1 %856 }
  0xc9   :  { %v4215_v15 = vpop.xlane.xlu0 %854  ;;  %v1287_v36 = vrot.slane %v857_v14, %v3930_v7 }
  0xca   :  { %v1283_v56 = vrot.slane %v4215_v15, %v3930_v7 }
  0xcb   :  { %v1532_v11 = vsel %vm1530_vm3, %v1523_v61, %v1287_v36 }
  0xcc   :  { %v4217_v16 = vpop.xlane.xlu1 %860  ;;  %v1531_v15 = vsel %vm1530_vm3, %v1522_v10, %v1283_v56 }
  0xcd   :  { %v4219_v17 = vpop.xlane.xlu0 %858  ;;  %v1295_v57 = vrot.slane %v4217_v16, %v3930_v7 }
  0xcf   :  { %v1534_v16 = vsel %vm1530_vm3, %v1525_v52, %v1295_v57 }
  0xd0   :  { %v4221_v18 = vpop.xlane.xlu1 %920 }
  0xd1   :  { %v4223_v19 = vpop.xlane.xlu0 %918  ;;  %v1335_v58 = vrot.slane %v4221_v18, %v3930_v7  ;;  %v1291_v18 = vrot.slane %v4219_v17, %v3930_v7 }
  0xd2   :  { %v1331_v59 = vrot.slane %v4223_v19, %v3930_v7 }
  0xd4   :  { %v4225_v21 = vpop.xlane.xlu1 %924  ;;  %v4227_v22 = vpop.f32.mrf.mxu1 }
  0xd5   :  { %v4229_v24 = vpop.xlane.xlu0 %922  ;;  %v1343_v13 = vrot.slane %v4225_v21, %v3930_v7 }
  0xd6   :  { %v3428_v25 = vpop.f32.mrf.mxu1 }
  0xd7   :  { %v1541_v25 = vsel %vm1539_vm4, %v1532_v11, %v1335_v58 }
  0xd8   :  { %v4231_v26 = vpop.xlane.xlu1 %984  ;;  %v4233_v27 = vpop.f32.mrf.mxu1 }
  0xd9   :  { %v4235_v28 = vpop.xlane.xlu0 %982  ;;  %v1383_v9 = vrot.slane %v4231_v26, %v3930_v7  ;;  %v1540_v26 = vsel %vm1539_vm4, %v1531_v15, %v1331_v59 }
  0xda   :  { %v3433_v29 = vpop.f32.mrf.mxu1  ;;  %v1379_v63 = vrot.slane %v4235_v28, %v3930_v7  ;;  %v1339_v28 = vrot.slane %v4229_v24, %v3930_v7 }
  0xdb   :  { %v1550_v35 = vsel %vm1548_vm5, %v1541_v25, %v1383_v9 }
  0xdc   :  { %v4237_v31 = vpop.xlane.xlu1 %988  ;;  %v4239_v32 = vpop.f32.mrf.mxu1 }
  0xdd   :  { %v4243_v38 = vpop.xlane.xlu0 %986  ;;  %v1391_v17 = vrot.slane %v4237_v31, %v3930_v7 }
  0xde   :  { %v3438_v39 = vpop.f32.mrf.mxu1  ;;  %v1387_v42 = vrot.slane %v4243_v38, %v3930_v7 }
  0xdf   :  { %v1549_v39 = vsel %vm1548_vm5, %v1540_v26, %v1379_v63 }
  0xe0   :  { %v1049_v3 = vpop.xlane.xlu1 %1048  ;;  %v4250_v46 = vpop.f32.mrf.mxu1 }
  0xe1   :  { %v1047_v51 = vpop.xlane.xlu0 %1046  ;;  %v1431_v12 = vrot.slane %v1049_v3, %v3930_v7  ;;  %v1524_v3 = vsel %vm1521_vm2, %v1515_v60, %v1243_v4 }
  0xe2   :  { %v3443_v54 = vpop.f32.mrf.mxu1  ;;  %v1427_v19 = vrot.slane %v1047_v51, %v3930_v7  ;;  %v1533_v50 = vsel %vm1530_vm3, %v1524_v3, %v1291_v18  ;;  %v1543_v51 = vsel %vm1539_vm4, %v1534_v16, %v1343_v13 }
  0xe3   :  { %v1559_v21 = vsel %vm1557_vm6, %v1550_v35, %v1431_v12  ;;  %v1542_v54 = vsel %vm1539_vm4, %v1533_v50, %v1339_v28  ;;  %v1552_v55 = vsel %vm1548_vm5, %v1543_v51, %v1391_v17 }
  0xe4   :  { %v1053_v44 = vpop.xlane.xlu1 %1052  ;;  %v4269_v1 = vpop.f32.mrf.mxu1  ;;  %v1558_v47 = vsel %vm1557_vm6, %v1549_v39, %v1427_v19  ;;  %v1551_v57 = vsel %vm1548_vm5, %v1542_v54, %v1387_v42 }
  0xe5   :  { %v1051_v0 = vpop.xlane.xlu0 %1050  ;;  %v1439_v24 = vrot.slane %v1053_v44, %v3930_v7 }
  0xe6   :  { %v3448_v14 = vpop.f32.mrf.mxu1  ;;  %v1435_v49 = vrot.slane %v1051_v0, %v3930_v7 }
  0xe7   :  { %v1561_v5 = vsel %vm1557_vm6, %v1552_v55, %v1439_v24 }
  0xe8   :  { %v1113_v29 = vpop.xlane.xlu1 %1112  ;;  %v4293_v34 = vpop.f32.mrf.mxu1  ;;  %v1560_v59 = vsel %vm1557_vm6, %v1551_v57, %v1435_v49 }
  0xe9   :  { %v1479_v40 = vrot.slane %v1113_v29, %v3930_v7  ;;  %v1111_v41 = vpop.xlane.xlu0 %1110 }
  0xea   :  { %v1475_v43 = vrot.slane %v1111_v41, %v3930_v7  ;;  %v3453_v45 = vpop.f32.mrf.mxu1 }
  0xeb   :  { %v1568_v31 = vsel %vm1566_vm7, %v1559_v21, %v1479_v40 }
  0xec   :  { %1577 = vst.msk [vmem:[#allocation2 + $0x8] sm:$0xff] %vm1575_vm8, %v1568_v31  ;;  %v1567_v38 = vsel %vm1566_vm7, %v1558_v47, %v1475_v43  ;;  %v1117_v53 = vpop.xlane.xlu1 %1116  ;;  %v4313_v36 = vpop.f32.mrf.mxu1 }
  0xed   :  { %1576 = vst.msk [vmem:[#allocation2] sm:$0xff] %vm1575_vm8, %v1567_v38  ;;  %v1487_v30 = vrot.slane %v1117_v53, %v3930_v7  ;;  %v1115_v56 = vpop.xlane.xlu0 %1114 }
  0xee   :  { %v1483_v52 = vrot.slane %v1115_v56, %v3930_v7  ;;  %v3458_v58 = vpop.f32.mrf.mxu1 }
  0xef   :  { %v1570_v44 = vsel %vm1566_vm7, %v1561_v5, %v1487_v30 }
  0xf0   :  { %1579 = vst.msk [vmem:[#allocation2 + $0x18] sm:$0xff] %vm1575_vm8, %v1570_v44  ;;  %v1569_v60 = vsel %vm1566_vm7, %v1560_v59, %v1483_v52  ;;  %v673_v61 = vpop.xlane.xlu1 %672  ;;  %v4326_v9 = vpop.f32.mrf.mxu1 }
  0xf1   :  { %1578 = vst.msk [vmem:[#allocation2 + $0x10] sm:$0xff] %vm1575_vm8, %v1569_v60  ;;  %v671_v63 = vpop.xlane.xlu0 %670  ;;  %v1159_v50 = vrot.slane %v673_v61, %v3930_v7 }
  0xf2   :  { %v3463_v0 = vpop.f32.mrf.mxu1 }
  0xf3   :  { %v4329_v10 = vld [vmem:[#allocation2 + $0x8] sm:$0xff] }
  0xf4   :  { %v737_v4 = vpop.xlane.xlu1 %736  ;;  %v1694_v11 = vsel %vm1575_vm8, %v4329_v10, -inf  ;;  %v4333_v12 = vld [vmem:[#allocation2] sm:$0xff] }
  0xf5   :  { %v735_v14 = vpop.xlane.xlu0 %734  ;;  %1695 = vmax.xlane.f32.xlu1 %v1694_v11  ;;  %v1691_v15 = vsel %vm1575_vm8, %v4333_v12, -inf  ;;  %v1207_v51 = vrot.slane %v737_v4, %v3930_v7  ;;  %v1155_v4 = vrot.slane %v671_v63, %v3930_v7 }
  0xf6   :  { %1692 = vmax.xlane.f32.xlu0 %v1691_v15  ;;  %v1203_v52 = vrot.slane %v735_v14, %v3930_v7 }
  0xf7   :  { %v4337_v16 = vld [vmem:[#allocation2 + $0x18] sm:$0xff]  ;;  %v1518_v56 = vsel %vm1512_vm1, %v1159_v50, %v1207_v51 }
  0xf8   :  { %v677_v18 = vpop.xlane.xlu1 %676  ;;  %v1700_v19 = vsel %vm1575_vm8, %v4337_v16, -inf  ;;  %v4341_v25 = vld [vmem:[#allocation2 + $0x10] sm:$0xff] }
  0xf9   :  { %v675_v26 = vpop.xlane.xlu0 %674  ;;  %1701 = vmax.xlane.f32.xlu1 %v1700_v19  ;;  %v1697_v13 = vsel %vm1575_vm8, %v4341_v25, -inf  ;;  %v1167_v53 = vrot.slane %v677_v18, %v3930_v7 }
  0xfa   :  { %1698 = vmax.xlane.f32.xlu0 %v1697_v13  ;;  %v1163_v18 = vrot.slane %v675_v26, %v3930_v7 }
  0xfc   :  { %v741_v28 = vpop.xlane.xlu1 %740 }
  0xfd   :  { %v739_v29 = vpop.xlane.xlu0 %738  ;;  %v1215_v54 = vrot.slane %v741_v28, %v3930_v7 }
  0xfe   :  { %v1211_v60 = vrot.slane %v739_v29, %v3930_v7  ;;  %v1517_v29 = vsel %vm1512_vm1, %v1155_v4, %v1203_v52 }
  0xff   :  { %v1520_v58 = vsel %vm1512_vm1, %v1167_v53, %v1215_v54 }
 0x100   :  { %v801_v35 = vpop.xlane.xlu1 %800 }
 0x101   :  { %v799_v39 = vpop.xlane.xlu0 %798  ;;  %v1255_v30 = vrot.slane %v801_v35, %v3930_v7 }
 0x102   :  { %v1251_v0 = vrot.slane %v799_v39, %v3930_v7 }
 0x103   :  { %v1527_v61 = vsel %vm1521_vm2, %v1518_v56, %v1255_v30 }
 0x104   :  { %v805_v17 = vpop.xlane.xlu1 %804  ;;  %v1526_v26 = vsel %vm1521_vm2, %v1517_v29, %v1251_v0 }
 0x105   :  { %v4345_v40 = vpop.xlane.xlu0 %802  ;;  %v1263_v57 = vrot.slane %v805_v17, %v3930_v7 }
 0x107   :  { %v1529_v14 = vsel %vm1521_vm2, %v1520_v58, %v1263_v57 }
 0x108   :  { %v865_v41 = vpop.xlane.xlu1 %864 }
 0x109   :  { %v863_v42 = vpop.xlane.xlu0 %862  ;;  %v1303_v59 = vrot.slane %v865_v41, %v3930_v7  ;;  %v1519_v41 = vsel %vm1512_vm1, %v1163_v18, %v1211_v60 }
 0x10a   :  { %v1299_v11 = vrot.slane %v863_v42, %v3930_v7  ;;  %v1259_v42 = vrot.slane %v4345_v40, %v3930_v7 }
 0x10b   :  { %v1536_v35 = vsel %vm1530_vm3, %v1527_v61, %v1303_v59 }
 0x10c   :  { %v869_v21 = vpop.xlane.xlu1 %868 }
 0x10d   :  { %v4347_v24 = vpop.xlane.xlu0 %866  ;;  %v1311_v15 = vrot.slane %v869_v21, %v3930_v7 }
 0x10e   :  { %v1307_v50 = vrot.slane %v4347_v24, %v3930_v7 }
 0x110   :  { %v929_v43 = vpop.xlane.xlu1 %928 }
 0x111   :  { %v927_v45 = vpop.xlane.xlu0 %926  ;;  %v1351_v19 = vrot.slane %v929_v43, %v3930_v7  ;;  %v1535_v43 = vsel %vm1530_vm3, %v1526_v26, %v1299_v11 }
 0x112   :  { %v1347_v13 = vrot.slane %v927_v45, %v3930_v7  ;;  %v1538_v45 = vsel %vm1530_vm3, %v1529_v14, %v1311_v15 }
 0x114   :  { %v4349_v3 = vpop.xlane.xlu1 %932  ;;  %v1544_v51 = vsel %vm1539_vm4, %v1535_v43, %v1347_v13 }
 0x115   :  { %v4351_v47 = vpop.xlane.xlu0 %930  ;;  %v1359_v53 = vrot.slane %v4349_v3, %v3930_v7 }
 0x116   :  { %v1355_v40 = vrot.slane %v4351_v47, %v3930_v7  ;;  %v1528_v47 = vsel %vm1521_vm2, %v1519_v41, %v1259_v42 }
 0x117   :  { %v1537_v61 = vsel %vm1530_vm3, %v1528_v47, %v1307_v50  ;;  %v1547_v0 = vsel %vm1539_vm4, %v1538_v45, %v1359_v53  ;;  %v1596_v45 = vsel %vm1575_vm8, %v4233_v27, -inf  ;;  %v4443_v50 = vmul.f32 0.1, %v4233_v27 }
 0x118   :  { %v993_v49 = vpop.xlane.xlu1 %992  ;;  %v1546_v11 = vsel %vm1539_vm4, %v1537_v61, %v1355_v40  ;;  %v1602_v40 = vsel %vm1575_vm8, %v4250_v46, -inf  ;;  %v4490_v61 = vmul.f32 0.1, %v4313_v36  ;;  %vm3146_vm3 = vcmask 74752  }
 0x119   :  { %v991_v31 = vpop.xlane.xlu0 %990  ;;  %v1399_v39 = vrot.slane %v993_v49, %v3930_v7 }
 0x11a   :  { %v1395_v63 = vrot.slane %v991_v31, %v3930_v7  ;;  %v1545_v31 = vsel %vm1539_vm4, %v1536_v35, %v1351_v19  ;;  %vm2899_vm4 = vcmask 73728  }
 0x11b   :  { %v1554_v30 = vsel %vm1548_vm5, %v1545_v31, %v1399_v39  ;;  %v4448_v31 = vmul.f32 0.1, %v4227_v22 }
 0x11c   :  { %v997_v38 = vpop.xlane.xlu1 %996  ;;  %v1553_v56 = vsel %vm1548_vm5, %v1544_v51, %v1395_v63  ;;  %v1808_v51 = vsel %vm1575_vm8, %v4443_v50, -inf }
 0x11d   :  { %v4357_v55 = vpop.xlane.xlu0 %994  ;;  %v1407_v57 = vrot.slane %v997_v38, %v3930_v7  ;;  %v1805_v53 = vsel %vm1575_vm8, %v4448_v31, -inf }
 0x11e   :  { %v1403_v52 = vrot.slane %v4357_v55, %v3930_v7 }
 0x11f   :  { %v1556_v15 = vsel %vm1548_vm5, %v1547_v0, %v1407_v57 }
 0x120   :  { %v1057_v5 = vpop.xlane.xlu1 %1056  ;;  %v1555_v19 = vsel %vm1548_vm5, %v1546_v11, %v1403_v52  ;;  %v4471_v52 = vmul.f32 0.1, %v4293_v34  ;;  %vm3364_vm5 = vcmask 60416  }
 0x121   :  { %v1055_v44 = vpop.xlane.xlu0 %1054  ;;  %v1447_v21 = vrot.slane %v1057_v5, %v3930_v7 }
 0x122   :  { %v1443_v49 = vrot.slane %v1055_v44, %v3930_v7 }
 0x123   :  { %v1563_v58 = vsel %vm1557_vm6, %v1554_v30, %v1447_v21  ;;  %v1599_v30 = vsel %vm1575_vm8, %v4239_v32, -inf }
 0x124   :  { %v1061_v28 = vpop.xlane.xlu1 %1060  ;;  %v1562_v44 = vsel %vm1557_vm6, %v1553_v56, %v1443_v49  ;;  %v1593_v49 = vsel %vm1575_vm8, %v4227_v22, -inf  ;;  %v4462_v56 = vmul.f32 0.1, %v4239_v32 }
 0x125   :  { %v1059_v17 = vpop.xlane.xlu0 %1058  ;;  %v1455_v3 = vrot.slane %v1061_v28, %v3930_v7 }
 0x126   :  { %v1451_v60 = vrot.slane %v1059_v17, %v3930_v7 }
 0x127   :  { %v1565_v13 = vsel %vm1557_vm6, %v1556_v15, %v1455_v3  ;;  %v4476_v3 = vmul.f32 0.1, %v4269_v1 }
 0x128   :  { %v1121_v54 = vpop.xlane.xlu1 %1120  ;;  %v1564_v29 = vsel %vm1557_vm6, %v1555_v19, %v1451_v60  ;;  %v4485_v60 = vmul.f32 0.1, %v4326_v9 }
 0x129   :  { %v1495_v24 = vrot.slane %v1121_v54, %v3930_v7  ;;  %v1119_v5 = vpop.xlane.xlu0 %1118  ;;  %v4457_v54 = vmul.f32 0.1, %v4250_v46  ;;  %v1817_v47 = vsel %vm1575_vm8, %v4476_v3, -inf }
 0x12a   :  { %v1491_v59 = vrot.slane %v1119_v5, %v3930_v7  ;;  %v1608_v5 = vsel %vm1575_vm8, %v4293_v34, -inf  ;;  %v1826_v0 = vsel %vm1575_vm8, %v4485_v60, -inf }
 0x12b   :  { %v1572_v38 = vsel %vm1566_vm7, %v1563_v58, %v1495_v24  ;;  %v1814_v57 = vsel %vm1575_vm8, %v4457_v54, -inf  ;;  %v1811_v24 = vsel %vm1575_vm8, %v4462_v56, -inf  ;;  %v1605_v58 = vsel %vm1575_vm8, %v4269_v1, -inf }
 0x12c   :  { %1581 = vst.msk [vmem:[#allocation2 + $0x28] sm:$0xff] %vm1575_vm8, %v1572_v38  ;;  %v1571_v55 = vsel %vm1566_vm7, %v1562_v44, %v1491_v59  ;;  %v1125_v4 = vpop.xlane.xlu1 %1124  ;;  %v1820_v59 = vsel %vm1575_vm8, %v4471_v52, -inf  ;;  %v1614_v44 = vsel %vm1575_vm8, %v4326_v9, -inf  ;;  %v1611_v38 = vsel %vm1575_vm8, %v4313_v36, -inf }
 0x12d   :  { %1580 = vst.msk [vmem:[#allocation2 + $0x20] sm:$0xff] %vm1575_vm8, %v1571_v55  ;;  %v1503_v18 = vrot.slane %v1125_v4, %v3930_v7  ;;  %v1123_v14 = vpop.xlane.xlu0 %1122  ;;  %v1823_v55 = vsel %vm1575_vm8, %v4490_v61, -inf }
 0x12e   :  { %v1499_v28 = vrot.slane %v1123_v14, %v3930_v7 }
 0x12f   :  { %v1574_v35 = vsel %vm1566_vm7, %v1565_v13, %v1503_v18 }
 0x130   :  { %1583 = vst.msk [vmem:[#allocation2 + $0x38] sm:$0xff] %vm1575_vm8, %v1574_v35  ;;  %v1573_v39 = vsel %vm1566_vm7, %v1564_v29, %v1499_v28 }
 0x131   :  { %1582 = vst.msk [vmem:[#allocation2 + $0x30] sm:$0xff] %vm1575_vm8, %v1573_v39 }
 0x133   :  { %v4424_v63 = vld [vmem:[#allocation2 + $0x28] sm:$0xff] }
 0x134   :  { %v1706_v17 = vsel %vm1575_vm8, %v4424_v63, -inf  ;;  %v4428_v41 = vld [vmem:[#allocation2 + $0x20] sm:$0xff] }
 0x135   :  { %1707 = vmax.xlane.f32.xlu1 %v1706_v17  ;;  %v1703_v7 = vsel %vm1575_vm8, %v4428_v41, -inf }
 0x136   :  { %1704 = vmax.xlane.f32.xlu0 %v1703_v7 }
 0x137   :  { %v4432_v26 = vld [vmem:[#allocation2 + $0x38] sm:$0xff] }
 0x138   :  { %v1712_v42 = vsel %vm1575_vm8, %v4432_v26, -inf  ;;  %v4436_v21 = vld [vmem:[#allocation2 + $0x30] sm:$0xff] }
 0x139   :  { %1713 = vmax.xlane.f32.xlu1 %v1712_v42  ;;  %v1709_v43 = vsel %vm1575_vm8, %v4436_v21, -inf }
 0x13a   :  { %1710 = vmax.xlane.f32.xlu0 %v1709_v43 }
 0x13d   :  { %1597 = vmax.xlane.f32.xlu1 %v1596_v45 }
 0x13e   :  { %1594 = vmax.xlane.f32.xlu0 %v1593_v49 }
 0x141   :  { %1809 = vmax.xlane.f32.xlu1 %v1808_v51 }
 0x142   :  { %1806 = vmax.xlane.f32.xlu0 %v1805_v53 }
 0x145   :  { %1603 = vmax.xlane.f32.xlu1 %v1602_v40 }
 0x146   :  { %1600 = vmax.xlane.f32.xlu0 %v1599_v30 }
 0x149   :  { %1815 = vmax.xlane.f32.xlu1 %v1814_v57 }
 0x14a   :  { %1812 = vmax.xlane.f32.xlu0 %v1811_v24 }
 0x14d   :  { %1609 = vmax.xlane.f32.xlu1 %v1608_v5 }
 0x14e   :  { %1606 = vmax.xlane.f32.xlu0 %v1605_v58 }
 0x151   :  { %1821 = vmax.xlane.f32.xlu1 %v1820_v59 }
 0x152   :  { %1818 = vmax.xlane.f32.xlu0 %v1817_v47 }
 0x155   :  { %1615 = vmax.xlane.f32.xlu1 %v1614_v44 }
 0x156   :  { %1612 = vmax.xlane.f32.xlu0 %v1611_v38 }
 0x159   :  { %1827 = vmax.xlane.f32.xlu1 %v1826_v0 }
 0x15a   :  { %1824 = vmax.xlane.f32.xlu0 %v1823_v55 }
 0x17e   :  { %v1696_v4 = vpop.xlane.xlu1 %1695 }
 0x17f   :  { %v1716_v11 = vsub.f32 %v4329_v10, %v1696_v4  ;;  %v1693_v15 = vpop.xlane.xlu0 %1692 }
 0x180   :  { %v1715_v18 = vsub.f32 %v4333_v12, %v1693_v15 }
 0x181   :  { %v1725_v14 = vmul.f32 1.442695, %v1716_v11 }
 0x182   :  { %v1723_v19 = vmul.f32 1.442695, %v1715_v18  ;;  %v1702_v13 = vpop.xlane.xlu1 %1701 }
 0x183   :  { %3712 = vpow2.f32 %v1725_v14  ;;  %v1718_v28 = vsub.f32 %v4337_v16, %v1702_v13  ;;  %v1699_v29 = vpop.xlane.xlu0 %1698 }
 0x184   :  { %3714 = vpow2.f32 %v1723_v19  ;;  %v1717_v35 = vsub.f32 %v4341_v25, %v1699_v29 }
 0x185   :  { %v1729_v39 = vmul.f32 1.442695, %v1718_v28 }
 0x186   :  { %v1727_v17 = vmul.f32 1.442695, %v1717_v35 }
 0x187   :  { %3716 = vpow2.f32 %v1729_v39 }
 0x188   :  { %3718 = vpow2.f32 %v1727_v17 }
 0x190   :  { %v4500_v7 = vpop.eup %3712 }
 0x191   :  { %v4502_v10 = vpop.eup %3714  ;;  %v1742_v12 = vsel %vm1575_vm8, %v4500_v7, 0.0 }
 0x192   :  { %v1739_v42 = vsel %vm1575_vm8, %v4502_v10, 0.0  ;;  %1743 = vadd.xlane.f32.xlu1 %v1742_v12 }
 0x193   :  { %1740 = vadd.xlane.f32.xlu0 %v1739_v42 }
 0x194   :  { %v4508_v16 = vpop.eup %3716 }
 0x195   :  { %v4510_v43 = vpop.eup %3718  ;;  %v1748_v25 = vsel %vm1575_vm8, %v4508_v16, 0.0 }
 0x196   :  { %v1745_v45 = vsel %vm1575_vm8, %v4510_v43, 0.0  ;;  %1749 = vadd.xlane.f32.xlu1 %v1748_v25 }
 0x197   :  { %1746 = vadd.xlane.f32.xlu0 %v1745_v45 }
 0x1be   :  { %v1708_v49 = vpop.xlane.xlu1 %1707 }
 0x1bf   :  { %v1720_v51 = vsub.f32 %v4424_v63, %v1708_v49  ;;  %v1705_v53 = vpop.xlane.xlu0 %1704 }
 0x1c0   :  { %v1719_v40 = vsub.f32 %v4428_v41, %v1705_v53 }
 0x1c1   :  { %v1733_v30 = vmul.f32 1.442695, %v1720_v51 }
 0x1c2   :  { %v1731_v57 = vmul.f32 1.442695, %v1719_v40  ;;  %v1714_v24 = vpop.xlane.xlu1 %1713 }
 0x1c3   :  { %3720 = vpow2.f32 %v1733_v30  ;;  %v1722_v5 = vsub.f32 %v4432_v26, %v1714_v24  ;;  %v1711_v58 = vpop.xlane.xlu0 %1710 }
 0x1c4   :  { %3722 = vpow2.f32 %v1731_v57  ;;  %v1721_v59 = vsub.f32 %v4436_v21, %v1711_v58 }
 0x1c5   :  { %v1737_v47 = vmul.f32 1.442695, %v1722_v5 }
 0x1c6   :  { %v1735_v44 = vmul.f32 1.442695, %v1721_v59  ;;  %v1598_v38 = vpop.xlane.xlu1 %1597 }
 0x1c7   :  { %3724 = vpow2.f32 %v1737_v47  ;;  %v1595_v0 = vpop.xlane.xlu0 %1594  ;;  %v1618_v63 = vsub.f32 %v4233_v27, %v1598_v38 }
 0x1c8   :  { %3726 = vpow2.f32 %v1735_v44  ;;  %v1617_v41 = vsub.f32 %v4227_v22, %v1595_v0 }
 0x1c9   :  { %v1627_v55 = vmul.f32 1.442695, %v1618_v63 }
 0x1ca   :  { %v1625_v4 = vmul.f32 1.442695, %v1617_v41  ;;  %v1810_v11 = vpop.xlane.xlu1 %1809 }
 0x1cb   :  { %3728 = vpow2.f32 %v1627_v55  ;;  %v1807_v15 = vpop.xlane.xlu0 %1806  ;;  %v1830_v26 = vsub.f32 %v4443_v50, %v1810_v11 }
 0x1cc   :  { %3730 = vpow2.f32 %v1625_v4  ;;  %v1829_v21 = vsub.f32 %v4448_v31, %v1807_v15 }
 0x1cd   :  { %v1839_v18 = vmul.f32 1.442695, %v1830_v26 }
 0x1ce   :  { %v1837_v14 = vmul.f32 1.442695, %v1829_v21  ;;  %v1604_v19 = vpop.xlane.xlu1 %1603 }
 0x1cf   :  { %3732 = vpow2.f32 %v1839_v18  ;;  %v1601_v13 = vpop.xlane.xlu0 %1600  ;;  %v1620_v27 = vsub.f32 %v4250_v46, %v1604_v19 }
 0x1d0   :  { %v4525_v28 = vpop.eup %3720  ;;  %3734 = vpow2.f32 %v1837_v14  ;;  %v1619_v22 = vsub.f32 %v4239_v32, %v1601_v13 }
 0x1d1   :  { %v4528_v29 = vpop.eup %3722  ;;  %v1631_v35 = vmul.f32 1.442695, %v1620_v27  ;;  %v1754_v50 = vsel %vm1575_vm8, %v4525_v28, 0.0 }
 0x1d2   :  { %v1629_v39 = vmul.f32 1.442695, %v1619_v22  ;;  %v1816_v31 = vpop.xlane.xlu1 %1815  ;;  %v1751_v17 = vsel %vm1575_vm8, %v4528_v29, 0.0  ;;  %1755 = vadd.xlane.f32.xlu1 %v1754_v50 }
 0x1d3   :  { %3736 = vpow2.f32 %v1631_v35  ;;  %v1813_v12 = vpop.xlane.xlu0 %1812  ;;  %v1832_v46 = vsub.f32 %v4457_v54, %v1816_v31  ;;  %1752 = vadd.xlane.f32.xlu0 %v1751_v17 }
 0x1d4   :  { %v4535_v42 = vpop.eup %3724  ;;  %3738 = vpow2.f32 %v1629_v39  ;;  %v1831_v32 = vsub.f32 %v4462_v56, %v1813_v12 }
 0x1d5   :  { %v4538_v25 = vpop.eup %3726  ;;  %v1843_v45 = vmul.f32 1.442695, %v1832_v46  ;;  %v1760_v49 = vsel %vm1575_vm8, %v4535_v42, 0.0 }
 0x1d6   :  { %v1841_v51 = vmul.f32 1.442695, %v1831_v32  ;;  %v1610_v53 = vpop.xlane.xlu1 %1609  ;;  %v1757_v40 = vsel %vm1575_vm8, %v4538_v25, 0.0  ;;  %1761 = vadd.xlane.f32.xlu1 %v1760_v49 }
 0x1d7   :  { %3740 = vpow2.f32 %v1843_v45  ;;  %v1607_v54 = vpop.xlane.xlu0 %1606  ;;  %v1622_v30 = vsub.f32 %v4293_v34, %v1610_v53  ;;  %1758 = vadd.xlane.f32.xlu0 %v1757_v40 }
 0x1d8   :  { %v4545_v57 = vpop.eup %3728  ;;  %3742 = vpow2.f32 %v1841_v51  ;;  %v1621_v56 = vsub.f32 %v4269_v1, %v1607_v54 }
 0x1d9   :  { %v4548_v24 = vpop.eup %3730  ;;  %v1635_v5 = vmul.f32 1.442695, %v1622_v30  ;;  %v1644_v58 = vsel %vm1575_vm8, %v4545_v57, 0.0 }
 0x1da   :  { %v1633_v59 = vmul.f32 1.442695, %v1621_v56  ;;  %v1822_v47 = vpop.xlane.xlu1 %1821  ;;  %v1641_v44 = vsel %vm1575_vm8, %v4548_v24, 0.0  ;;  %1645 = vadd.xlane.f32.xlu1 %v1644_v58 }
 0x1db   :  { %3744 = vpow2.f32 %v1635_v5  ;;  %v1819_v34 = vpop.xlane.xlu0 %1818  ;;  %v1834_v38 = vsub.f32 %v4471_v52, %v1822_v47  ;;  %1642 = vadd.xlane.f32.xlu0 %v1641_v44 }
 0x1dc   :  { %v4555_v0 = vpop.eup %3732  ;;  %3746 = vpow2.f32 %v1633_v59  ;;  %v1833_v1 = vsub.f32 %v4476_v3, %v1819_v34  ;;  %v3855_v34 = vmov 1  }
 0x1dd   :  { %v4558_v63 = vpop.eup %3734  ;;  %v1847_v41 = vmul.f32 1.442695, %v1834_v38  ;;  %v1856_v55 = vsel %vm1575_vm8, %v4555_v0, 0.0  ;;  %3513 = vset.pattern.permute.xlu1 %v3855_v34  ;;  %v3856_v38 = vmov 0  }
 0x1de   :  { %v1845_v4 = vmul.f32 1.442695, %v1833_v1  ;;  %v1853_v11 = vsel %vm1575_vm8, %v4558_v63, 0.0  ;;  %1857 = vadd.xlane.f32.xlu1 %v1856_v55  ;;  %v1616_v15 = vpop.xlane.xlu1 %1615  ;;  %3512 = vset.pattern.permute.xlu0 %v3856_v38 }
 0x1df   :  { %3748 = vpow2.f32 %v1847_v41  ;;  %1854 = vadd.xlane.f32.xlu0 %v1853_v11  ;;  %v1613_v52 = vpop.xlane.xlu0 %1612  ;;  %v1624_v26 = vsub.f32 %v4326_v9, %v1616_v15 }
 0x1e0   :  { %v4565_v21 = vpop.eup %3736  ;;  %3750 = vpow2.f32 %v1845_v4  ;;  %v1623_v3 = vsub.f32 %v4313_v36, %v1613_v52 }
 0x1e1   :  { %v4568_v18 = vpop.eup %3738  ;;  %v1639_v14 = vmul.f32 1.442695, %v1624_v26  ;;  %v1650_v19 = vsel %vm1575_vm8, %v4565_v21, 0.0 }
 0x1e2   :  { %v1637_v13 = vmul.f32 1.442695, %v1623_v3  ;;  %v1647_v27 = vsel %vm1575_vm8, %v4568_v18, 0.0  ;;  %1651 = vadd.xlane.f32.xlu1 %v1650_v19  ;;  %v1828_v22 = vpop.xlane.xlu1 %1827 }
 0x1e3   :  { %3752 = vpow2.f32 %v1639_v14  ;;  %1648 = vadd.xlane.f32.xlu0 %v1647_v27  ;;  %v1825_v9 = vpop.xlane.xlu0 %1824  ;;  %v1836_v35 = vsub.f32 %v4485_v60, %v1828_v22 }
 0x1e4   :  { %v4575_v50 = vpop.eup %3740  ;;  %3754 = vpow2.f32 %v1637_v13  ;;  %v1835_v36 = vsub.f32 %v4490_v61, %v1825_v9 }
 0x1e5   :  { %v4578_v39 = vpop.eup %3742  ;;  %v1851_v31 = vmul.f32 1.442695, %v1836_v35  ;;  %v1862_v17 = vsel %vm1575_vm8, %v4575_v50, 0.0 }
 0x1e6   :  { %v1849_v12 = vmul.f32 1.442695, %v1835_v36  ;;  %v1859_v46 = vsel %vm1575_vm8, %v4578_v39, 0.0  ;;  %1863 = vadd.xlane.f32.xlu1 %v1862_v17  ;;  %v4626_v17 = vstv %s1592_s17 }
 0x1e7   :  { %3756 = vpow2.f32 %v1851_v31  ;;  %1860 = vadd.xlane.f32.xlu0 %v1859_v46 }
 0x1e8   :  { %v4584_v32 = vpop.eup %3744  ;;  %3758 = vpow2.f32 %v1849_v12 }
 0x1e9   :  { %v4586_v60 = vpop.eup %3746  ;;  %v1656_v61 = vsel %vm1575_vm8, %v4584_v32, 0.0 }
 0x1ea   :  { %v1653_v45 = vsel %vm1575_vm8, %v4586_v60, 0.0  ;;  %1657 = vadd.xlane.f32.xlu1 %v1656_v61 }
 0x1eb   :  { %1654 = vadd.xlane.f32.xlu0 %v1653_v45  ;;  %v4630_v45 = vstv %s3381_s18  ;;  %s3863_s18 = smov 108  }
 0x1ec   :  { %v4592_v49 = vpop.eup %3748 }
 0x1ed   :  { %v4594_v51 = vpop.eup %3750  ;;  %v1868_v53 = vsel %vm1575_vm8, %v4592_v49, 0.0 }
 0x1ee   :  { %v1865_v40 = vsel %vm1575_vm8, %v4594_v51, 0.0  ;;  %1869 = vadd.xlane.f32.xlu1 %v1868_v53 }
 0x1ef   :  { %1866 = vadd.xlane.f32.xlu0 %v1865_v40 }
 0x1f0   :  { %v4600_v54 = vpop.eup %3752 }
 0x1f1   :  { %v4602_v30 = vpop.eup %3754  ;;  %v1662_v56 = vsel %vm1575_vm8, %v4600_v54, 0.0 }
 0x1f2   :  { %v1659_v5 = vsel %vm1575_vm8, %v4602_v30, 0.0  ;;  %1663 = vadd.xlane.f32.xlu1 %v1662_v56 }
 0x1f3   :  { %1660 = vadd.xlane.f32.xlu0 %v1659_v5  ;;  %v4635_v5 = vstv %s3382_s19  ;;  %s3864_s19 = smov 78  }
 0x1f4   :  { %v4608_v58 = vpop.eup %3756 }
 0x1f5   :  { %v4610_v59 = vpop.eup %3758  ;;  %v1874_v47 = vsel %vm1575_vm8, %v4608_v58, 0.0 }
 0x1f6   :  { %v1871_v44 = vsel %vm1575_vm8, %v4610_v59, 0.0  ;;  %1875 = vadd.xlane.f32.xlu1 %v1874_v47 }
 0x1f7   :  { %1872 = vadd.xlane.f32.xlu0 %v1871_v44 }
 0x21b   :  { %v1744_v1 = vpop.xlane.xlu1 %1743 }
 0x21c   :  { %v1741_v41 = vpop.xlane.xlu0 %1740 }
 0x21d   :  { %3760 = vrcp.f32 %v1741_v41 }
 0x21f   :  { %v4618_v55 = vpop.xlane.xlu1 %1749 }
 0x220   :  { %v1747_v4 = vpop.xlane.xlu0 %1746 }
 0x22a   :  { %v3761_v35 = vpop.eup %3760 }
 0x22b   :  { %v1771_v12 = vmul.f32 %v3761_v35, %v4502_v10 }
 0x22d   :  { %v1780_v47 = vmul.f32 %v4630_v45, %v1771_v12 }
 0x25b   :  { %v1756_v11 = vpop.xlane.xlu1 %1755 }
 0x25c   :  { %v4620_v15 = vpop.xlane.xlu0 %1752 }
 0x25f   :  { %v1762_v52 = vpop.xlane.xlu1 %1761 }
 0x260   :  { %v1759_v26 = vpop.xlane.xlu0 %1758 }
 0x263   :  { %v1646_v3 = vpop.xlane.xlu1 %1645 }
 0x264   :  { %v1643_v14 = vpop.xlane.xlu0 %1642 }
 0x265   :  { %3762 = vrcp.f32 %v1643_v14 }
 0x267   :  { %v1858_v19 = vpop.xlane.xlu1 %1857 }
 0x268   :  { %v1855_v13 = vpop.xlane.xlu0 %1854 }
 0x269   :  { %3764 = vrcp.f32 %v1855_v13 }
 0x26a   :  { %3766 = vrcp.f32 %v1646_v3 }
 0x26b   :  { %v4622_v27 = vpop.xlane.xlu1 %1651  ;;  %3768 = vrcp.f32 %v1744_v1 }
 0x26c   :  { %v1649_v22 = vpop.xlane.xlu0 %1648  ;;  %3770 = vrcp.f32 %v1858_v19 }
 0x26d   :  { %3772 = vrcp.f32 %v1756_v11 }
 0x26f   :  { %v4624_v9 = vpop.xlane.xlu1 %1863 }
 0x270   :  { %v1861_v36 = vpop.xlane.xlu0 %1860 }
 0x272   :  { %v3763_v31 = vpop.eup %3762 }
 0x273   :  { %v1673_v46 = vmul.f32 %v3763_v31, %v4548_v24  ;;  %v1658_v61 = vpop.xlane.xlu1 %1657 }
 0x274   :  { %v4632_v53 = vpop.xlane.xlu0 %1654  ;;  %3774 = vrcp.f32 %v1658_v61 }
 0x275   :  { %v1682_v40 = vmul.f32 %v4626_v17, %v1673_v46 }
 0x276   :  { %v3765_v56 = vpop.eup %3764 }
 0x277   :  { %v1885_v44 = vmul.f32 %v3765_v56, %v4558_v63  ;;  %v1870_v1 = vpop.xlane.xlu1 %1869  ;;  %v3767_v41 = vpop.eup %3766  ;;  %v1788_v11 = vadd.f32 %v1780_v47, %v1682_v40  ;;  %v3858_v40 = vmov 2  }
 0x278   :  { %v4639_v10 = vpop.xlane.xlu0 %1866  ;;  %3776 = vrcp.f32 %v1870_v1  ;;  %v3769_v24 = vpop.eup %3768  ;;  %v1674_v19 = vmul.f32 %v3767_v41, %v4545_v57 }
 0x279   :  { %3778 = vrcp.f32 %v1747_v4  ;;  %v1894_v3 = vmul.f32 %v4635_v5, %v1885_v44  ;;  %v3771_v14 = vpop.eup %3770  ;;  %v1772_v63 = vmul.f32 %v3769_v24, %v4500_v7 }
 0x27a   :  { %3780 = vrcp.f32 %v1762_v52  ;;  %v1886_v12 = vmul.f32 %v3771_v14, %v4555_v0  ;;  %v3773_v4 = vpop.eup %3772  ;;  %v1683_v52 = vmul.f32 %v4626_v17, %v1674_v19  ;;  %v3857_v0 = vmov 3  }
 0x27b   :  { %3782 = vrcp.f32 %v1759_v26  ;;  %v4643_v13 = vadd.f32 %v1894_v3, %v1788_v11  ;;  %v1664_v35 = vpop.xlane.xlu1 %1663  ;;  %v1781_v61 = vmul.f32 %v4630_v45, %v1772_v63 }
 0x27c   :  { %v1661_v31 = vpop.xlane.xlu0 %1660  ;;  %3784 = vrcp.f32 %v1664_v35  ;;  %v1895_v7 = vmul.f32 %v4635_v5, %v1886_v12 }
 0x27d   :  { %3786 = vrcp.f32 %v1661_v31  ;;  %1912 = vperm.xlu0 %3512, %v4643_v13   ;;  %1991 = vperm.xlu1 %3513, %v4643_v13  }
 0x27e   :  { %3788 = vrcp.f32 %v1649_v22  ;;  %v1776_v22 = vmul.f32 %v3773_v4, %v4525_v28  ;;  %v3859_v28 = vmov 4  }
 0x27f   :  { %3790 = vrcp.f32 %v1861_v36  ;;  %v1876_v57 = vpop.xlane.xlu1 %1875  ;;  %v1789_v36 = vadd.f32 %v1781_v61, %v1683_v52 }
 0x280   :  { %v1873_v26 = vpop.xlane.xlu0 %1872  ;;  %3792 = vrcp.f32 %v1876_v57  ;;  %v1785_v24 = vmul.f32 %v4630_v45, %v1776_v22 }
 0x281   :  { %v3775_v46 = vpop.eup %3774  ;;  %3794 = vrcp.f32 %v1873_v26  ;;  %3515 = vset.pattern.permute.xlu0 %v3857_v0  ;;  %3514 = vset.pattern.permute.xlu1 %v3858_v40  ;;  %v4659_v1 = vadd.f32 %v1895_v7, %v1789_v36  ;;  %v3860_v26 = vmov 5  }
 0x282   :  { %v1678_v56 = vmul.f32 %v3775_v46, %v4584_v32  ;;  %2151 = vperm.xlu0 %3515, %v4643_v13   ;;  %2071 = vperm.xlu1 %3514, %v4643_v13   ;;  %3796 = vrcp.f32 %v4622_v27 }
 0x283   :  { %3798 = vrcp.f32 %v4618_v55 }
 0x284   :  { %v1687_v47 = vmul.f32 %v4626_v17, %v1678_v56  ;;  %3800 = vrcp.f32 %v4624_v9 }
 0x285   :  { %v3777_v44 = vpop.eup %3776  ;;  %3802 = vrcp.f32 %v4632_v53 }
 0x286   :  { %v3779_v41 = vpop.eup %3778  ;;  %v1890_v11 = vmul.f32 %v3777_v44, %v4592_v49  ;;  %3522 = vset.pattern.permute.xlu0 %v3858_v40  ;;  %3516 = vset.pattern.permute.xlu1 %v3859_v28  ;;  %v1793_v14 = vadd.f32 %v1785_v24, %v1687_v47  ;;  %3804 = vrcp.f32 %v4620_v15  ;;  %v3861_v47 = vmov 6  }
 0x287   :  { %v3781_v32 = vpop.eup %3780  ;;  %2231 = vperm.xlu1 %3516, %v4643_v13   ;;  %2075 = vperm.xlu0 %3522, %v4659_v1   ;;  %v1773_v22 = vmul.f32 %v3779_v41, %v4510_v43  ;;  %3806 = vrcp.f32 %v4639_v10  ;;  %v3862_v41 = vmov 7  }
 0x288   :  { %v3783_v3 = vpop.eup %3782  ;;  %v1899_v19 = vmul.f32 %v4635_v5, %v1890_v11  ;;  %v1778_v49 = vmul.f32 %v3781_v32, %v4535_v42 }
 0x289   :  { %v3785_v35 = vpop.eup %3784  ;;  %v1777_v52 = vmul.f32 %v3783_v3, %v4538_v25  ;;  %v1782_v10 = vmul.f32 %v4630_v45, %v1773_v22 }
 0x28a   :  { %v3787_v31 = vpop.eup %3786  ;;  %v4671_v63 = vadd.f32 %v1899_v19, %v1793_v14  ;;  %v1680_v12 = vmul.f32 %v3785_v35, %v4600_v54  ;;  %v1787_v9 = vmul.f32 %v4630_v45, %v1778_v49 }
 0x28b   :  { %v3789_v4 = vpop.eup %3788  ;;  %v1679_v57 = vmul.f32 %v3787_v31, %v4602_v30  ;;  %3517 = vset.pattern.permute.xlu1 %v3860_v26  ;;  %3524 = vset.pattern.permute.xlu0 %v3859_v28  ;;  %v1786_v46 = vmul.f32 %v4630_v45, %v1777_v52 }
 0x28c   :  { %v3791_v27 = vpop.eup %3790  ;;  %v1689_v55 = vmul.f32 %v4626_v17, %v1680_v12  ;;  %2311 = vperm.xlu1 %3517, %v4643_v13   ;;  %2235 = vperm.xlu0 %3524, %v4659_v1   ;;  %v1675_v61 = vmul.f32 %v3789_v4, %v4568_v18 }
 0x28d   :  { %v3793_v42 = vpop.eup %3792  ;;  %v1688_v54 = vmul.f32 %v4626_v17, %v1679_v57 }
 0x28e   :  { %v3795_v25 = vpop.eup %3794  ;;  %v1892_v30 = vmul.f32 %v3793_v42, %v4608_v58  ;;  %v1795_v56 = vadd.f32 %v1787_v9, %v1689_v55  ;;  %v1887_v58 = vmul.f32 %v3791_v27, %v4578_v39  ;;  %v1684_v18 = vmul.f32 %v4626_v17, %v1675_v61  ;;  %v3582_v9 = vld [vmem:[%s5295_s2 + $0x8] sm:$0xff]  }
 0x28f   :  { %v1891_v7 = vmul.f32 %v3795_v25, %v4610_v59  ;;  %v1794_v15 = vadd.f32 %v1786_v46, %v1688_v54  ;;  %v3797_v39 = vpop.eup %3796  ;;  %v3580_v54 = vld [vmem:[%s5295_s2 + $0x18] sm:$0xff]   ;;  %v3581_v25 = vld [vmem:[%s5295_s2 + $0x10] sm:$0xff]  }
 0x290   :  { %v1901_v36 = vmul.f32 %v4635_v5, %v1892_v30  ;;  %3518 = vset.pattern.permute.xlu1 %v3861_v47  ;;  %3526 = vset.pattern.permute.xlu0 %v3861_v47  ;;  %v1896_v44 = vmul.f32 %v4635_v5, %v1887_v58  ;;  %v3799_v24 = vpop.eup %3798  ;;  %v1790_v11 = vadd.f32 %v1782_v10, %v1684_v18  ;;  %v3583_v30 = vld [vmem:[%s5295_s2] sm:$0xff]  }
 0x291   :  { %v1900_v53 = vmul.f32 %v4635_v5, %v1891_v7  ;;  %2391 = vperm.xlu1 %3518, %v4643_v13   ;;  %2395 = vperm.xlu0 %3526, %v4659_v1   ;;  %v3801_v32 = vpop.eup %3800  ;;  %v1676_v3 = vmul.f32 %v3797_v39, %v4565_v21  ;;  %v1774_v35 = vmul.f32 %v3799_v24, %v4508_v16 }
 0x292   :  { %v4699_v43 = vadd.f32 %v1901_v36, %v1795_v56  ;;  %v1904_v14 = vadd.f32 %v1896_v44, %v1790_v11  ;;  %v3803_v19 = vpop.eup %3802  ;;  %v1888_v31 = vmul.f32 %v3801_v32, %v4575_v50 }
 0x293   :  { %v4702_v59 = vadd.f32 %v1900_v53, %v1794_v15  ;;  %v1685_v12 = vmul.f32 %v4626_v17, %v1676_v3  ;;  %v1677_v4 = vmul.f32 %v3803_v19, %v4586_v60  ;;  %v1783_v21 = vmul.f32 %v4630_v45, %v1774_v35  ;;  %v4824_v53 = vld [vmem:[%s5294_s1] sm:$0xff] }
 0x294   :  { %v1897_v52 = vmul.f32 %v4635_v5, %v1888_v31  ;;  %v1953_v18 = vrot.slane %v4824_v53, %v3933_v8  ;;  %v2025_v10 = vrot.slane %v4824_v53, %v3927_v6  ;;  %v2105_v44 = vrot.slane %v4824_v53, %v3975_v23 }
 0x295   :  { %3519 = vset.pattern.permute.xlu1 %v3862_v41  ;;  %3527 = vset.pattern.permute.xlu0 %v3862_v41  ;;  %v1791_v57 = vadd.f32 %v1783_v21, %v1685_v12  ;;  %v1686_v27 = vmul.f32 %v4626_v17, %v1677_v4  ;;  %v3576_v17 = vld [vmem:[%s5295_s2 + $0x38] sm:$0xff]   ;;  %v2185_v31 = vrot.slane %v4824_v53, %v4005_v33 }
 0x296   :  { %2471 = vperm.xlu1 %3519, %v4643_v13   ;;  %2475 = vperm.xlu0 %3527, %v4659_v1   ;;  %v3805_v13 = vpop.eup %3804  ;;  %v2265_v4 = vrot.slane %v4824_v53, %v4040_v48 }
 0x297   :  { %v3807_v49 = vpop.eup %3806  ;;  %v1775_v16 = vmul.f32 %v3805_v13, %v4528_v29  ;;  %v4726_v55 = vadd.f32 %v1897_v52, %v1791_v57  ;;  %3464 = vmatprep.subr.bf16.mxu0 %v3576_v17 }
 0x298   :  { %v1889_v50 = vmul.f32 %v3807_v49, %v4594_v51  ;;  %3465 = vmatpush3.bf16.msra.mxu0 %v3576_v17 }
 0x299   :  { %v1784_v60 = vmul.f32 %v4630_v45, %v1775_v16  ;;  %v3577_v45 = vld [vmem:[%s5295_s2 + $0x30] sm:$0xff]  }
 0x29a   :  { %3520 = vset.pattern.permute.xlu1 %v3856_v38  ;;  %3534 = vset.pattern.permute.xlu0 %v3861_v47  ;;  %v1898_v42 = vmul.f32 %v4635_v5, %v1889_v50  ;;  %v3578_v5 = vld [vmem:[%s5295_s2 + $0x28] sm:$0xff]  }
 0x29b   :  { %2399 = vperm.xlu0 %3534, %v1904_v14   ;;  %1917 = vperm.xlu1 %3520, %v4659_v1   ;;  %v1792_v29 = vadd.f32 %v1784_v60, %v1686_v27  ;;  %v2345_v27 = vrot.slane %v4824_v53, %v4068_v62 }
 0x29c   :  { %3466 = vmatprep.subr.bf16.mxu0 %v3577_v45 }
 0x29d   :  { %v4734_v51 = vadd.f32 %v1898_v42, %v1792_v29  ;;  %3467 = vmatpush3.bf16.msra.mxu0 %v3577_v45 }
 0x29e   :  { %3468 = vmatprep.subr.bf16.mxu0 %v3578_v5 }
 0x29f   :  { %3535 = vset.pattern.permute.xlu0 %v3862_v41  ;;  %3521 = vset.pattern.permute.xlu1 %v3855_v34 }
 0x2a0   :  { %2479 = vperm.xlu0 %3535, %v1904_v14   ;;  %1995 = vperm.xlu1 %3521, %v4659_v1  }
 0x2a1   :  { %3469 = vmatpush3.bf16.msra.mxu0 %v3578_v5 }
 0x2a4   :  { %3539 = vset.pattern.permute.xlu0 %v3857_v0  ;;  %3523 = vset.pattern.permute.xlu1 %v3857_v0 }
 0x2a5   :  { %2155 = vperm.xlu1 %3523, %v4659_v1   ;;  %2163 = vperm.xlu0 %3539, %v4726_v55  }
 0x2a9   :  { %3525 = vset.pattern.permute.xlu1 %v3860_v26  ;;  %3544 = vset.pattern.permute.xlu0 %v3856_v38 }
 0x2aa   :  { %2315 = vperm.xlu1 %3525, %v4659_v1   ;;  %1932 = vperm.xlu0 %3544, %v4734_v51   ;;  %v3579_v1 = vld [vmem:[%s5295_s2 + $0x20] sm:$0xff]  }
 0x2ab   :  { %3470 = vmatprep.subr.bf16.mxu0 %v3579_v1 }
 0x2ac   :  { %3471 = vmatpush3.bf16.msra.mxu0 %v3579_v1 }
 0x2ad   :  { %3472 = vmatprep.subr.bf16.mxu0 %v3580_v54 }
 0x2ae   :  { %3528 = vset.pattern.permute.xlu1 %v3856_v38  ;;  %3546 = vset.pattern.permute.xlu0 %v3858_v40 }
 0x2af   :  { %1922 = vperm.xlu1 %3528, %v1904_v14   ;;  %2087 = vperm.xlu0 %3546, %v4734_v51  }
 0x2b0   :  { %3473 = vmatpush3.bf16.msra.mxu0 %v3580_v54 }
 0x2b1   :  { %3474 = vmatprep.subr.bf16.mxu0 %v3581_v25 }
 0x2b3   :  { %3529 = vset.pattern.permute.xlu1 %v3855_v34  ;;  %3547 = vset.pattern.permute.xlu0 %v3857_v0 }
 0x2b4   :  { %1999 = vperm.xlu1 %3529, %v1904_v14   ;;  %2167 = vperm.xlu0 %3547, %v4734_v51  }
 0x2b5   :  { %3475 = vmatpush3.bf16.msra.mxu0 %v3581_v25  ;;  %v2505_v25 = vrot.slane %v4824_v53, %v4098_v37 }
 0x2b6   :  { %3476 = vmatprep.subr.bf16.mxu0 %v3582_v9 }
 0x2b8   :  { %3530 = vset.pattern.permute.xlu1 %v3858_v40  ;;  %3548 = vset.pattern.permute.xlu0 %v3859_v28 }
 0x2b9   :  { %2079 = vperm.xlu1 %3530, %v1904_v14   ;;  %2247 = vperm.xlu0 %3548, %v4734_v51  }
 0x2ba   :  { %3477 = vmatpush3.bf16.msra.mxu0 %v3582_v9 }
 0x2bb   :  { %3478 = vmatprep.subr.bf16.mxu0 %v3583_v30 }
 0x2bd   :  { %3531 = vset.pattern.permute.xlu1 %v3857_v0  ;;  %3550 = vset.pattern.permute.xlu0 %v3861_v47 }
 0x2be   :  { %2159 = vperm.xlu1 %3531, %v1904_v14   ;;  %2407 = vperm.xlu0 %3550, %v4734_v51  }
 0x2bf   :  { %3479 = vmatpush3.bf16.msra.mxu0 %v3583_v30 }
 0x2c2   :  { %3532 = vset.pattern.permute.xlu1 %v3859_v28  ;;  %3553 = vset.pattern.permute.xlu0 %v3855_v34 }
 0x2c3   :  { %2239 = vperm.xlu1 %3532, %v1904_v14   ;;  %2011 = vperm.xlu0 %3553, %v4671_v63  }
 0x2c7   :  { %3533 = vset.pattern.permute.xlu1 %v3860_v26  ;;  %3557 = vset.pattern.permute.xlu0 %v3860_v26 }
 0x2c8   :  { %2319 = vperm.xlu1 %3533, %v1904_v14   ;;  %2331 = vperm.xlu0 %3557, %v4671_v63   ;;  %v3809_v14 = vld [vmem:[%s5294_s1 + $0x8] sm:$0xff] }
 0x2c9   :  { %v1957_v19 = vrot.slane %v3809_v14, %v3933_v8  ;;  %v2109_v13 = vrot.slane %v3809_v14, %v3975_v23  ;;  %v2189_v16 = vrot.slane %v3809_v14, %v4005_v33  ;;  %v2269_v60 = vrot.slane %v3809_v14, %v4040_v48 }
 0x2ca   :  { %v2349_v9 = vrot.slane %v3809_v14, %v4068_v62 }
 0x2cc   :  { %3536 = vset.pattern.permute.xlu1 %v3856_v38  ;;  %3559 = vset.pattern.permute.xlu0 %v3856_v38 }
 0x2cd   :  { %1927 = vperm.xlu1 %3536, %v4726_v55   ;;  %1942 = vperm.xlu0 %3559, %v4702_v59  }
 0x2d1   :  { %3537 = vset.pattern.permute.xlu1 %v3855_v34  ;;  %3567 = vset.pattern.permute.xlu0 %v3855_v34 }
 0x2d2   :  { %2003 = vperm.xlu1 %3537, %v4726_v55   ;;  %2019 = vperm.xlu0 %3567, %v4699_v43  }
 0x2d6   :  { %3538 = vset.pattern.permute.xlu1 %v3858_v40  ;;  %3570 = vset.pattern.permute.xlu0 %v3859_v28 }
 0x2d7   :  { %2083 = vperm.xlu1 %3538, %v4726_v55   ;;  %2259 = vperm.xlu0 %3570, %v4699_v43  }
 0x2db   :  { %3540 = vset.pattern.permute.xlu1 %v3859_v28  ;;  %3572 = vset.pattern.permute.xlu0 %v3861_v47 }
 0x2dc   :  { %2243 = vperm.xlu1 %3540, %v4726_v55   ;;  %2419 = vperm.xlu0 %3572, %v4699_v43  }
 0x2e0   :  { %3541 = vset.pattern.permute.xlu1 %v3860_v26  ;;  %3573 = vset.pattern.permute.xlu0 %v3862_v41 }
 0x2e1   :  { %2323 = vperm.xlu1 %3541, %v4726_v55   ;;  %2491 = vperm.xlu0 %3573, %v4671_v63  }
 0x2e5   :  { %3542 = vset.pattern.permute.xlu1 %v3861_v47  ;;  %3575 = vset.pattern.permute.xlu0 %v3856_v38 }
 0x2e6   :  { %2403 = vperm.xlu1 %3542, %v4726_v55   ;;  %2822 = vrot.lane.b32.xlu0 %v3853_v2, %s3863_s18 }
 0x2ea   :  { %3543 = vset.pattern.permute.xlu1 %v3862_v41 }
 0x2eb   :  { %2483 = vperm.xlu1 %3543, %v4726_v55  }
 0x2ef   :  { %3545 = vset.pattern.permute.xlu1 %v3855_v34 }
 0x2f0   :  { %2007 = vperm.xlu1 %3545, %v4734_v51  }
 0x2f4   :  { %3549 = vset.pattern.permute.xlu1 %v3860_v26 }
 0x2f5   :  { %2327 = vperm.xlu1 %3549, %v4734_v51  }
 0x2f8   :  { %v1992_v46 = vpop.permute.xlu1 %1991  ;;  %v1913_v56 = vpop.permute.xlu0 %1912 }
 0x2f9   :  { %3551 = vset.pattern.permute.xlu1 %v3862_v41  ;;  %v1982_v24 = vmul.f32 %v1953_v18, %v1913_v56  ;;  %v2054_v11 = vmul.f32 %v2025_v10, %v1992_v46 }
 0x2fa   :  { %2487 = vperm.xlu1 %3551, %v4734_v51   ;;  %v2425_v51 = vrot.slane %v4824_v53, %v4083_v20 }
 0x2fb   :  { %v2062_v35 = vadd.f32 %v2054_v11, %v1982_v24 }
 0x2fd   :  { %v2072_v61 = vpop.permute.xlu1 %2071  ;;  %v2152_v58 = vpop.permute.xlu0 %2151 }
 0x2fe   :  { %3552 = vset.pattern.permute.xlu1 %v3856_v38  ;;  %v2134_v3 = vmul.f32 %v2105_v44, %v2072_v61  ;;  %v2214_v50 = vmul.f32 %v2185_v31, %v2152_v58  ;;  %v2509_v44 = vrot.slane %v3809_v14, %v4098_v37 }
 0x2ff   :  { %1937 = vperm.xlu1 %3552, %v4671_v63  }
 0x302   :  { %v2232_v7 = vpop.permute.xlu1 %2231  ;;  %v2076_v39 = vpop.permute.xlu0 %2075 }
 0x303   :  { %3554 = vset.pattern.permute.xlu1 %v3858_v40  ;;  %v2135_v57 = vmul.f32 %v2109_v13, %v2076_v39  ;;  %v2294_v29 = vmul.f32 %v2265_v4, %v2232_v7  ;;  %v2429_v7 = vrot.slane %v3809_v14, %v4083_v20 }
 0x304   :  { %2091 = vperm.xlu1 %3554, %v4671_v63  }
 0x307   :  { %v2312_v22 = vpop.permute.xlu1 %2311  ;;  %v2236_v49 = vpop.permute.xlu0 %2235 }
 0x308   :  { %3555 = vset.pattern.permute.xlu1 %v3857_v0  ;;  %v2374_v54 = vmul.f32 %v2345_v27, %v2312_v22  ;;  %v2295_v30 = vmul.f32 %v2269_v60, %v2236_v49 }
 0x309   :  { %2171 = vperm.xlu1 %3555, %v4671_v63  }
 0x30c   :  { %v2392_v36 = vpop.permute.xlu1 %2391  ;;  %v2396_v5 = vpop.permute.xlu0 %2395 }
 0x30d   :  { %3556 = vset.pattern.permute.xlu1 %v3859_v28  ;;  %v2454_v56 = vmul.f32 %v2425_v51, %v2392_v36  ;;  %v2455_v11 = vmul.f32 %v2429_v7, %v2396_v5  ;;  %v4913_v51 = vld [vmem:[%s5296_s3] ss:$0 sm:$0xff] }
 0x30e   :  { %2251 = vperm.xlu1 %3556, %v4671_v63   ;;  %3110 = vrot.lane.b32.xlu0 %v4913_v51, %s3863_s18 }
 0x311   :  { %v2472_v15 = vpop.permute.xlu1 %2471  ;;  %v2476_v24 = vpop.permute.xlu0 %2475 }
 0x312   :  { %3558 = vset.pattern.permute.xlu1 %v3861_v47  ;;  %v2534_v39 = vmul.f32 %v2505_v25, %v2472_v15 }
 0x313   :  { %2411 = vperm.xlu1 %3558, %v4671_v63   ;;  %v2029_v63 = vrot.slane %v3809_v14, %v3927_v6 }
 0x316   :  { %v1918_v32 = vpop.permute.xlu1 %1917  ;;  %v4870_v4 = vpop.permute.xlu0 %2399 }
 0x317   :  { %3560 = vset.pattern.permute.xlu1 %v3855_v34  ;;  %v2142_v34 = vadd.f32 %v2134_v3, %v2062_v35  ;;  %v1983_v21 = vmul.f32 %v1957_v19, %v1918_v32  ;;  %v2535_v19 = vmul.f32 %v2509_v44, %v2476_v24 }
 0x318   :  { %2015 = vperm.xlu1 %3560, %v4702_v59  }
 0x319   :  { %v2222_v42 = vadd.f32 %v2214_v50, %v2142_v34 }
 0x31b   :  { %v1996_v12 = vpop.permute.xlu1 %1995  ;;  %v2302_v61 = vadd.f32 %v2294_v29, %v2222_v42 }
 0x31c   :  { %v2055_v52 = vmul.f32 %v2029_v63, %v1996_v12  ;;  %3561 = vset.pattern.permute.xlu1 %v3858_v40 }
 0x31d   :  { %2095 = vperm.xlu1 %3561, %v4702_v59   ;;  %v2382_v10 = vadd.f32 %v2374_v54, %v2302_v61 }
 0x31e   :  { %v2063_v55 = vadd.f32 %v2055_v52, %v1983_v21 }
 0x31f   :  { %v2462_v32 = vadd.f32 %v2454_v56, %v2382_v10 }
 0x320   :  { %v2143_v17 = vadd.f32 %v2135_v57, %v2063_v55  ;;  %v2156_v45 = vpop.permute.xlu1 %2155 }
 0x321   :  { %v2215_v1 = vmul.f32 %v2189_v16, %v2156_v45  ;;  %3562 = vset.pattern.permute.xlu1 %v3857_v0  ;;  %v2542_v63 = vadd.f32 %v2534_v39, %v2462_v32 }
 0x322   :  { %2175 = vperm.xlu1 %3562, %v4702_v59  }
 0x323   :  { %v2223_v46 = vadd.f32 %v2215_v1, %v2143_v17  ;;  %v2550_v15 = vadd.f32 %v4824_v53, %v2542_v63 }
 0x325   :  { %v2303_v58 = vadd.f32 %v2295_v30, %v2223_v46  ;;  %v2316_v18 = vpop.permute.xlu1 %2315 }
 0x326   :  { %v2375_v22 = vmul.f32 %v2349_v9, %v2316_v18  ;;  %3563 = vset.pattern.permute.xlu1 %v3859_v28 }
 0x327   :  { %2255 = vperm.xlu1 %3563, %v4702_v59  }
 0x328   :  { %v2383_v3 = vadd.f32 %v2375_v22, %v2303_v58 }
 0x32a   :  { %v2463_v35 = vadd.f32 %v2455_v11, %v2383_v3  ;;  %v1923_v31 = vpop.permute.xlu1 %1922 }
 0x32b   :  { %3564 = vset.pattern.permute.xlu1 %v3860_v26 }
 0x32c   :  { %2335 = vperm.xlu1 %3564, %v4702_v59   ;;  %v2543_v36 = vadd.f32 %v2535_v19, %v2463_v35 }
 0x32e   :  { %v2551_v13 = vadd.f32 %v3809_v14, %v2543_v36 }
 0x32f   :  { %v2000_v49 = vpop.permute.xlu1 %1999 }
 0x330   :  { %3565 = vset.pattern.permute.xlu1 %v3861_v47  ;;  %v2558_v28 = vpack.c.bf16 %v2551_v13, %v2550_v15  ;;  %v4875_v47 = vpop.permute.xlu0 %2479 }
 0x331   :  { %2415 = vperm.xlu1 %3565, %v4702_v59  }
 0x332   :  { %3480 = vmatprep.mubr.bf16.mxu0 %v2558_v28 }
 0x334   :  { %v2080_v12 = vpop.permute.xlu1 %2079 }
 0x335   :  { %3566 = vset.pattern.permute.xlu1 %v3856_v38  ;;  %v2164_v38 = vpop.permute.xlu0 %2163 }
 0x336   :  { %1947 = vperm.xlu1 %3566, %v4699_v43  }
 0x339   :  { %v2160_v34 = vpop.permute.xlu1 %2159 }
 0x33a   :  { %3568 = vset.pattern.permute.xlu1 %v3858_v40  ;;  %v4882_v40 = vpop.permute.xlu0 %1932 }
 0x33b   :  { %2099 = vperm.xlu1 %3568, %v4699_v43  }
 0x33e   :  { %v2240_v53 = vpop.permute.xlu1 %2239  ;;  %v4900_v57 = vpop.permute.xlu0 %2087 }
 0x33f   :  { %3569 = vset.pattern.permute.xlu1 %v3857_v0  ;;  %v4887_v0 = vld [vmem:[%s5294_s1 + $0x10] sm:$0xff] }
 0x340   :  { %2179 = vperm.xlu1 %3569, %v4699_v43   ;;  %v2033_v16 = vrot.slane %v4887_v0, %v3927_v6  ;;  %v2193_v60 = vrot.slane %v4887_v0, %v4005_v33  ;;  %v2273_v45 = vrot.slane %v4887_v0, %v4040_v48  ;;  %v2353_v54 = vrot.slane %v4887_v0, %v4068_v62 }
 0x341   :  { %v2433_v24 = vrot.slane %v4887_v0, %v4083_v20  ;;  %v2513_v13 = vrot.slane %v4887_v0, %v4098_v37 }
 0x342   :  { %v2056_v27 = vmul.f32 %v2033_v16, %v2000_v49  ;;  %v2216_v25 = vmul.f32 %v2193_v60, %v2160_v34  ;;  %v2296_v56 = vmul.f32 %v2273_v45, %v2240_v53  ;;  %v3812_v45 = vld [vmem:[%s5294_s1 + $0x20] sm:$0xff] }
 0x343   :  { %v2320_v14 = vpop.permute.xlu1 %2319  ;;  %v2456_v15 = vmul.f32 %v2433_v24, %v4870_v4 }
 0x344   :  { %3571 = vset.pattern.permute.xlu1 %v3860_v26  ;;  %v1961_v26 = vrot.slane %v4887_v0, %v3933_v8  ;;  %v2376_v10 = vmul.f32 %v2353_v54, %v2320_v14 }
 0x345   :  { %2339 = vperm.xlu1 %3571, %v4699_v43  }
 0x346   :  { %v1984_v29 = vmul.f32 %v1961_v26, %v1923_v31 }
 0x348   :  { %v1928_v21 = vpop.permute.xlu1 %1927  ;;  %v2064_v1 = vadd.f32 %v2056_v27, %v1984_v29 }
 0x349   :  { %3574 = vset.pattern.permute.xlu1 %v3862_v41  ;;  %v2113_v41 = vrot.slane %v4887_v0, %v3975_v23 }
 0x34a   :  { %2495 = vperm.xlu1 %3574, %v4702_v59   ;;  %v3811_v59 = vld [vmem:[%s5294_s1 + $0x18] sm:$0xff] }
 0x34b   :  { %v2037_v50 = vrot.slane %v3811_v59, %v3927_v6  ;;  %v2117_v42 = vrot.slane %v3811_v59, %v3975_v23  ;;  %v2136_v17 = vmul.f32 %v2113_v41, %v2080_v12  ;;  %v2197_v61 = vrot.slane %v3811_v59, %v4005_v33 }
 0x34c   :  { %v2277_v39 = vrot.slane %v3811_v59, %v4040_v48  ;;  %v2357_v3 = vrot.slane %v3811_v59, %v4068_v62  ;;  %v2437_v36 = vrot.slane %v3811_v59, %v4083_v20  ;;  %v2517_v14 = vrot.slane %v3811_v59, %v4098_v37 }
 0x34d   :  { %v2004_v52 = vpop.permute.xlu1 %2003  ;;  %v2144_v7 = vadd.f32 %v2136_v17, %v2064_v1  ;;  %v2217_v11 = vmul.f32 %v2197_v61, %v2164_v38  ;;  %v2201_v61 = vrot.slane %v3812_v45, %v4005_v33 }
 0x34e   :  { %2499 = vperm.xlu1 %3574, %v4699_v43   ;;  %v1965_v43 = vrot.slane %v3811_v59, %v3933_v8  ;;  %v2057_v5 = vmul.f32 %v2037_v50, %v2004_v52 }
 0x34f   :  { %v2224_v18 = vadd.f32 %v2216_v25, %v2144_v7 }
 0x350   :  { %v1985_v9 = vmul.f32 %v1965_v43, %v1928_v21  ;;  %v2536_v21 = vmul.f32 %v2513_v13, %v4875_v47  ;;  %v2041_v47 = vrot.slane %v3812_v45, %v3927_v6 }
 0x351   :  { %v2304_v32 = vadd.f32 %v2296_v56, %v2224_v18 }
 0x352   :  { %v2084_v55 = vpop.permute.xlu1 %2083  ;;  %3069 = vrot.lane.b32.xlu1 %v3853_v2, %s3864_s19  ;;  %v2168_v2 = vpop.permute.xlu0 %2167  ;;  %v2065_v58 = vadd.f32 %v2057_v5, %v1985_v9  ;;  %v1969_v5 = vrot.slane %v3812_v45, %v3933_v8 }
 0x353   :  { %v2137_v30 = vmul.f32 %v2117_v42, %v2084_v55  ;;  %v2384_v63 = vadd.f32 %v2376_v10, %v2304_v32  ;;  %v2218_v10 = vmul.f32 %v2201_v61, %v2168_v2 }
 0x355   :  { %v2145_v44 = vadd.f32 %v2137_v30, %v2065_v58  ;;  %v2464_v12 = vadd.f32 %v2456_v15, %v2384_v63  ;;  %v3813_v58 = vld [vmem:[%s5294_s1 + $0x28] sm:$0xff]  ;;  %v2361_v63 = vrot.slane %v3812_v45, %v4068_v62 }
 0x356   :  { %2863 = vrot.lane.b32.xlu1 %v4913_v51, %s3865_s22  ;;  %v2248_v19 = vpop.permute.xlu0 %2247  ;;  %v1973_v18 = vrot.slane %v3813_v58, %v3933_v8  ;;  %v2205_v32 = vrot.slane %v3813_v58, %v4005_v33 }
 0x357   :  { %v2244_v46 = vpop.permute.xlu1 %2243  ;;  %v2225_v35 = vadd.f32 %v2217_v11, %v2145_v44  ;;  %v2544_v26 = vadd.f32 %v2536_v21, %v2464_v12 }
 0x358   :  { %v2297_v31 = vmul.f32 %v2277_v39, %v2244_v46  ;;  %v2045_v39 = vrot.slane %v3813_v58, %v3927_v6 }
 0x359   :  { %v2552_v43 = vadd.f32 %v4887_v0, %v2544_v26  ;;  %v2121_v0 = vrot.slane %v3812_v45, %v3975_v23 }
 0x35a   :  { %v2305_v34 = vadd.f32 %v2297_v31, %v2225_v35  ;;  %v2408_v38 = vpop.permute.xlu0 %2407 }
 0x35b   :  { %v2138_v46 = vmul.f32 %v2121_v0, %v4900_v57 }
 0x35c   :  { %v2324_v22 = vpop.permute.xlu1 %2323 }
 0x35d   :  { %v2377_v49 = vmul.f32 %v2357_v3, %v2324_v22  ;;  %v2125_v22 = vrot.slane %v3813_v58, %v3975_v23 }
 0x35e   :  { %v2012_v4 = vpop.permute.xlu0 %2011 }
 0x35f   :  { %v2385_v52 = vadd.f32 %v2377_v49, %v2305_v34  ;;  %v2059_v35 = vmul.f32 %v2045_v39, %v2012_v4  ;;  %v2285_v49 = vrot.slane %v3813_v58, %v4040_v48  ;;  %v2365_v34 = vrot.slane %v3813_v58, %v4068_v62 }
 0x361   :  { %v2404_v28 = vpop.permute.xlu1 %2403 }
 0x362   :  { %v2457_v53 = vmul.f32 %v2437_v36, %v2404_v28  ;;  %v2332_v29 = vpop.permute.xlu0 %2331  ;;  %v2441_v28 = vrot.slane %v3812_v45, %v4083_v20 }
 0x364   :  { %v2465_v41 = vadd.f32 %v2457_v53, %v2385_v52  ;;  %v2458_v26 = vmul.f32 %v2441_v28, %v2408_v38 }
 0x366   :  { %v2484_v16 = vpop.permute.xlu1 %2483  ;;  %v4940_v25 = vpop.permute.xlu0 %1942 }
 0x367   :  { %v2537_v50 = vmul.f32 %v2517_v14, %v2484_v16 }
 0x369   :  { %v2545_v27 = vadd.f32 %v2537_v50, %v2465_v41  ;;  %v2521_v41 = vrot.slane %v3812_v45, %v4098_v37  ;;  %v2445_v50 = vrot.slane %v3813_v58, %v4083_v20 }
 0x36a   :  { %v4946_v7 = vpop.permute.xlu0 %2019 }
 0x36b   :  { %v2553_v55 = vadd.f32 %v3811_v59, %v2545_v27  ;;  %v2008_v60 = vpop.permute.xlu1 %2007  ;;  %v1986_v59 = vmul.f32 %v1969_v5, %v4882_v40  ;;  %v2281_v40 = vrot.slane %v3812_v45, %v4040_v48  ;;  %v2379_v27 = vmul.f32 %v2365_v34, %v2332_v29 }
 0x36c   :  { %v2058_v1 = vmul.f32 %v2041_v47, %v2008_v60 }
 0x36d   :  { %v2559_v42 = vpack.c.bf16 %v2553_v55, %v2552_v43  ;;  %v2298_v3 = vmul.f32 %v2281_v40, %v2248_v19  ;;  %v2525_v55 = vrot.slane %v3813_v58, %v4098_v37 }
 0x36e   :  { %v2066_v9 = vadd.f32 %v2058_v1, %v1986_v59  ;;  %v4955_v24 = vpop.permute.xlu0 %2259 }
 0x36f   :  { %3481 = vmatmul.mubr.bf16.vlgmr.msra.gmra.mxu0 %v2559_v42 }
 0x370   :  { %v2328_v17 = vpop.permute.xlu1 %2327  ;;  %v2146_v56 = vadd.f32 %v2138_v46, %v2066_v9 }
 0x371   :  { %v2378_v12 = vmul.f32 %v2361_v63, %v2328_v17 }
 0x372   :  { %v2226_v57 = vadd.f32 %v2218_v10, %v2146_v56  ;;  %v4962_v53 = vpop.permute.xlu0 %2419 }
 0x374   :  { %v2306_v2 = vadd.f32 %v2298_v3, %v2226_v57 }
 0x375   :  { %v2488_v54 = vpop.permute.xlu1 %2487 }
 0x376   :  { %v2386_v21 = vadd.f32 %v2378_v12, %v2306_v2  ;;  %v2492_v43 = vpop.permute.xlu0 %2491  ;;  %v2538_v47 = vmul.f32 %v2521_v41, %v2488_v54  ;;  %v3814_v54 = vld [vmem:[%s5294_s1 + $0x38] sm:$0xff] }
 0x377   :  { %v2539_v1 = vmul.f32 %v2525_v55, %v2492_v43  ;;  %v1981_v39 = vrot.slane %v3814_v54, %v3933_v8  ;;  %v2133_v57 = vrot.slane %v3814_v54, %v3975_v23 }
 0x378   :  { %v2466_v60 = vadd.f32 %v2458_v26, %v2386_v21 }
 0x37a   :  { %v1938_v30 = vpop.permute.xlu1 %1937  ;;  %v2546_v59 = vadd.f32 %v2538_v47, %v2466_v60  ;;  %v2453_v60 = vrot.slane %v3814_v54, %v4083_v20 }
 0x37b   :  { %v1987_v11 = vmul.f32 %v1973_v18, %v1938_v30 }
 0x37c   :  { %v2554_v38 = vadd.f32 %v3812_v45, %v2546_v59  ;;  %v3815_v45 = vld [vmem:[%s5294_s1 + $0x30] sm:$0xff]  ;;  %s3866_s1 = smov 98  }
 0x37d   :  { %v2067_v15 = vadd.f32 %v2059_v35, %v1987_v11  ;;  %v1977_v3 = vrot.slane %v3815_v45, %v3933_v8  ;;  %v2129_v35 = vrot.slane %v3815_v45, %v3975_v23  ;;  %v2289_v28 = vrot.slane %v3815_v45, %v4040_v48 }
 0x37e   :  { %v2449_v41 = vrot.slane %v3815_v45, %v4083_v20 }
 0x37f   :  { %v2092_v44 = vpop.permute.xlu1 %2091  ;;  %v1988_v12 = vmul.f32 %v1977_v3, %v4940_v25 }
 0x380   :  { %v2139_v31 = vmul.f32 %v2125_v22, %v2092_v44  ;;  %v2053_v22 = vrot.slane %v3814_v54, %v3927_v6 }
 0x382   :  { %v2147_v14 = vadd.f32 %v2139_v31, %v2067_v15  ;;  %v2061_v63 = vmul.f32 %v2053_v22, %v4946_v7  ;;  %v2209_v15 = vrot.slane %v3815_v45, %v4005_v33  ;;  %v2369_v7 = vrot.slane %v3815_v45, %v4068_v62 }
 0x384   :  { %v2172_v36 = vpop.permute.xlu1 %2171 }
 0x385   :  { %v2219_v13 = vmul.f32 %v2205_v32, %v2172_v36  ;;  %v2213_v36 = vrot.slane %v3814_v54, %v4005_v33 }
 0x387   :  { %v2227_v52 = vadd.f32 %v2219_v13, %v2147_v14 }
 0x389   :  { %v2252_v19 = vpop.permute.xlu1 %2251 }
 0x38a   :  { %v2299_v16 = vmul.f32 %v2285_v49, %v2252_v19  ;;  %v2293_v49 = vrot.slane %v3814_v54, %v4040_v48 }
 0x38c   :  { %v2307_v4 = vadd.f32 %v2299_v16, %v2227_v52  ;;  %v2373_v52 = vrot.slane %v3814_v54, %v4068_v62  ;;  %v2301_v33 = vmul.f32 %v2293_v49, %v4955_v24  ;;  %v2533_v24 = vrot.slane %v3814_v54, %v4098_v37 }
 0x38e   :  { %v2387_v42 = vadd.f32 %v2379_v27, %v2307_v4  ;;  %v2412_v17 = vpop.permute.xlu1 %2411 }
 0x38f   :  { %v2459_v5 = vmul.f32 %v2445_v50, %v2412_v17  ;;  %v2529_v50 = vrot.slane %v3815_v45, %v4098_v37 }
 0x391   :  { %v2467_v0 = vadd.f32 %v2459_v5, %v2387_v42 }
 0x393   :  { %v2547_v9 = vadd.f32 %v2539_v1, %v2467_v0  ;;  %v2016_v30 = vpop.permute.xlu1 %2015  ;;  %v2461_v1 = vmul.f32 %v2453_v60, %v4962_v53 }
 0x395   :  { %v2555_v46 = vadd.f32 %v3813_v58, %v2547_v9  ;;  %v2049_v58 = vrot.slane %v3815_v45, %v3927_v6 }
 0x397   :  { %v2560_v61 = vpack.c.bf16 %v2555_v46, %v2554_v38  ;;  %v2060_v2 = vmul.f32 %v2049_v58, %v2016_v30 }
 0x398   :  { %v2096_v56 = vpop.permute.xlu1 %2095 }
 0x399   :  { %3484 = vmatprep.mubr.bf16.mxu0 %v2560_v61  ;;  %v2140_v34 = vmul.f32 %v2129_v35, %v2096_v56  ;;  %v2068_v23 = vadd.f32 %v2060_v2, %v1988_v12 }
 0x39b   :  { %v2148_v16 = vadd.f32 %v2140_v34, %v2068_v23 }
 0x39d   :  { %v2176_v29 = vpop.permute.xlu1 %2175 }
 0x39e   :  { %v2220_v21 = vmul.f32 %v2209_v15, %v2176_v29 }
 0x3a0   :  { %v2228_v25 = vadd.f32 %v2220_v21, %v2148_v16 }
 0x3a2   :  { %v2256_v18 = vpop.permute.xlu1 %2255 }
 0x3a3   :  { %v2300_v26 = vmul.f32 %v2289_v28, %v2256_v18 }
 0x3a5   :  { %v2308_v43 = vadd.f32 %v2300_v26, %v2228_v25 }
 0x3a7   :  { %v2336_v10 = vpop.permute.xlu1 %2335 }
 0x3a8   :  { %v2380_v27 = vmul.f32 %v2369_v7, %v2336_v10 }
 0x3aa   :  { %v2388_v47 = vadd.f32 %v2380_v27, %v2308_v43 }
 0x3ac   :  { %v2416_v40 = vpop.permute.xlu1 %2415 }
 0x3ad   :  { %v2460_v42 = vmul.f32 %v2449_v41, %v2416_v40 }
 0x3af   :  { %v2468_v59 = vadd.f32 %v2460_v42, %v2388_v47 }
 0x3b1   :  { %v1948_v44 = vpop.permute.xlu1 %1947 }
 0x3b2   :  { %v1989_v11 = vmul.f32 %v1981_v39, %v1948_v44 }
 0x3b4   :  { %v2069_v13 = vadd.f32 %v2061_v63, %v1989_v11 }
 0x3b6   :  { %v2100_v32 = vpop.permute.xlu1 %2099 }
 0x3b7   :  { %v2141_v31 = vmul.f32 %v2133_v57, %v2100_v32 }
 0x3b9   :  { %v2149_v8 = vadd.f32 %v2141_v31, %v2069_v13 }
 0x3bb   :  { %v2180_v6 = vpop.permute.xlu1 %2179 }
 0x3bc   :  { %v2221_v14 = vmul.f32 %v2213_v36, %v2180_v6 }
 0x3be   :  { %v2229_v19 = vadd.f32 %v2221_v14, %v2149_v8 }
 0x3c0   :  { %v2340_v48 = vpop.permute.xlu1 %2339  ;;  %v2309_v4 = vadd.f32 %v2301_v33, %v2229_v19 }
 0x3c1   :  { %v2381_v55 = vmul.f32 %v2373_v52, %v2340_v48 }
 0x3c3   :  { %v2389_v62 = vadd.f32 %v2381_v55, %v2309_v4 }
 0x3c5   :  { %v2496_v17 = vpop.permute.xlu1 %2495  ;;  %v2469_v30 = vadd.f32 %v2461_v1, %v2389_v62 }
 0x3c6   :  { %v2540_v5 = vmul.f32 %v2529_v50, %v2496_v17 }
 0x3c8   :  { %v2548_v9 = vadd.f32 %v2540_v5, %v2468_v59 }
 0x3c9   :  { %v2500_v0 = vpop.permute.xlu1 %2499 }
 0x3ca   :  { %v2541_v38 = vmul.f32 %v2533_v24, %v2500_v0  ;;  %v2556_v61 = vadd.f32 %v3815_v45, %v2548_v9 }
 0x3cc   :  { %v2549_v46 = vadd.f32 %v2541_v38, %v2469_v30  ;;  %v5042_v30 = vpop.permute.xlu0 %2822 }
 0x3ce   :  { %v2557_v56 = vadd.f32 %v3814_v54, %v2549_v46  ;;  %v5046_v46 = vpop.permute.xlu1 %3069 }
 0x3d0   :  { %v2561_v29 = vpack.c.bf16 %v2557_v56, %v2556_v61 }
 0x3d2   :  { %3485 = vmatmul.mubr.bf16.gmra.mxu0 %v2561_v29 }
 0x42f   :  { %v3482_v20 = vpop.f32.mrf.mxu0 }
 0x430   :  { %v2700_v18 = vadd.f32 %v3482_v20, %v4913_v51  ;;  %3073 = vrot.lane.b32.xlu0 %v3482_v20, %s3864_s19  ;;  %2826 = vrot.lane.b32.xlu1 %v3482_v20, %s3863_s18  ;;  %v2973_v40 = vrot.slane %v3482_v20, 6  ;;  %v2781_v44 = vrot.slane %v3482_v20, 7 }
 0x431   :  { %v2660_v37 = vpop.f32.mrf.mxu0 }
 0x432   :  { %v2708_v53 = vmax.f32 %v2700_v18, 0.0  ;;  %v2698_v10 = vadd.f32 %v4913_v51, %v2660_v37  ;;  %v2971_v23 = vrot.slane %v2660_v37, 6  ;;  %v2779_v26 = vrot.slane %v2660_v37, 7 }
 0x433   :  { %v4997_v39 = vpop.f32.mrf.mxu0 }
 0x434   :  { %v2729_v54 = vsel %vm2714_vm9, %v2708_v53, -inf  ;;  %v2706_v22 = vmax.f32 %v2698_v10, 0.0  ;;  %v2701_v57 = vadd.f32 %v4997_v39, %v4913_v51  ;;  %2983 = vrot.lane.b32.xlu0 %v2973_v40, %s3866_s1  ;;  %3015 = vrot.lane.b32.xlu1 %v2781_v44, %s3867_s29  ;;  %v2782_v41 = vrot.slane %v4997_v39, 7 }
 0x435   :  { %v2730_v45 = vrot.slane %v2729_v54, 4  ;;  %v2663_v58 = vpop.f32.mrf.mxu0  ;;  %v2974_v62 = vrot.slane %v4997_v39, 6 }
 0x436   :  { %v2715_v11 = vsel %vm2714_vm9, %v2706_v22, -inf  ;;  %v2709_v32 = vmax.f32 %v2701_v57, 0.0  ;;  %v2699_v3 = vadd.f32 %v4913_v51, %v2663_v58  ;;  %v2972_v55 = vrot.slane %v2663_v58, 6 }
 0x437   :  { %v2731_v63 = vmax.f32 %v2729_v54, %v2730_v45  ;;  %v2716_v35 = vrot.slane %v2715_v11, 4  ;;  %v2780_v47 = vrot.slane %v2663_v58, 7 }
 0x438   :  { %v2736_v31 = vsel %vm2714_vm9, %v2709_v32, -inf  ;;  %v2707_v36 = vmax.f32 %v2699_v3, 0.0  ;;  %2791 = vrot.lane.b32.xlu0 %v2781_v44, %s3865_s22  ;;  %2820 = vrot.lane.b32.xlu1 %v2660_v37, %s3863_s18  ;;  %v5063_v32 = vpop.permute.xlu1 %2863 }
 0x439   :  { %v2717_v2 = vmax.f32 %v2715_v11, %v2716_v35  ;;  %v2737_v15 = vrot.slane %v2736_v31, 4  ;;  %v2732_v13 = vrot.slane %v2731_v63, 2  ;;  %v5061_v11 = vpop.permute.xlu0 %3110 }
 0x43a   :  { %v2722_v49 = vsel %vm2714_vm9, %v2707_v36, -inf }
 0x43b   :  { %v2718_v28 = vrot.slane %v2717_v2, 2  ;;  %v2738_v6 = vmax.f32 %v2736_v31, %v2737_v15  ;;  %v2723_v12 = vrot.slane %v2722_v49, 4  ;;  %v2733_v7 = vmax.f32 %v2731_v63, %v2732_v13 }
 0x43c   :  { %3067 = vrot.lane.b32.xlu0 %v2660_v37, %s3864_s19  ;;  %3075 = vrot.lane.b32.xlu1 %v4997_v39, %s3864_s19 }
 0x43d   :  { %v2719_v34 = vmax.f32 %v2717_v2, %v2718_v28  ;;  %v2739_v8 = vrot.slane %v2738_v6, 2  ;;  %v2724_v14 = vmax.f32 %v2722_v49, %v2723_v12  ;;  %v2734_v16 = vrot.slane %v2733_v7, 1 }
 0x43f   :  { %v2740_v21 = vmax.f32 %v2738_v6, %v2739_v8  ;;  %v2725_v19 = vrot.slane %v2724_v14, 2  ;;  %v2720_v52 = vrot.slane %v2719_v34, 1  ;;  %v2735_v4 = vmax.f32 %v2733_v7, %v2734_v16 }
 0x440   :  { %2979 = vrot.lane.b32.xlu0 %v2971_v23, %s3866_s1  ;;  %2824 = vrot.lane.b32.xlu1 %v2663_v58, %s3863_s18 }
 0x441   :  { %v2726_v33 = vmax.f32 %v2724_v14, %v2725_v19  ;;  %v2741_v48 = vrot.slane %v2740_v21, 1  ;;  %v2721_v25 = vmax.f32 %v2719_v34, %v2720_v52 }
 0x443   :  { %v2727_v50 = vrot.slane %v2726_v33, 1  ;;  %v2742_v60 = vmax.f32 %v2740_v21, %v2741_v48 }
 0x444   :  { %3011 = vrot.lane.b32.xlu0 %v2779_v26, %s3867_s29  ;;  %3017 = vrot.lane.b32.xlu1 %v2782_v41, %s3867_s29 }
 0x445   :  { %v2728_v27 = vmax.f32 %v2726_v33, %v2727_v50 }
 0x447   :  { %v3227_v43 = vsel %vm3226_vm10, %v2728_v27, %v2721_v25 }
 0x448   :  { %2787 = vrot.lane.b32.xlu0 %v2779_v26, %s3865_s22  ;;  %2981 = vrot.lane.b32.xlu1 %v2972_v55, %s3866_s1  ;;  %v3229_v42 = vsel %vm3228_vm11, %v2735_v4, %v3227_v43 }
 0x449   :  { %v5023_v17 = vsel %vm3230_vm12, %v2742_v60, %v3229_v42 }
 0x44c   :  { %2828 = vrot.lane.b32.xlu0 %v4997_v39, %s3863_s18  ;;  %3013 = vrot.lane.b32.xlu1 %v2780_v47, %s3867_s29 }
 0x450   :  { %2985 = vrot.lane.b32.xlu0 %v2974_v62, %s3866_s1  ;;  %2789 = vrot.lane.b32.xlu1 %v2780_v47, %s3865_s22 }
 0x454   :  { %2793 = vrot.lane.b32.xlu0 %v2782_v41, %s3865_s22 }
 0x458   :  { %3071 = vrot.lane.b32.xlu0 %v2663_v58, %s3864_s19 }
 0x492   :  { %v5033_v5 = vpop.f32.mrf.mxu0 }
 0x493   :  { %v2704_v24 = vadd.f32 %v5033_v5, %v4913_v51  ;;  %2834 = vrot.lane.b32.xlu1 %v5033_v5, %s3863_s18  ;;  %v2977_v9 = vrot.slane %v5033_v5, 6  ;;  %v2785_v20 = vrot.slane %v5033_v5, 7 }
 0x494   :  { %v2676_v1 = vpop.f32.mrf.mxu0 }
 0x495   :  { %v2712_v59 = vmax.f32 %v2704_v24, 0.0  ;;  %v2702_v0 = vadd.f32 %v4913_v51, %v2676_v1  ;;  %2830 = vrot.lane.b32.xlu0 %v2676_v1, %s3863_s18  ;;  %v2975_v57 = vrot.slane %v2676_v1, 6  ;;  %v2783_v13 = vrot.slane %v2676_v1, 7 }
 0x496   :  { %v5044_v38 = vpop.f32.mrf.mxu0 }
 0x497   :  { %v2757_v61 = vsel %vm2714_vm9, %v2712_v59, -inf  ;;  %v2710_v56 = vmax.f32 %v2702_v0, 0.0  ;;  %v2705_v29 = vadd.f32 %v5044_v38, %v4913_v51  ;;  %2991 = vrot.lane.b32.xlu1 %v2977_v9, %s3866_s1  ;;  %v2786_v14 = vrot.slane %v5044_v38, 7 }
 0x498   :  { %v2758_v18 = vrot.slane %v2757_v61, 4  ;;  %v5053_v37 = vpop.f32.mrf.mxu0 }
 0x499   :  { %v2743_v53 = vsel %vm2714_vm9, %v2710_v56, -inf  ;;  %v2713_v10 = vmax.f32 %v2705_v29, 0.0  ;;  %v2703_v40 = vadd.f32 %v4913_v51, %v5053_v37  ;;  %3023 = vrot.lane.b32.xlu0 %v2785_v20, %s3867_s29  ;;  %v2978_v29 = vrot.slane %v5044_v38, 6 }
 0x49a   :  { %v2759_v44 = vmax.f32 %v2757_v61, %v2758_v18  ;;  %v2744_v39 = vrot.slane %v2743_v53, 4 }
 0x49b   :  { %v2764_v54 = vsel %vm2714_vm9, %v2713_v10, -inf  ;;  %v2711_v22 = vmax.f32 %v2703_v40, 0.0  ;;  %2799 = vrot.lane.b32.xlu1 %v2785_v20, %s3865_s22  ;;  %v2976_v10 = vrot.slane %v5053_v37, 6 }
 0x49c   :  { %v2745_v45 = vmax.f32 %v2743_v53, %v2744_v39  ;;  %v2765_v58 = vrot.slane %v2764_v54, 4  ;;  %v2760_v3 = vrot.slane %v2759_v44, 2 }
 0x49d   :  { %v2750_v63 = vsel %vm2714_vm9, %v2711_v22, -inf  ;;  %2987 = vrot.lane.b32.xlu0 %v2975_v57, %s3866_s1  ;;  %v2784_v22 = vrot.slane %v5053_v37, 7 }
 0x49e   :  { %v2746_v51 = vrot.slane %v2745_v45, 2  ;;  %v2766_v35 = vmax.f32 %v2764_v54, %v2765_v58  ;;  %v2751_v31 = vrot.slane %v2750_v63, 4  ;;  %v2761_v49 = vmax.f32 %v2759_v44, %v2760_v3 }
 0x49f   :  { %3077 = vrot.lane.b32.xlu1 %v2676_v1, %s3864_s19 }
 0x4a0   :  { %v2747_v36 = vmax.f32 %v2745_v45, %v2746_v51  ;;  %v2752_v2 = vmax.f32 %v2750_v63, %v2751_v31  ;;  %v2767_v15 = vrot.slane %v2766_v35, 2  ;;  %v2762_v21 = vrot.slane %v2761_v49, 1 }
 0x4a1   :  { %2832 = vrot.lane.b32.xlu0 %v5053_v37, %s3863_s18 }
 0x4a2   :  { %v2748_v28 = vrot.slane %v2747_v36, 1  ;;  %v2753_v6 = vrot.slane %v2752_v2, 2  ;;  %v3074_v12 = vpop.permute.xlu0 %3073  ;;  %v2827_v34 = vpop.permute.xlu1 %2826  ;;  %v2768_v8 = vmax.f32 %v2766_v35, %v2767_v15  ;;  %v2763_v55 = vmax.f32 %v2761_v49, %v2762_v21 }
 0x4a3   :  { %3019 = vrot.lane.b32.xlu1 %v2783_v13, %s3867_s29 }
 0x4a4   :  { %v2754_v7 = vmax.f32 %v2752_v2, %v2753_v6  ;;  %v2749_v23 = vmax.f32 %v2747_v36, %v2748_v28  ;;  %v2769_v16 = vrot.slane %v2768_v8, 1 }
 0x4a5   :  { %3025 = vrot.lane.b32.xlu0 %v2786_v14, %s3867_s29 }
 0x4a6   :  { %v2755_v19 = vrot.slane %v2754_v7, 1  ;;  %v2984_v52 = vpop.permute.xlu0 %2983  ;;  %v3016_v33 = vpop.permute.xlu1 %3015  ;;  %v3233_v26 = vsel %vm3232_vm13, %v2749_v23, %v5023_v17  ;;  %v2770_v17 = vmax.f32 %v2768_v8, %v2769_v16 }
 0x4a7   :  { %v3005_v41 = vsel %vm1521_vm2, 0.0, %v2984_v52  ;;  %v3037_v48 = vsel %vm1512_vm1, 0.0, %v3016_v33  ;;  %v3045_v50 = vsel %vm1512_vm1, %v3016_v33, 0.0  ;;  %2795 = vrot.lane.b32.xlu1 %v2783_v13, %s3865_s22 }
 0x4a8   :  { %v3055_v25 = vadd.f32 %v3037_v48, %v3005_v41  ;;  %v3056_v27 = vadd.f32 %v3045_v50, %v2984_v52  ;;  %v2756_v4 = vmax.f32 %v2754_v7, %v2755_v19 }
 0x4a9   :  { %2801 = vrot.lane.b32.xlu0 %v2786_v14, %s3865_s22 }
 0x4aa   :  { %v3098_v60 = vadd.f32 %v3074_v12, %v3055_v25  ;;  %v3099_v43 = vadd.f32 %v5046_v46, %v3056_v27  ;;  %v2792_v42 = vpop.permute.xlu0 %2791  ;;  %v3235_v47 = vsel %vm3234_vm14, %v2756_v4, %v3233_v26 }
 0x4ab   :  { %v2813_v62 = vsel %vm1512_vm1, 0.0, %v2792_v42  ;;  %v2852_v24 = vadd.f32 %v5042_v30, %v2792_v42  ;;  %2836 = vrot.lane.b32.xlu1 %v5044_v38, %s3863_s18  ;;  %v3237_v1 = vsel %vm3236_vm15, %v2763_v55, %v3235_v47 }
 0x4ac   :  { %v3117_v59 = vadd.f32 %v5061_v11, %v3098_v60  ;;  %v3118_v0 = vadd.f32 %v5061_v11, %v3099_v43  ;;  %v2851_v9 = vadd.f32 %v2827_v34, %v2813_v62  ;;  %v5090_v61 = vsel %vm3238_vm0, %v2770_v17, %v3237_v1 }
 0x4ad   :  { %v2871_v56 = vadd.f32 %v5063_v32, %v2852_v24  ;;  %3079 = vrot.lane.b32.xlu0 %v5053_v37, %s3864_s19  ;;  %v2821_v37 = vpop.permute.xlu1 %2820 }
 0x4ae   :  { %v3133_v20 = vmax.f32 %v3117_v59, 0.0  ;;  %v3134_v18 = vmax.f32 %v3118_v0, 0.0  ;;  %v2870_v53 = vadd.f32 %v5063_v32, %v2851_v9  ;;  %v3068_v63 = vpop.permute.xlu0 %3067 }
 0x4af   :  { %v2887_v40 = vmax.f32 %v2871_v56, 0.0  ;;  %2993 = vrot.lane.b32.xlu1 %v2978_v29, %s3866_s1 }
 0x4b0   :  { %v3164_v44 = vsel %vm2714_vm9, %v3133_v20, -inf  ;;  %v3165_v39 = vsel %vm3146_vm3, %v3134_v18, -inf  ;;  %v2886_v54 = vmax.f32 %v2870_v53, 0.0 }
 0x4b1   :  { %v5102_v57 = vmax.f32 %v3164_v44, %v3165_v39  ;;  %v2918_v45 = vsel %vm2899_vm4, %v2887_v40, -inf  ;;  %2989 = vrot.lane.b32.xlu0 %v2976_v10, %s3866_s1  ;;  %v3076_v51 = vpop.permute.xlu1 %3075 }
 0x4b2   :  { %v2917_v58 = vsel %vm2714_vm9, %v2886_v54, -inf  ;;  %v2980_v35 = vpop.permute.xlu0 %2979 }
 0x4b3   :  { %v5107_v3 = vmax.f32 %v2917_v58, %v2918_v45  ;;  %3021 = vrot.lane.b32.xlu1 %v2784_v22, %s3867_s29  ;;  %v3167_v20 = vrot.slane %v5102_v57, 4 }
 0x4b5   :  { %3081 = vrot.lane.b32.xlu0 %v5033_v5, %s3864_s19  ;;  %v2825_v31 = vpop.permute.xlu1 %2824  ;;  %v3003_v5 = vsel %vm1521_vm2, 0.0, %v2980_v35 }
 0x4b6   :  { %v3012_v36 = vpop.permute.xlu0 %3011 }
 0x4b7   :  { %2797 = vrot.lane.b32.xlu1 %v2784_v22, %s3865_s22  ;;  %v3035_v13 = vsel %vm1512_vm1, 0.0, %v3012_v36  ;;  %v3043_v49 = vsel %vm1512_vm1, %v3012_v36, 0.0 }
 0x4b8   :  { %v3051_v6 = vadd.f32 %v3035_v13, %v3003_v5  ;;  %v3052_v34 = vadd.f32 %v3043_v49, %v2980_v35 }
 0x4b9   :  { %v3018_v2 = vpop.permute.xlu1 %3017 }
 0x4ba   :  { %v2788_v15 = vpop.permute.xlu0 %2787  ;;  %v3094_v8 = vadd.f32 %v3068_v63, %v3051_v6  ;;  %v3095_v14 = vadd.f32 %v5046_v46, %v3052_v34  ;;  %v3038_v48 = vsel %vm1512_vm1, 0.0, %v3018_v2  ;;  %v3046_v50 = vsel %vm1512_vm1, %v3018_v2, 0.0 }
 0x4bb   :  { %3083 = vrot.lane.b32.xlu1 %v5044_v38, %s3864_s19  ;;  %v2811_v21 = vsel %vm1512_vm1, 0.0, %v2788_v15  ;;  %v2848_v26 = vadd.f32 %v5042_v30, %v2788_v15  ;;  %v2920_v63 = vrot.slane %v5107_v3, 4 }
 0x4bc   :  { %v3113_v23 = vadd.f32 %v5061_v11, %v3094_v8  ;;  %v3114_v19 = vadd.f32 %v5061_v11, %v3095_v14  ;;  %v2847_v16 = vadd.f32 %v2821_v37, %v2811_v21  ;;  %v3168_v37 = vmax.f32 %v5102_v57, %v3167_v20 }
 0x4bd   :  { %v2982_v28 = vpop.permute.xlu1 %2981  ;;  %v2867_v42 = vadd.f32 %v5063_v32, %v2848_v26  ;;  %v2921_v8 = vmax.f32 %v5107_v3, %v2920_v63 }
 0x4be   :  { %v2829_v12 = vpop.permute.xlu0 %2828  ;;  %v3129_v41 = vmax.f32 %v3113_v23, 0.0  ;;  %v3130_v27 = vmax.f32 %v3114_v19, 0.0  ;;  %v2866_v43 = vadd.f32 %v5063_v32, %v2847_v16  ;;  %v3004_v56 = vsel %vm1521_vm2, 0.0, %v2982_v28 }
 0x4bf   :  { %v2883_v40 = vmax.f32 %v2867_v42, 0.0 }
 0x4c0   :  { %v3145_v1 = vsel %vm2714_vm9, %v3129_v41, -inf  ;;  %v3147_v59 = vsel %vm3146_vm3, %v3130_v27, -inf  ;;  %v2882_v54 = vmax.f32 %v2866_v43, 0.0 }
 0x4c1   :  { %v3014_v38 = vpop.permute.xlu1 %3013  ;;  %v3148_v10 = vmax.f32 %v3145_v1, %v3147_v59  ;;  %v2900_v36 = vsel %vm2899_vm4, %v2883_v40, -inf }
 0x4c2   :  { %v2986_v7 = vpop.permute.xlu0 %2985  ;;  %v3036_v17 = vsel %vm1512_vm1, 0.0, %v3014_v38  ;;  %v3044_v47 = vsel %vm1512_vm1, %v3014_v38, 0.0  ;;  %v2898_v13 = vsel %vm2714_vm9, %v2882_v54, -inf }
 0x4c3   :  { %v3006_v52 = vsel %vm1521_vm2, 0.0, %v2986_v7  ;;  %v3058_v55 = vadd.f32 %v3046_v50, %v2986_v7  ;;  %v3054_v18 = vadd.f32 %v3044_v47, %v2982_v28  ;;  %v3053_v53 = vadd.f32 %v3036_v17, %v3004_v56 }
 0x4c4   :  { %v3057_v4 = vadd.f32 %v3038_v48, %v3006_v52  ;;  %v2901_v23 = vmax.f32 %v2898_v13, %v2900_v36  ;;  %v3169_v52 = vrot.slane %v3168_v37, 2  ;;  %v2922_v48 = vrot.slane %v2921_v8, 2 }
 0x4c5   :  { %v2790_v33 = vpop.permute.xlu1 %2789  ;;  %v3101_v9 = vadd.f32 %v5046_v46, %v3058_v55 }
 0x4c6   :  { %v2794_v25 = vpop.permute.xlu0 %2793  ;;  %v2812_v60 = vsel %vm1512_vm1, 0.0, %v2790_v33  ;;  %v2850_v24 = vadd.f32 %v5042_v30, %v2790_v33  ;;  %v3100_v0 = vadd.f32 %v3076_v51, %v3057_v4  ;;  %v3097_v51 = vadd.f32 %v5046_v46, %v3054_v18 }
 0x4c7   :  { %v2849_v62 = vadd.f32 %v2825_v31, %v2812_v60  ;;  %v3120_v45 = vadd.f32 %v5061_v11, %v3101_v9  ;;  %v2814_v35 = vsel %vm1512_vm1, 0.0, %v2794_v25  ;;  %v3149_v31 = vrot.slane %v3148_v10, 4 }
 0x4c8   :  { %v2869_v39 = vadd.f32 %v5063_v32, %v2850_v24  ;;  %v3119_v22 = vadd.f32 %v5061_v11, %v3100_v0  ;;  %v2853_v34 = vadd.f32 %v2829_v12, %v2814_v35  ;;  %v2854_v57 = vadd.f32 %v5042_v30, %v2794_v25 }
 0x4c9   :  { %v2868_v44 = vadd.f32 %v5063_v32, %v2849_v62  ;;  %v3136_v28 = vmax.f32 %v3120_v45, 0.0  ;;  %v3116_v38 = vadd.f32 %v5061_v11, %v3097_v51  ;;  %v3150_v7 = vmax.f32 %v3148_v10, %v3149_v31 }
 0x4ca   :  { %v3072_v29 = vpop.permute.xlu0 %3071  ;;  %v2885_v15 = vmax.f32 %v2869_v39, 0.0  ;;  %v3135_v49 = vmax.f32 %v3119_v22, 0.0  ;;  %v2872_v3 = vadd.f32 %v5063_v32, %v2853_v34  ;;  %v2873_v41 = vadd.f32 %v5063_v32, %v2854_v57 }
 0x4cb   :  { %v3096_v58 = vadd.f32 %v3072_v29, %v3053_v53  ;;  %v2884_v2 = vmax.f32 %v2868_v44, 0.0  ;;  %v3174_v16 = vsel %vm3146_vm3, %v3136_v28, -inf  ;;  %v3132_v50 = vmax.f32 %v3116_v38, 0.0 }
 0x4cc   :  { %v2909_v19 = vsel %vm2899_vm4, %v2885_v15, -inf  ;;  %v3173_v33 = vsel %vm2714_vm9, %v3135_v49, -inf  ;;  %v3151_v4 = vrot.slane %v3150_v7, 2  ;;  %v2902_v55 = vrot.slane %v2901_v23, 4 }
 0x4cd   :  { %v3115_v5 = vadd.f32 %v5061_v11, %v3096_v58  ;;  %v2908_v21 = vsel %vm2714_vm9, %v2884_v2, -inf  ;;  %v3175_v60 = vmax.f32 %v3173_v33, %v3174_v16  ;;  %v3170_v43 = vmax.f32 %v3168_v37, %v3169_v52 }
 0x4ce   :  { %v2910_v25 = vmax.f32 %v2908_v21, %v2909_v19  ;;  %v2888_v47 = vmax.f32 %v2872_v3, 0.0  ;;  %v2889_v62 = vmax.f32 %v2873_v41, 0.0  ;;  %v2923_v24 = vmax.f32 %v2921_v8, %v2922_v48 }
 0x4cf   :  { %v3131_v12 = vmax.f32 %v3115_v5, 0.0  ;;  %v3156_v59 = vsel %vm3146_vm3, %v3132_v50, -inf  ;;  %v3152_v56 = vmax.f32 %v3150_v7, %v3151_v4  ;;  %v2903_v29 = vmax.f32 %v2901_v23, %v2902_v55 }
 0x4d0   :  { %v2911_v1 = vrot.slane %v2910_v25, 4  ;;  %v3176_v20 = vrot.slane %v3175_v60, 4  ;;  %v3171_v53 = vrot.slane %v3170_v43, 1  ;;  %v2926_v44 = vsel %vm2714_vm9, %v2888_v47, -inf }
 0x4d1   :  { %v3155_v42 = vsel %vm2714_vm9, %v3131_v12, -inf  ;;  %v2927_v39 = vsel %vm2899_vm4, %v2889_v62, -inf  ;;  %v2924_v45 = vrot.slane %v2923_v24, 1  ;;  %v3153_v63 = vrot.slane %v3152_v56, 1 }
 0x4d2   :  { %v3157_v18 = vmax.f32 %v3155_v42, %v3156_v59  ;;  %v2912_v58 = vmax.f32 %v2910_v25, %v2911_v1  ;;  %v2904_v51 = vrot.slane %v2903_v29, 2  ;;  %v3177_v35 = vmax.f32 %v3175_v60, %v3176_v20 }
 0x4d3   :  { %v5173_v36 = vmax.f32 %v3170_v43, %v3171_v53  ;;  %v2928_v2 = vmax.f32 %v2926_v44, %v2927_v39  ;;  %v5181_v57 = vmax.f32 %v2923_v24, %v2924_v45  ;;  %v5185_v21 = vmax.f32 %v3152_v56, %v3153_v63 }
 0x4d4   :  { %v3158_v31 = vrot.slane %v3157_v18, 4  ;;  %v2913_v8 = vrot.slane %v2912_v58, 2  ;;  %v5187_v19 = vmax.f32 %v2903_v29, %v2904_v51  ;;  %v3178_v52 = vrot.slane %v3177_v35, 2 }
 0x4d5   :  { %v2929_v16 = vrot.slane %v2928_v2, 4 }
 0x4d6   :  { %v3159_v33 = vmax.f32 %v3157_v18, %v3158_v31  ;;  %v5193_v60 = vmax.f32 %v2912_v58, %v2913_v8  ;;  %v2906_v31 = vrot.slane %v5187_v19, 1 }
 0x4d7   :  { %v5208_v45 = vmax.f32 %v2928_v2, %v2929_v16 }
 0x4d8   :  { %v3160_v62 = vrot.slane %v3159_v33, 2  ;;  %v2915_v8 = vrot.slane %v5193_v60, 1 }
 0x505   :  { %v2835_v6 = vpop.permute.xlu1 %2834 }
 0x507   :  { %v5151_v14 = vpop.permute.xlu0 %2830 }
 0x509   :  { %v5157_v26 = vpop.permute.xlu1 %2991 }
 0x50b   :  { %v5161_v27 = vpop.permute.xlu0 %3023 }
 0x50c   :  { %v3049_v54 = vsel %vm1512_vm1, %v5161_v27, 0.0 }
 0x50d   :  { %v2800_v17 = vpop.permute.xlu1 %2799  ;;  %v3064_v15 = vadd.f32 %v3049_v54, %v5157_v26 }
 0x50e   :  { %v2817_v0 = vsel %vm1512_vm1, 0.0, %v2800_v17  ;;  %v2860_v10 = vadd.f32 %v5042_v30, %v2800_v17 }
 0x50f   :  { %v2988_v9 = vpop.permute.xlu0 %2987  ;;  %v2859_v22 = vadd.f32 %v2835_v6, %v2817_v0  ;;  %v3107_v12 = vadd.f32 %v5046_v46, %v3064_v15  ;;  %v5213_v15 = vmax.f32 %v3159_v33, %v3160_v62 }
 0x510   :  { %v2879_v13 = vadd.f32 %v5063_v32, %v2860_v10  ;;  %v3007_v5 = vsel %vm1521_vm2, 0.0, %v2988_v9 }
 0x511   :  { %v3078_v40 = vpop.permute.xlu1 %3077  ;;  %v2878_v28 = vadd.f32 %v5063_v32, %v2859_v22  ;;  %v3126_v0 = vadd.f32 %v5061_v11, %v3107_v12  ;;  %v2931_v12 = vrot.slane %v5208_v45, 2 }
 0x512   :  { %v2895_v25 = vmax.f32 %v2879_v13, 0.0 }
 0x513   :  { %v5171_v37 = vpop.permute.xlu0 %2832  ;;  %v2894_v50 = vmax.f32 %v2878_v28, 0.0 }
 0x514   :  { %v2954_v53 = vsel %vm2899_vm4, %v2895_v25, -inf }
 0x515   :  { %v3020_v49 = vpop.permute.xlu1 %3019  ;;  %v2953_v18 = vsel %vm2714_vm9, %v2894_v50, -inf }
 0x516   :  { %v3039_v6 = vsel %vm1512_vm1, 0.0, %v3020_v49  ;;  %v3047_v34 = vsel %vm1512_vm1, %v3020_v49, 0.0  ;;  %v2955_v13 = vmax.f32 %v2953_v18, %v2954_v53 }
 0x517   :  { %v3059_v38 = vadd.f32 %v3039_v6, %v3007_v5  ;;  %v3060_v7 = vadd.f32 %v3047_v34, %v2988_v9  ;;  %v5183_v23 = vpop.permute.xlu0 %3025  ;;  %v5216_v5 = vmax.f32 %v3177_v35, %v3178_v52  ;;  %v3041_v6 = vsel %vm1512_vm1, 0.0, %v5161_v27 }
 0x518   :  { %v2956_v27 = vrot.slane %v2955_v13, 4 }
 0x519   :  { %v3102_v3 = vadd.f32 %v3078_v40, %v3059_v38  ;;  %v3103_v41 = vadd.f32 %v5046_v46, %v3060_v7  ;;  %v2796_v48 = vpop.permute.xlu1 %2795  ;;  %v3142_v38 = vmax.f32 %v3126_v0, 0.0  ;;  %v3050_v7 = vsel %vm1512_vm1, %v5183_v23, 0.0 }
 0x51a   :  { %v2815_v4 = vsel %vm1512_vm1, 0.0, %v2796_v48  ;;  %v2856_v55 = vadd.f32 %v5042_v30, %v2796_v48 }
 0x51b   :  { %v3121_v43 = vadd.f32 %v5061_v11, %v3102_v3  ;;  %v3122_v42 = vadd.f32 %v5061_v11, %v3103_v41  ;;  %v2855_v17 = vadd.f32 %v5151_v14, %v2815_v4  ;;  %v2802_v47 = vpop.permute.xlu0 %2801  ;;  %v3009_v3 = vsel %vm1521_vm2, 0.0, %v5157_v26 }
 0x51c   :  { %v2875_v24 = vadd.f32 %v5063_v32, %v2856_v55  ;;  %v2862_v1 = vadd.f32 %v5042_v30, %v2802_v47  ;;  %v2818_v59 = vsel %vm1512_vm1, 0.0, %v2802_v47  ;;  %v3162_v41 = vrot.slane %v5213_v15, 1 }
 0x51d   :  { %v3137_v9 = vmax.f32 %v3121_v43, 0.0  ;;  %v3138_v56 = vmax.f32 %v3122_v42, 0.0  ;;  %v2874_v29 = vadd.f32 %v5063_v32, %v2855_v17  ;;  %v2837_v20 = vpop.permute.xlu1 %2836  ;;  %v3063_v25 = vadd.f32 %v3041_v6, %v3009_v3 }
 0x51e   :  { %v2891_v14 = vmax.f32 %v2875_v24, 0.0  ;;  %v2861_v10 = vadd.f32 %v2837_v20, %v2818_v59  ;;  %v2881_v54 = vadd.f32 %v5063_v32, %v2862_v1  ;;  %v3201_v24 = vsel %vm3146_vm3, %v3142_v38, -inf }
 0x51f   :  { %v3182_v40 = vsel %vm2714_vm9, %v3137_v9, -inf  ;;  %v3183_v44 = vsel %vm3146_vm3, %v3138_v56, -inf  ;;  %v2890_v39 = vmax.f32 %v2874_v29, 0.0  ;;  %v3080_v22 = vpop.permute.xlu0 %3079  ;;  %v3042_v56 = vsel %vm1512_vm1, 0.0, %v5183_v23 }
 0x520   :  { %v3184_v58 = vmax.f32 %v3182_v40, %v3183_v44  ;;  %v2936_v63 = vsel %vm2899_vm4, %v2891_v14, -inf  ;;  %v2880_v51 = vadd.f32 %v5063_v32, %v2861_v10  ;;  %v2897_v16 = vmax.f32 %v2881_v54, 0.0 }
 0x521   :  { %v2935_v49 = vsel %vm2714_vm9, %v2890_v39, -inf  ;;  %v2994_v28 = vpop.permute.xlu1 %2993  ;;  %v2957_v14 = vmax.f32 %v2955_v13, %v2956_v27 }
 0x522   :  { %v2937_v2 = vmax.f32 %v2935_v49, %v2936_v63  ;;  %v2896_v34 = vmax.f32 %v2880_v51, 0.0  ;;  %v3185_v35 = vrot.slane %v3184_v58, 4  ;;  %v3066_v52 = vadd.f32 %v3050_v7, %v2994_v28 }
 0x523   :  { %v2990_v33 = vpop.permute.xlu0 %2989  ;;  %v2963_v17 = vsel %vm2899_vm4, %v2897_v16, -inf  ;;  %v3010_v59 = vsel %vm1521_vm2, 0.0, %v2994_v28 }
 0x524   :  { %v2938_v48 = vrot.slane %v2937_v2, 4  ;;  %v2962_v4 = vsel %vm2714_vm9, %v2896_v34, -inf  ;;  %v3008_v55 = vsel %vm1521_vm2, 0.0, %v2990_v33  ;;  %v3186_v1 = vmax.f32 %v3184_v58, %v3185_v35 }
 0x525   :  { %v3022_v50 = vpop.permute.xlu1 %3021  ;;  %v3109_v0 = vadd.f32 %v5046_v46, %v3066_v52  ;;  %v2964_v29 = vmax.f32 %v2962_v4, %v2963_v17  ;;  %v3065_v63 = vadd.f32 %v3042_v56, %v3010_v59  ;;  %vm3287_vm2 = vcmask 244736  }
 0x526   :  { %v3040_v43 = vsel %vm1512_vm1, 0.0, %v3022_v50  ;;  %v3048_v42 = vsel %vm1512_vm1, %v3022_v50, 0.0  ;;  %v2939_v10 = vmax.f32 %v2937_v2, %v2938_v48  ;;  %v3187_v51 = vrot.slane %v3186_v1, 2 }
 0x527   :  { %v3061_v47 = vadd.f32 %v3040_v43, %v3008_v55  ;;  %v3062_v26 = vadd.f32 %v3048_v42, %v2990_v33  ;;  %v3082_v62 = vpop.permute.xlu0 %3081  ;;  %v3128_v23 = vadd.f32 %v5061_v11, %v3109_v0  ;;  %v2965_v49 = vrot.slane %v2964_v29, 4 }
 0x528   :  { %v3106_v9 = vadd.f32 %v3082_v62, %v3063_v25  ;;  %v2940_v34 = vrot.slane %v2939_v10, 2  ;;  %v2932_v50 = vmax.f32 %v5208_v45, %v2931_v12  ;;  %v3188_v43 = vmax.f32 %v3186_v1, %v3187_v51 }
 0x529   :  { %v3104_v20 = vadd.f32 %v3080_v22, %v3061_v47  ;;  %v3105_v18 = vadd.f32 %v5046_v46, %v3062_v26  ;;  %v2798_v53 = vpop.permute.xlu1 %2797  ;;  %v3144_v52 = vmax.f32 %v3128_v23, 0.0  ;;  %v2966_v25 = vmax.f32 %v2964_v29, %v2965_v49 }
 0x52a   :  { %v3125_v40 = vadd.f32 %v5061_v11, %v3106_v9  ;;  %v2816_v44 = vsel %vm1512_vm1, 0.0, %v2798_v53  ;;  %v2858_v46 = vadd.f32 %v5042_v30, %v2798_v53  ;;  %v3163_v47 = vmax.f32 %v5213_v15, %v3162_v41 }
 0x52b   :  { %v3123_v39 = vadd.f32 %v5061_v11, %v3104_v20  ;;  %v3124_v54 = vadd.f32 %v5061_v11, %v3105_v18  ;;  %v2857_v58 = vadd.f32 %v5171_v37, %v2816_v44  ;;  %v2958_v26 = vrot.slane %v2957_v14, 2 }
 0x52c   :  { %v3141_v22 = vmax.f32 %v3125_v40, 0.0  ;;  %v2877_v7 = vadd.f32 %v5063_v32, %v2858_v46  ;;  %v2941_v59 = vmax.f32 %v2939_v10, %v2940_v34  ;;  %v2967_v12 = vrot.slane %v2966_v25, 2 }
 0x52d   :  { %v3139_v13 = vmax.f32 %v3123_v39, 0.0  ;;  %v3140_v28 = vmax.f32 %v3124_v54, 0.0  ;;  %v2876_v6 = vadd.f32 %v5063_v32, %v2857_v58  ;;  %v3084_v2 = vpop.permute.xlu1 %3083  ;;  %v3180_v1 = vrot.slane %v5216_v5, 1 }
 0x52e   :  { %v3200_v38 = vsel %vm2714_vm9, %v3141_v22, -inf  ;;  %v3108_v16 = vadd.f32 %v3084_v2, %v3065_v63  ;;  %v2893_v27 = vmax.f32 %v2877_v7, 0.0  ;;  %v2916_v20 = vmax.f32 %v5193_v60, %v2915_v8 }
 0x52f   :  { %v3191_v37 = vsel %vm2714_vm9, %v3139_v13, -inf  ;;  %v3192_v33 = vsel %vm3146_vm3, %v3140_v28, -inf  ;;  %v3202_v3 = vmax.f32 %v3200_v38, %v3201_v24  ;;  %v2892_v35 = vmax.f32 %v2876_v6, 0.0 }
 0x530   :  { %v3193_v30 = vmax.f32 %v3191_v37, %v3192_v33  ;;  %v3127_v48 = vadd.f32 %v5061_v11, %v3108_v16  ;;  %v2945_v42 = vsel %vm2899_vm4, %v2893_v27, -inf  ;;  %v3210_v11 = vsel %vm3146_vm3, %v3144_v52, -inf }
 0x531   :  { %v3203_v4 = vrot.slane %v3202_v3, 4  ;;  %v2944_v55 = vsel %vm2714_vm9, %v2892_v35, -inf  ;;  %v3189_v15 = vrot.slane %v3188_v43, 1  ;;  %v2933_v18 = vrot.slane %v2932_v50, 1 }
 0x532   :  { %v3194_v32 = vrot.slane %v3193_v30, 4  ;;  %v3143_v17 = vmax.f32 %v3127_v48, 0.0  ;;  %v2946_v24 = vmax.f32 %v2944_v55, %v2945_v42  ;;  %v3267_v53 = vsel %vm3226_vm10, %v3163_v47, %v5185_v21 }
 0x533   :  { %v3204_v62 = vmax.f32 %v3202_v3, %v3203_v4  ;;  %v2959_v44 = vmax.f32 %v2957_v14, %v2958_v26  ;;  %v2942_v39 = vrot.slane %v2941_v59, 1  ;;  %v2907_v63 = vmax.f32 %v5187_v19, %v2906_v31 }
 0x534   :  { %v3195_v0 = vmax.f32 %v3193_v30, %v3194_v32  ;;  %v3209_v45 = vsel %vm2714_vm9, %v3143_v17, -inf  ;;  %v2947_v56 = vrot.slane %v2946_v24, 4  ;;  %v2968_v22 = vmax.f32 %v2966_v25, %v2967_v12  ;;  %v3281_v32 = vld [vmem:[%s5298_s5] sm:$0xf]  ;;  %s3828_s5 = scalar_lea.vmem %s3373_s12, 64 }
 0x535   :  { %v3205_v9 = vrot.slane %v3204_v62, 2  ;;  %v3211_v29 = vmax.f32 %v3209_v45, %v3210_v11  ;;  %v3181_v60 = vmax.f32 %v5216_v5, %v3180_v1  ;;  %v3190_v8 = vmax.f32 %v3188_v43, %v3189_v15  ;;  %p3829_p5 = scmp.ne.s32.totalorder %s3373_s12, %s3828_s5  ;;  %p3834_p7 = scmp.lt.s32.totalorder %s3828_s5, %s3828_s5 }
 0x536   :  { %v3196_v41 = vrot.slane %v3195_v0, 2  ;;  %v2948_v10 = vmax.f32 %v2946_v24, %v2947_v56  ;;  %v3268_v21 = vsel %vm3228_vm11, %v5173_v36, %v3267_v53  ;;  %v2934_v49 = vmax.f32 %v2932_v50, %v2933_v18 }
 0x537   :  { %v3212_v40 = vrot.slane %v3211_v29, 4  ;;  %v3206_v58 = vmax.f32 %v3204_v62, %v3205_v9  ;;  %v3249_v28 = vsel %vm3226_vm10, %v2916_v20, %v2907_v63  ;;  %v2943_v6 = vmax.f32 %v2941_v59, %v2942_v39  ;;  %v3280_v62 = vld [vmem:[%s5297_s4] sm:$0xf]  ;;  %p3835_p8 = por %p3834_p7, %p3833_p6 }
 0x538   :  { %v3197_v54 = vmax.f32 %v3195_v0, %v3196_v41  ;;  %v2949_v51 = vrot.slane %v2948_v10, 2  ;;  %v2960_v34 = vrot.slane %v2959_v44, 1  ;;  %v2969_v31 = vrot.slane %v2968_v22, 1 }
 0x539   :  { %v3213_v23 = vmax.f32 %v3211_v29, %v3212_v40  ;;  %v3207_v2 = vrot.slane %v3206_v58, 1  ;;  %v3269_v16 = vsel %vm3230_vm12, %v3181_v60, %v3268_v21  ;;  %v3250_v5 = vsel %vm3228_vm11, %v5181_v57, %v3249_v28  ;;  %p3836_p9 = pnand %p3835_p8, %p3829_p5 }
 0x53a   :  { %v3198_v46 = vrot.slane %v3197_v54, 1  ;;  %v2950_v13 = vmax.f32 %v2948_v10, %v2949_v51  ;;  %v3270_v37 = vsel %vm3232_vm13, %v3190_v8, %v3269_v16  ;;  %v3251_v33 = vsel %vm3230_vm12, %v2934_v49, %v3250_v5 }
 0x53b   :  { %v3214_v14 = vrot.slane %v3213_v23, 2  ;;  %v2961_v52 = vmax.f32 %v2959_v44, %v2960_v34  ;;  %v3252_v30 = vsel %vm3232_vm13, %v2943_v6, %v3251_v33  ;;  %v3208_v27 = vmax.f32 %v3206_v58, %v3207_v2 }
 0x53c   :  { %v3199_v38 = vmax.f32 %v3197_v54, %v3198_v46  ;;  %v2951_v19 = vrot.slane %v2950_v13, 1  ;;  %v2970_v48 = vmax.f32 %v2968_v22, %v2969_v31  ;;  %vm3278_vm1 = vcmask 162816  }
 0x53d   :  { %v3215_v7 = vmax.f32 %v3213_v23, %v3214_v14 }
 0x53e   :  { %v2952_v36 = vmax.f32 %v2950_v13, %v2951_v19  ;;  %v3271_v35 = vsel %vm3234_vm14, %v3199_v38, %v3270_v37 }
 0x53f   :  { %v3216_v3 = vrot.slane %v3215_v7, 1  ;;  %v3272_v57 = vsel %vm3236_vm15, %v3208_v27, %v3271_v35 }
 0x540   :  { %v3253_v50 = vsel %vm3234_vm14, %v2952_v36, %v3252_v30 }
 0x541   :  { %v3217_v25 = vmax.f32 %v3215_v7, %v3216_v3  ;;  %v3254_v4 = vsel %vm3236_vm15, %v2961_v52, %v3253_v50 }
 0x542   :  { %v3255_v55 = vsel %vm3238_vm0, %v2970_v48, %v3254_v4 }
 0x543   :  { %v3273_v43 = vsel %vm3238_vm0, %v3217_v25, %v3272_v57  ;;  %3256 = vrot.lane.b32.xlu0 %v3255_v55, %s3868_s30 }
 0x544   :  { %3274 = vrot.lane.b32.xlu1 %v3273_v43, %s3869_s7 }
 0x547   :  { %3284 = vperm.xlu0 %3575, %v3281_v32  }
 0x5b5   :  { %v3257_v42 = vpop.permute.xlu0 %3256 }
 0x5b6   :  { %v3275_v17 = vpop.permute.xlu1 %3274  ;;  %v3277_v47 = vsel %vm2714_vm9, %v5090_v61, %v3257_v42 }
 0x5b7   :  { %v3279_v26 = vsel %vm3278_vm1, %v3277_v47, %v3275_v17 }
 0x5b8   :  { %3489 = vmatpush3.xpose.msk.msra.mxu1 %vm3287_vm2, %v3279_v26 }
 0x5bb   :  { %3491 = vmatmul.mubr.msk.f32.vlgmr.msra.gmra.mxu1 %vm3287_vm2, %v3280_v62 }
 0x5c2   :  { %v3285_v24 = vpop.permute.xlu0 %3284 }
 0x67b   :  { %v3360_v59 = vpop.f32.mrf.mxu1 }
 0x67c   :  { %v3361_v0 = vadd.f32 %v3360_v59, %v3285_v24 }
 0x67d   :  { %v3492_v11 = vpop.f32.mrf.mxu1 }
 0x67e   :  { %3365 = vst.msk [vmem:[#allocation6] sm:$0xf] %vm3364_vm5, %v3361_v0 }
 0x67f   :  { %3839 = shalt.err (!%p3836_p9)
}
 0x680   :  { %3375 = dma.vmem_to_hbm [thread:$0]  %s3373_s12, 64, %s5299_s6, [#allocation4]  }
 0x681   :  { %3850 = dma.done.wait [#allocation4], 64  }
 0x682   :  { %3851 = vsyncadd [#allocation4], 4294967232 }
 0x683   :  { %3379 = vsyncpa [#allocation4], 1 }
 0x684   :  { %3380 = vsyncpa [#allocation5], 1 }

</bundles_post_ra>
